<compile_context>
chip_gen: v7x
topology: tpu7x:2x2x1
jax: 0.10.0
libtpu: 0.0.40
codegen_flags: <defaults>
</compile_context>

<pallas_src>
import jax
import jax.numpy as jnp
from jax.experimental import pallas as pl
from jax.experimental.pallas import tpu as pltpu


# ----------------------------------------------------------------------------
# Kernel
# ----------------------------------------------------------------------------
def _gru_stack_kernel(x_ref, wih_ref, whh_ref, bgx_ref, bhn_ref, out_ref,
                      seq_ref, gx_ref):
    """Multi-layer unidirectional GRU over one batch block.

    x_ref   : (1, T*BB, HP) bf16  block-major, time-major-within-block input
    wih_ref : (L, HP, 3HP)  bf16  input->gates weights, gate order [r | z | n]
    whh_ref : (L, HP, 3HP)  bf16  hidden->gates weights
    bgx_ref : (L, 1, 3HP)   f32   b_ih + [b_hr, b_hz, 0] (folded into gx)
    bhn_ref : (L, 1, HP)    f32   b_hn (kept separate: lives under reset gate)
    out_ref : (T, BB, HP)   f32   last layer's hidden states (lane-dense)
    seq_ref : (T*BB, HP)    bf16  scratch: previous layer's outputs
    gx_ref  : (TC*BB, 3HP)  f32   scratch: input projection for one time chunk
    """
    T, BB, HP = out_ref.shape
    L = wih_ref.shape[0]
    TC = gx_ref.shape[0] // BB                           # time-chunk length

    for l in range(L):                                   # static -> unrolled
        # Hoisted out of the time loop (JAX does not CSE broadcast_in_dim).
        b_hn = jnp.broadcast_to(bhn_ref[l], (BB, HP))
        b_gx = bgx_ref[l]                                # (1, 3HP)
        last = l == L - 1

        h = jnp.zeros((BB, HP), jnp.float32)
        for c0 in range(0, T, TC):                       # static chunk loop
            tc = min(TC, T - c0)
            # --- batched input projection for this time chunk: one tall MXU
            #     matmul (tc*BB rows), bf16 operands, f32 accumulation. ------
            if l == 0:
                src = x_ref[0, c0 * BB:(c0 + tc) * BB, :]          # bf16
            else:
                src = seq_ref[c0 * BB:(c0 + tc) * BB, :]           # bf16
            gx_ref[:tc * BB, :] = (
                jnp.dot(src, wih_ref[l], preferred_element_type=jnp.float32)
                + b_gx)

            for dt in range(tc):                         # static recurrence
                t = c0 + dt
                # Re-read w_hh from VMEM every step instead of keeping a
                # (HP, 3HP) value live across the unrolled loop.
                gh = jnp.dot(h.astype(jnp.bfloat16), whh_ref[l],
                             preferred_element_type=jnp.float32)
                gxt = gx_ref[dt * BB:(dt + 1) * BB, :]   # 8-sublane aligned
                # Gate slices start at 128-lane boundaries -> whole-vreg reads.
                r = jax.nn.sigmoid(gxt[:, :HP] + gh[:, :HP])
                z = jax.nn.sigmoid(gxt[:, HP:2 * HP] + gh[:, HP:2 * HP])
                n = jnp.tanh(gxt[:, 2 * HP:] + r * (gh[:, 2 * HP:] + b_hn))
                h = (1.0 - z) * n + z * h
                if last:
                    out_ref[t] = h                       # lane-dense store
                else:
                    seq_ref[t * BB:(t + 1) * BB, :] = h.astype(seq_ref.dtype)


# ----------------------------------------------------------------------------
# Wrapper (padding, layout, pallas_call, linear head)
# ----------------------------------------------------------------------------
def _round_up(v, m):
    return (v + m - 1) // m * m


def _pad_gate_mat(w, H, HP):
    """(L, H, 3H) -> (L, HP, 3HP) bf16; each gate block padded to HP lanes."""
    L = w.shape[0]
    w4 = w.reshape(L, H, 3, H)
    w4 = jnp.pad(w4, ((0, 0), (0, HP - H), (0, 0), (0, HP - H)))
    return w4.reshape(L, HP, 3 * HP).astype(jnp.bfloat16)


def _pad_gate_vec(b, H, HP):
    """(L, 3H) -> (L, 3HP) f32; each gate block padded to HP lanes."""
    L = b.shape[0]
    b3 = b.reshape(L, 3, H)
    b3 = jnp.pad(b3, ((0, 0), (0, 0), (0, HP - H)))
    return b3.reshape(L, 3 * HP)


@jax.jit
def discriminator_forward(x, params):
    """x: (B, T, H) float32 (batch-first, like PyTorch). Returns (B, T, 1)."""
    B, T, H = x.shape
    L = params["w_ih"].shape[0]
    HP = _round_up(H, 128)              # lane-aligned hidden size

    # ---- adaptive batch block: big enough to feed the MXU, small enough to
    #      avoid vreg spills in the f32 gate math; >= 2 blocks when possible
    #      so v7x's two TensorCores both get work. --------------------------
    BB = min(64, _round_up(B, 8))
    Bp = _round_up(B, BB)
    if Bp // BB < 2 and BB >= 16:
        BB = _round_up(BB // 2, 8)
        Bp = _round_up(B, BB)
    nblk = Bp // BB
    TC = min(T, 32)                     # time-chunk for the gx scratch

    # ---- pad parameters so each gate occupies a 128-lane-aligned block ----
    # Zero rows/cols for padded dims keep the real lanes exact (padded hidden
    # lanes stay identically zero through the recurrence).
    w_ih = _pad_gate_mat(params["w_ih"], H, HP)          # (L, HP, 3HP) bf16
    w_hh = _pad_gate_mat(params["w_hh"], H, HP)          # (L, HP, 3HP) bf16
    b_ih = _pad_gate_vec(params["b_ih"], H, HP)          # (L, 3HP) f32
    b_hh = _pad_gate_vec(params["b_hh"], H, HP)          # (L, 3HP) f32
    # Fold b_ih and the r/z parts of b_hh into the batched input projection;
    # only b_hn must stay inside the recurrence (it sits under the reset gate).
    b_gx = (b_ih + b_hh.at[:, 2 * HP:].set(0.0)).reshape(L, 1, 3 * HP)
    b_hn = b_hh[:, 2 * HP:].reshape(L, 1, HP)

    # ---- pad + block-major, time-major-within-block, bf16; under jit these
    #      fuse into a single HBM copy. ------------------------------------
    x_p = jnp.pad(x, ((0, Bp - B), (0, 0), (0, HP - H)))     # (Bp, T, HP)
    x_blk = (x_p.reshape(nblk, BB, T, HP)
                .transpose(0, 2, 1, 3)                       # (nblk, T, BB, HP)
                .reshape(nblk, T * BB, HP)
                .astype(jnp.bfloat16))

    # ---- VMEM budget computed from the actual buffers (double-buffered
    #      pipeline inputs/outputs + scratch), clamped to the v7x-safe cap. --
    vmem_needed = (
        2 * (T * BB * HP * 2)                  # x block (bf16) x2 buffers
        + 2 * (T * BB * HP * 4)                # out block (f32) x2 buffers
        + 2 * 2 * (L * HP * 3 * HP * 2)        # w_ih + w_hh (bf16) x2 buffers
        + 2 * 2 * (L * (3 * HP + HP) * 4)      # biases (f32) x2 buffers
        + T * BB * HP * 2                      # seq scratch (bf16)
        + TC * BB * 3 * HP * 4                 # gx scratch (f32)
    )
    vmem_limit = int(min(max(2 * vmem_needed, 8 * 1024 * 1024),
                         64 * 1024 * 1024))

    out_tm = pl.pallas_call(
        _gru_stack_kernel,
        out_shape=jax.ShapeDtypeStruct((T, Bp, HP), jnp.float32),
        grid=(nblk,),
        in_specs=[
            pl.BlockSpec((1, T * BB, HP), lambda i: (i, 0, 0)),    # x (block-major)
            pl.BlockSpec((L, HP, 3 * HP), lambda i: (0, 0, 0)),    # w_ih
            pl.BlockSpec((L, HP, 3 * HP), lambda i: (0, 0, 0)),    # w_hh
            pl.BlockSpec((L, 1, 3 * HP), lambda i: (0, 0, 0)),     # folded gx bias
            pl.BlockSpec((L, 1, HP), lambda i: (0, 0, 0)),         # b_hn
        ],
        out_specs=pl.BlockSpec((T, BB, HP), lambda i: (0, i, 0)),
        scratch_shapes=[
            pltpu.VMEM((T * BB, HP), jnp.bfloat16),      # previous-layer hidden seq
            pltpu.VMEM((TC * BB, 3 * HP), jnp.float32),  # chunked input-gate buffer
        ],
        compiler_params=pltpu.CompilerParams(
            dimension_semantics=("parallel",),           # batch blocks split over TCs
            vmem_limit_bytes=vmem_limit,
        ),
    )(x_blk, w_ih, w_hh, b_gx, b_hn)

    # Linear(H, 1) head: a lane-dot, trivially cheap in XLA. Keeping it out of
    # the kernel keeps the kernel's output stores lane-dense (last dim = HP,
    # not 1).  Only the tiny (T, B, 1) logits get transposed back.
    # TODO(synk): for HP > 128, fold this head into the kernel (dot against
    #             w_out padded to (HP, 128)) to cut output HBM writeback.
    hseq = out_tm[:, :B, :H]                                 # (T, B, H)
    logits = jnp.dot(hseq, params["w_out"]) + params["b_out"][0, 0]
    return jnp.transpose(logits, (1, 0, 2))                  # (B, T, 1)


# ----------------------------------------------------------------------------
# Parameters + pure-JAX reference
# ----------------------------------------------------------------------------
def init_params(key, hidden_dim, num_layers):
    """Deterministic init matching PyTorch GRU/Linear shapes (uniform +-1/sqrt(H)).

    Weights are stored pre-transposed: (L, H, 3H) instead of (L, 3H, H)."""
    k = 1.0 / jnp.sqrt(jnp.float32(hidden_dim))
    ks = jax.random.split(key, 6)
    H, L = hidden_dim, num_layers
    u = lambda kk, shape: jax.random.uniform(kk, shape, jnp.float32, -k, k)
    return {
        "w_ih": u(ks[0], (L, H, 3 * H)),   # gate order [r | z | n]
        "w_hh": u(ks[1], (L, H, 3 * H)),
        "b_ih": u(ks[2], (L, 3 * H)),
        "b_hh": u(ks[3], (L, 3 * H)),
        "w_out": u(ks[4], (H, 1)),
        "b_out": u(ks[5], (1, 1)),
    }


def discriminator_ref(x, params):
    """Pure-JAX f32 reference (same GRU equations as torch.nn.GRU)."""
    B, T, H = x.shape
    L = params["w_ih"].shape[0]
    seq = x.astype(jnp.float32)
    for l in range(L):
        h = jnp.zeros((B, H), jnp.float32)
        outs = []
        for t in range(T):
            gx = seq[:, t, :] @ params["w_ih"][l] + params["b_ih"][l]
            gh = h @ params["w_hh"][l] + params["b_hh"][l]
            r = jax.nn.sigmoid(gx[:, :H] + gh[:, :H])
            z = jax.nn.sigmoid(gx[:, H:2 * H] + gh[:, H:2 * H])
            n = jnp.tanh(gx[:, 2 * H:] + r * gh[:, 2 * H:])
            h = (1.0 - z) * n + z * h
            outs.append(h)
        seq = jnp.stack(outs, axis=1)
    return seq @ params["w_out"] + params["b_out"][0, 0]


if __name__ == "__main__":
    B, T, H, L = 2, 8, 32, 2  # batch, seq_len, hidden_dim, num_layers
    key = jax.random.PRNGKey(0)
    kx, kp = jax.random.split(key)
    x = jax.random.normal(kx, (B, T, H), jnp.float32)
    params = init_params(kp, H, L)

    out = discriminator_forward(x, params)
    out = jax.block_until_ready(out)

    ref = discriminator_ref(x, params)
    assert out.shape == (B, T, 1), out.shape
    # bf16 matmul operands (f32 accumulation / gate math) compound a small
    # rounding error over the T-step recurrence -> looser tolerance than f32.
    err = float(jnp.max(jnp.abs(out - ref)))
    assert err < 5e-2, err
    print("KERNEL_OK")
</pallas_src>

<mosaic_0001>
module attributes {stable_mosaic.version = 11 : i64} {
  func.func @_gru_stack_kernel(%arg0: i32, %arg1: memref<1x64x128xbf16, #tpu.memory_space<vmem>>, %arg2: memref<2x128x384xbf16, #tpu.memory_space<vmem>>, %arg3: memref<2x128x384xbf16, #tpu.memory_space<vmem>>, %arg4: memref<2x1x384xf32, #tpu.memory_space<vmem>>, %arg5: memref<2x1x128xf32, #tpu.memory_space<vmem>>, %arg6: memref<8x8x128xf32, #tpu.memory_space<vmem>>, %arg7: memref<64x128xbf16, #tpu.memory_space<vmem>>, %arg8: memref<64x384xf32, #tpu.memory_space<vmem>>) attributes {dimension_semantics = [#tpu.dimension_semantics<parallel>], iteration_bounds = array<i64: 1>, scalar_prefetch = 0 : i64, scratch_operands = 2 : i64, tpu.core_type = #tpu.core_type<tc>, window_params = [{transform_indices = @transform_0, window_bounds = array<i64: 1, 64, 128>}, {pipeline_mode = #tpu.pipeline_mode<synchronous>, transform_indices = @transform_1, window_bounds = array<i64: 2, 128, 384>}, {pipeline_mode = #tpu.pipeline_mode<synchronous>, transform_indices = @transform_2, window_bounds = array<i64: 2, 128, 384>}, {pipeline_mode = #tpu.pipeline_mode<synchronous>, transform_indices = @transform_3, window_bounds = array<i64: 2, 1, 384>}, {pipeline_mode = #tpu.pipeline_mode<synchronous>, transform_indices = @transform_4, window_bounds = array<i64: 2, 1, 128>}, {transform_indices = @transform_5, window_bounds = array<i64: 8, 8, 128>}]} {
    %c0 = arith.constant 0 : index
    %c0_0 = arith.constant 0 : index
    %c0_1 = arith.constant 0 : index
    %0 = vector.load %arg5[%c0, %c0_0, %c0_1] : memref<2x1x128xf32, #tpu.memory_space<vmem>>, vector<1x1x128xf32>
    %1 = vector.shape_cast %0 : vector<1x1x128xf32> to vector<1x128xf32>
    %2 = vector.shape_cast %1 : vector<1x128xf32> to vector<1x128xf32>
    %3 = vector.broadcast %2 : vector<1x128xf32> to vector<8x128xf32>
    %c0_2 = arith.constant 0 : index
    %c0_3 = arith.constant 0 : index
    %c0_4 = arith.constant 0 : index
    %4 = vector.load %arg4[%c0_2, %c0_3, %c0_4] : memref<2x1x384xf32, #tpu.memory_space<vmem>>, vector<1x1x384xf32>
    %5 = vector.shape_cast %4 : vector<1x1x384xf32> to vector<1x384xf32>
    %cst = arith.constant 0.000000e+00 : f32
    %6 = vector.broadcast %cst : f32 to vector<8x128xf32>
    %c0_5 = arith.constant 0 : index
    %c0_6 = arith.constant 0 : index
    %c0_7 = arith.constant 0 : index
    %7 = vector.load %arg1[%c0_5, %c0_6, %c0_7] : memref<1x64x128xbf16, #tpu.memory_space<vmem>>, vector<1x64x128xbf16>
    %8 = vector.shape_cast %7 : vector<1x64x128xbf16> to vector<64x128xbf16>
    %c0_8 = arith.constant 0 : index
    %c0_9 = arith.constant 0 : index
    %c0_10 = arith.constant 0 : index
    %9 = vector.load %arg2[%c0_8, %c0_9, %c0_10] : memref<2x128x384xbf16, #tpu.memory_space<vmem>>, vector<1x128x384xbf16>
    %10 = vector.shape_cast %9 : vector<1x128x384xbf16> to vector<128x384xbf16>
    %cst_11 = arith.constant dense<0.000000e+00> : vector<64x384xf32>
    %11 = tpu.matmul %8, %10, %cst_11 {dimension_numbers = #tpu.dot_dimension_numbers<[1], [0], [0], [1], [0, 0, 1, 1], [], []>} : vector<64x128xbf16>, vector<128x384xbf16>, vector<64x384xf32> -> vector<64x384xf32>
    %12 = vector.broadcast %5 : vector<1x384xf32> to vector<64x384xf32>
    %13 = arith.addf %11, %12 : vector<64x384xf32>
    %c0_12 = arith.constant 0 : index
    %c0_13 = arith.constant 0 : index
    %14 = vector.load %arg8[%c0_12, %c0_13] : memref<64x384xf32, #tpu.memory_space<vmem>>, vector<64x384xf32>
    tpu.vector_store %arg8[%c0_12, %c0_13], %13 {strides = array<i32>} : memref<64x384xf32, #tpu.memory_space<vmem>>, vector<64x384xf32>,
    %15 = arith.truncf %6 : vector<8x128xf32> to vector<8x128xbf16>
    %c0_14 = arith.constant 0 : index
    %c0_15 = arith.constant 0 : index
    %c0_16 = arith.constant 0 : index
    %16 = vector.load %arg3[%c0_14, %c0_15, %c0_16] : memref<2x128x384xbf16, #tpu.memory_space<vmem>>, vector<1x128x384xbf16>
    %17 = vector.shape_cast %16 : vector<1x128x384xbf16> to vector<128x384xbf16>
    %cst_17 = arith.constant dense<0.000000e+00> : vector<8x384xf32>
    %18 = tpu.matmul %15, %17, %cst_17 {dimension_numbers = #tpu.dot_dimension_numbers<[1], [0], [0], [1], [0, 0, 1, 1], [], []>} : vector<8x128xbf16>, vector<128x384xbf16>, vector<8x384xf32> -> vector<8x384xf32>
    %c0_18 = arith.constant 0 : index
    %c0_19 = arith.constant 0 : index
    %19 = vector.load %arg8[%c0_18, %c0_19] : memref<64x384xf32, #tpu.memory_space<vmem>>, vector<8x384xf32>
    %20 = vector.extract_strided_slice %19 {offsets = [0, 0], sizes = [8, 128], strides = [1, 1]} : vector<8x384xf32> to vector<8x128xf32>
    %21 = vector.extract_strided_slice %18 {offsets = [0, 0], sizes = [8, 128], strides = [1, 1]} : vector<8x384xf32> to vector<8x128xf32>
    %22 = arith.addf %20, %21 : vector<8x128xf32>
    %23 = arith.negf %22 : vector<8x128xf32>
    %24 = math.exp %23 : vector<8x128xf32>
    %cst_20 = arith.constant 1.000000e+00 : f32
    %25 = vector.broadcast %cst_20 : f32 to vector<8x128xf32>
    %26 = arith.addf %25, %24 : vector<8x128xf32>
    %27 = arith.divf %25, %26 : vector<8x128xf32>
    %28 = vector.extract_strided_slice %19 {offsets = [0, 128], sizes = [8, 128], strides = [1, 1]} : vector<8x384xf32> to vector<8x128xf32>
    %29 = vector.extract_strided_slice %18 {offsets = [0, 128], sizes = [8, 128], strides = [1, 1]} : vector<8x384xf32> to vector<8x128xf32>
    %30 = arith.addf %28, %29 : vector<8x128xf32>
    %31 = arith.negf %30 : vector<8x128xf32>
    %32 = math.exp %31 : vector<8x128xf32>
    %cst_21 = arith.constant 1.000000e+00 : f32
    %33 = vector.broadcast %cst_21 : f32 to vector<8x128xf32>
    %34 = arith.addf %33, %32 : vector<8x128xf32>
    %35 = arith.divf %33, %34 : vector<8x128xf32>
    %36 = vector.extract_strided_slice %19 {offsets = [0, 256], sizes = [8, 128], strides = [1, 1]} : vector<8x384xf32> to vector<8x128xf32>
    %37 = vector.extract_strided_slice %18 {offsets = [0, 256], sizes = [8, 128], strides = [1, 1]} : vector<8x384xf32> to vector<8x128xf32>
    %38 = arith.addf %37, %3 : vector<8x128xf32>
    %39 = arith.mulf %27, %38 : vector<8x128xf32>
    %40 = arith.addf %36, %39 : vector<8x128xf32>
    %41 = math.tanh %40 : vector<8x128xf32>
    %cst_22 = arith.constant 1.000000e+00 : f32
    %42 = vector.broadcast %cst_22 : f32 to vector<8x128xf32>
    %43 = arith.subf %42, %35 : vector<8x128xf32>
    %44 = arith.mulf %43, %41 : vector<8x128xf32>
    %45 = arith.mulf %35, %6 : vector<8x128xf32>
    %46 = arith.addf %44, %45 : vector<8x128xf32>
    %47 = arith.truncf %46 : vector<8x128xf32> to vector<8x128xbf16>
    %c0_23 = arith.constant 0 : index
    %c0_24 = arith.constant 0 : index
    %48 = vector.load %arg7[%c0_23, %c0_24] : memref<64x128xbf16, #tpu.memory_space<vmem>>, vector<8x128xbf16>
    tpu.vector_store %arg7[%c0_23, %c0_24], %47 {strides = array<i32>} : memref<64x128xbf16, #tpu.memory_space<vmem>>, vector<8x128xbf16>,
    %49 = arith.truncf %46 : vector<8x128xf32> to vector<8x128xbf16>
    %c0_25 = arith.constant 0 : index
    %c0_26 = arith.constant 0 : index
    %c0_27 = arith.constant 0 : index
    %50 = vector.load %arg3[%c0_25, %c0_26, %c0_27] : memref<2x128x384xbf16, #tpu.memory_space<vmem>>, vector<1x128x384xbf16>
    %51 = vector.shape_cast %50 : vector<1x128x384xbf16> to vector<128x384xbf16>
    %cst_28 = arith.constant dense<0.000000e+00> : vector<8x384xf32>
    %52 = tpu.matmul %49, %51, %cst_28 {dimension_numbers = #tpu.dot_dimension_numbers<[1], [0], [0], [1], [0, 0, 1, 1], [], []>} : vector<8x128xbf16>, vector<128x384xbf16>, vector<8x384xf32> -> vector<8x384xf32>
    %c8 = arith.constant 8 : index
    %c0_29 = arith.constant 0 : index
    %53 = vector.load %arg8[%c8, %c0_29] : memref<64x384xf32, #tpu.memory_space<vmem>>, vector<8x384xf32>
    %54 = vector.extract_strided_slice %53 {offsets = [0, 0], sizes = [8, 128], strides = [1, 1]} : vector<8x384xf32> to vector<8x128xf32>
    %55 = vector.extract_strided_slice %52 {offsets = [0, 0], sizes = [8, 128], strides = [1, 1]} : vector<8x384xf32> to vector<8x128xf32>
    %56 = arith.addf %54, %55 : vector<8x128xf32>
    %57 = arith.negf %56 : vector<8x128xf32>
    %58 = math.exp %57 : vector<8x128xf32>
    %cst_30 = arith.constant 1.000000e+00 : f32
    %59 = vector.broadcast %cst_30 : f32 to vector<8x128xf32>
    %60 = arith.addf %59, %58 : vector<8x128xf32>
    %61 = arith.divf %59, %60 : vector<8x128xf32>
    %62 = vector.extract_strided_slice %53 {offsets = [0, 128], sizes = [8, 128], strides = [1, 1]} : vector<8x384xf32> to vector<8x128xf32>
    %63 = vector.extract_strided_slice %52 {offsets = [0, 128], sizes = [8, 128], strides = [1, 1]} : vector<8x384xf32> to vector<8x128xf32>
    %64 = arith.addf %62, %63 : vector<8x128xf32>
    %65 = arith.negf %64 : vector<8x128xf32>
    %66 = math.exp %65 : vector<8x128xf32>
    %cst_31 = arith.constant 1.000000e+00 : f32
    %67 = vector.broadcast %cst_31 : f32 to vector<8x128xf32>
    %68 = arith.addf %67, %66 : vector<8x128xf32>
    %69 = arith.divf %67, %68 : vector<8x128xf32>
    %70 = vector.extract_strided_slice %53 {offsets = [0, 256], sizes = [8, 128], strides = [1, 1]} : vector<8x384xf32> to vector<8x128xf32>
    %71 = vector.extract_strided_slice %52 {offsets = [0, 256], sizes = [8, 128], strides = [1, 1]} : vector<8x384xf32> to vector<8x128xf32>
    %72 = arith.addf %71, %3 : vector<8x128xf32>
    %73 = arith.mulf %61, %72 : vector<8x128xf32>
    %74 = arith.addf %70, %73 : vector<8x128xf32>
    %75 = math.tanh %74 : vector<8x128xf32>
    %cst_32 = arith.constant 1.000000e+00 : f32
    %76 = vector.broadcast %cst_32 : f32 to vector<8x128xf32>
    %77 = arith.subf %76, %69 : vector<8x128xf32>
    %78 = arith.mulf %77, %75 : vector<8x128xf32>
    %79 = arith.mulf %69, %46 : vector<8x128xf32>
    %80 = arith.addf %78, %79 : vector<8x128xf32>
    %81 = arith.truncf %80 : vector<8x128xf32> to vector<8x128xbf16>
    %c8_33 = arith.constant 8 : index
    %c0_34 = arith.constant 0 : index
    %82 = vector.load %arg7[%c8_33, %c0_34] : memref<64x128xbf16, #tpu.memory_space<vmem>>, vector<8x128xbf16>
    tpu.vector_store %arg7[%c8_33, %c0_34], %81 {strides = array<i32>} : memref<64x128xbf16, #tpu.memory_space<vmem>>, vector<8x128xbf16>,
    %83 = arith.truncf %80 : vector<8x128xf32> to vector<8x128xbf16>
    %c0_35 = arith.constant 0 : index
    %c0_36 = arith.constant 0 : index
    %c0_37 = arith.constant 0 : index
    %84 = vector.load %arg3[%c0_35, %c0_36, %c0_37] : memref<2x128x384xbf16, #tpu.memory_space<vmem>>, vector<1x128x384xbf16>
    %85 = vector.shape_cast %84 : vector<1x128x384xbf16> to vector<128x384xbf16>
    %cst_38 = arith.constant dense<0.000000e+00> : vector<8x384xf32>
    %86 = tpu.matmul %83, %85, %cst_38 {dimension_numbers = #tpu.dot_dimension_numbers<[1], [0], [0], [1], [0, 0, 1, 1], [], []>} : vector<8x128xbf16>, vector<128x384xbf16>, vector<8x384xf32> -> vector<8x384xf32>
    %c16 = arith.constant 16 : index
    %c0_39 = arith.constant 0 : index
    %87 = vector.load %arg8[%c16, %c0_39] : memref<64x384xf32, #tpu.memory_space<vmem>>, vector<8x384xf32>
    %88 = vector.extract_strided_slice %87 {offsets = [0, 0], sizes = [8, 128], strides = [1, 1]} : vector<8x384xf32> to vector<8x128xf32>
    %89 = vector.extract_strided_slice %86 {offsets = [0, 0], sizes = [8, 128], strides = [1, 1]} : vector<8x384xf32> to vector<8x128xf32>
    %90 = arith.addf %88, %89 : vector<8x128xf32>
    %91 = arith.negf %90 : vector<8x128xf32>
    %92 = math.exp %91 : vector<8x128xf32>
    %cst_40 = arith.constant 1.000000e+00 : f32
    %93 = vector.broadcast %cst_40 : f32 to vector<8x128xf32>
    %94 = arith.addf %93, %92 : vector<8x128xf32>
    %95 = arith.divf %93, %94 : vector<8x128xf32>
    %96 = vector.extract_strided_slice %87 {offsets = [0, 128], sizes = [8, 128], strides = [1, 1]} : vector<8x384xf32> to vector<8x128xf32>
    %97 = vector.extract_strided_slice %86 {offsets = [0, 128], sizes = [8, 128], strides = [1, 1]} : vector<8x384xf32> to vector<8x128xf32>
    %98 = arith.addf %96, %97 : vector<8x128xf32>
    %99 = arith.negf %98 : vector<8x128xf32>
    %100 = math.exp %99 : vector<8x128xf32>
    %cst_41 = arith.constant 1.000000e+00 : f32
    %101 = vector.broadcast %cst_41 : f32 to vector<8x128xf32>
    %102 = arith.addf %101, %100 : vector<8x128xf32>
    %103 = arith.divf %101, %102 : vector<8x128xf32>
    %104 = vector.extract_strided_slice %87 {offsets = [0, 256], sizes = [8, 128], strides = [1, 1]} : vector<8x384xf32> to vector<8x128xf32>
    %105 = vector.extract_strided_slice %86 {offsets = [0, 256], sizes = [8, 128], strides = [1, 1]} : vector<8x384xf32> to vector<8x128xf32>
    %106 = arith.addf %105, %3 : vector<8x128xf32>
    %107 = arith.mulf %95, %106 : vector<8x128xf32>
    %108 = arith.addf %104, %107 : vector<8x128xf32>
    %109 = math.tanh %108 : vector<8x128xf32>
    %cst_42 = arith.constant 1.000000e+00 : f32
    %110 = vector.broadcast %cst_42 : f32 to vector<8x128xf32>
    %111 = arith.subf %110, %103 : vector<8x128xf32>
    %112 = arith.mulf %111, %109 : vector<8x128xf32>
    %113 = arith.mulf %103, %80 : vector<8x128xf32>
    %114 = arith.addf %112, %113 : vector<8x128xf32>
    %115 = arith.truncf %114 : vector<8x128xf32> to vector<8x128xbf16>
    %c16_43 = arith.constant 16 : index
    %c0_44 = arith.constant 0 : index
    %116 = vector.load %arg7[%c16_43, %c0_44] : memref<64x128xbf16, #tpu.memory_space<vmem>>, vector<8x128xbf16>
    tpu.vector_store %arg7[%c16_43, %c0_44], %115 {strides = array<i32>} : memref<64x128xbf16, #tpu.memory_space<vmem>>, vector<8x128xbf16>,
    %117 = arith.truncf %114 : vector<8x128xf32> to vector<8x128xbf16>
    %c0_45 = arith.constant 0 : index
    %c0_46 = arith.constant 0 : index
    %c0_47 = arith.constant 0 : index
    %118 = vector.load %arg3[%c0_45, %c0_46, %c0_47] : memref<2x128x384xbf16, #tpu.memory_space<vmem>>, vector<1x128x384xbf16>
    %119 = vector.shape_cast %118 : vector<1x128x384xbf16> to vector<128x384xbf16>
    %cst_48 = arith.constant dense<0.000000e+00> : vector<8x384xf32>
    %120 = tpu.matmul %117, %119, %cst_48 {dimension_numbers = #tpu.dot_dimension_numbers<[1], [0], [0], [1], [0, 0, 1, 1], [], []>} : vector<8x128xbf16>, vector<128x384xbf16>, vector<8x384xf32> -> vector<8x384xf32>
    %c24 = arith.constant 24 : index
    %c0_49 = arith.constant 0 : index
    %121 = vector.load %arg8[%c24, %c0_49] : memref<64x384xf32, #tpu.memory_space<vmem>>, vector<8x384xf32>
    %122 = vector.extract_strided_slice %121 {offsets = [0, 0], sizes = [8, 128], strides = [1, 1]} : vector<8x384xf32> to vector<8x128xf32>
    %123 = vector.extract_strided_slice %120 {offsets = [0, 0], sizes = [8, 128], strides = [1, 1]} : vector<8x384xf32> to vector<8x128xf32>
    %124 = arith.addf %122, %123 : vector<8x128xf32>
    %125 = arith.negf %124 : vector<8x128xf32>
    %126 = math.exp %125 : vector<8x128xf32>
    %cst_50 = arith.constant 1.000000e+00 : f32
    %127 = vector.broadcast %cst_50 : f32 to vector<8x128xf32>
    %128 = arith.addf %127, %126 : vector<8x128xf32>
    %129 = arith.divf %127, %128 : vector<8x128xf32>
    %130 = vector.extract_strided_slice %121 {offsets = [0, 128], sizes = [8, 128], strides = [1, 1]} : vector<8x384xf32> to vector<8x128xf32>
    %131 = vector.extract_strided_slice %120 {offsets = [0, 128], sizes = [8, 128], strides = [1, 1]} : vector<8x384xf32> to vector<8x128xf32>
    %132 = arith.addf %130, %131 : vector<8x128xf32>
    %133 = arith.negf %132 : vector<8x128xf32>
    %134 = math.exp %133 : vector<8x128xf32>
    %cst_51 = arith.constant 1.000000e+00 : f32
    %135 = vector.broadcast %cst_51 : f32 to vector<8x128xf32>
    %136 = arith.addf %135, %134 : vector<8x128xf32>
    %137 = arith.divf %135, %136 : vector<8x128xf32>
    %138 = vector.extract_strided_slice %121 {offsets = [0, 256], sizes = [8, 128], strides = [1, 1]} : vector<8x384xf32> to vector<8x128xf32>
    %139 = vector.extract_strided_slice %120 {offsets = [0, 256], sizes = [8, 128], strides = [1, 1]} : vector<8x384xf32> to vector<8x128xf32>
    %140 = arith.addf %139, %3 : vector<8x128xf32>
    %141 = arith.mulf %129, %140 : vector<8x128xf32>
    %142 = arith.addf %138, %141 : vector<8x128xf32>
    %143 = math.tanh %142 : vector<8x128xf32>
    %cst_52 = arith.constant 1.000000e+00 : f32
    %144 = vector.broadcast %cst_52 : f32 to vector<8x128xf32>
    %145 = arith.subf %144, %137 : vector<8x128xf32>
    %146 = arith.mulf %145, %143 : vector<8x128xf32>
    %147 = arith.mulf %137, %114 : vector<8x128xf32>
    %148 = arith.addf %146, %147 : vector<8x128xf32>
    %149 = arith.truncf %148 : vector<8x128xf32> to vector<8x128xbf16>
    %c24_53 = arith.constant 24 : index
    %c0_54 = arith.constant 0 : index
    %150 = vector.load %arg7[%c24_53, %c0_54] : memref<64x128xbf16, #tpu.memory_space<vmem>>, vector<8x128xbf16>
    tpu.vector_store %arg7[%c24_53, %c0_54], %149 {strides = array<i32>} : memref<64x128xbf16, #tpu.memory_space<vmem>>, vector<8x128xbf16>,
    %151 = arith.truncf %148 : vector<8x128xf32> to vector<8x128xbf16>
    %c0_55 = arith.constant 0 : index
    %c0_56 = arith.constant 0 : index
    %c0_57 = arith.constant 0 : index
    %152 = vector.load %arg3[%c0_55, %c0_56, %c0_57] : memref<2x128x384xbf16, #tpu.memory_space<vmem>>, vector<1x128x384xbf16>
    %153 = vector.shape_cast %152 : vector<1x128x384xbf16> to vector<128x384xbf16>
    %cst_58 = arith.constant dense<0.000000e+00> : vector<8x384xf32>
    %154 = tpu.matmul %151, %153, %cst_58 {dimension_numbers = #tpu.dot_dimension_numbers<[1], [0], [0], [1], [0, 0, 1, 1], [], []>} : vector<8x128xbf16>, vector<128x384xbf16>, vector<8x384xf32> -> vector<8x384xf32>
    %c32 = arith.constant 32 : index
    %c0_59 = arith.constant 0 : index
    %155 = vector.load %arg8[%c32, %c0_59] : memref<64x384xf32, #tpu.memory_space<vmem>>, vector<8x384xf32>
    %156 = vector.extract_strided_slice %155 {offsets = [0, 0], sizes = [8, 128], strides = [1, 1]} : vector<8x384xf32> to vector<8x128xf32>
    %157 = vector.extract_strided_slice %154 {offsets = [0, 0], sizes = [8, 128], strides = [1, 1]} : vector<8x384xf32> to vector<8x128xf32>
    %158 = arith.addf %156, %157 : vector<8x128xf32>
    %159 = arith.negf %158 : vector<8x128xf32>
    %160 = math.exp %159 : vector<8x128xf32>
    %cst_60 = arith.constant 1.000000e+00 : f32
    %161 = vector.broadcast %cst_60 : f32 to vector<8x128xf32>
    %162 = arith.addf %161, %160 : vector<8x128xf32>
    %163 = arith.divf %161, %162 : vector<8x128xf32>
    %164 = vector.extract_strided_slice %155 {offsets = [0, 128], sizes = [8, 128], strides = [1, 1]} : vector<8x384xf32> to vector<8x128xf32>
    %165 = vector.extract_strided_slice %154 {offsets = [0, 128], sizes = [8, 128], strides = [1, 1]} : vector<8x384xf32> to vector<8x128xf32>
    %166 = arith.addf %164, %165 : vector<8x128xf32>
    %167 = arith.negf %166 : vector<8x128xf32>
    %168 = math.exp %167 : vector<8x128xf32>
    %cst_61 = arith.constant 1.000000e+00 : f32
    %169 = vector.broadcast %cst_61 : f32 to vector<8x128xf32>
    %170 = arith.addf %169, %168 : vector<8x128xf32>
    %171 = arith.divf %169, %170 : vector<8x128xf32>
    %172 = vector.extract_strided_slice %155 {offsets = [0, 256], sizes = [8, 128], strides = [1, 1]} : vector<8x384xf32> to vector<8x128xf32>
    %173 = vector.extract_strided_slice %154 {offsets = [0, 256], sizes = [8, 128], strides = [1, 1]} : vector<8x384xf32> to vector<8x128xf32>
    %174 = arith.addf %173, %3 : vector<8x128xf32>
    %175 = arith.mulf %163, %174 : vector<8x128xf32>
    %176 = arith.addf %172, %175 : vector<8x128xf32>
    %177 = math.tanh %176 : vector<8x128xf32>
    %cst_62 = arith.constant 1.000000e+00 : f32
    %178 = vector.broadcast %cst_62 : f32 to vector<8x128xf32>
    %179 = arith.subf %178, %171 : vector<8x128xf32>
    %180 = arith.mulf %179, %177 : vector<8x128xf32>
    %181 = arith.mulf %171, %148 : vector<8x128xf32>
    %182 = arith.addf %180, %181 : vector<8x128xf32>
    %183 = arith.truncf %182 : vector<8x128xf32> to vector<8x128xbf16>
    %c32_63 = arith.constant 32 : index
    %c0_64 = arith.constant 0 : index
    %184 = vector.load %arg7[%c32_63, %c0_64] : memref<64x128xbf16, #tpu.memory_space<vmem>>, vector<8x128xbf16>
    tpu.vector_store %arg7[%c32_63, %c0_64], %183 {strides = array<i32>} : memref<64x128xbf16, #tpu.memory_space<vmem>>, vector<8x128xbf16>,
    %185 = arith.truncf %182 : vector<8x128xf32> to vector<8x128xbf16>
    %c0_65 = arith.constant 0 : index
    %c0_66 = arith.constant 0 : index
    %c0_67 = arith.constant 0 : index
    %186 = vector.load %arg3[%c0_65, %c0_66, %c0_67] : memref<2x128x384xbf16, #tpu.memory_space<vmem>>, vector<1x128x384xbf16>
    %187 = vector.shape_cast %186 : vector<1x128x384xbf16> to vector<128x384xbf16>
    %cst_68 = arith.constant dense<0.000000e+00> : vector<8x384xf32>
    %188 = tpu.matmul %185, %187, %cst_68 {dimension_numbers = #tpu.dot_dimension_numbers<[1], [0], [0], [1], [0, 0, 1, 1], [], []>} : vector<8x128xbf16>, vector<128x384xbf16>, vector<8x384xf32> -> vector<8x384xf32>
    %c40 = arith.constant 40 : index
    %c0_69 = arith.constant 0 : index
    %189 = vector.load %arg8[%c40, %c0_69] : memref<64x384xf32, #tpu.memory_space<vmem>>, vector<8x384xf32>
    %190 = vector.extract_strided_slice %189 {offsets = [0, 0], sizes = [8, 128], strides = [1, 1]} : vector<8x384xf32> to vector<8x128xf32>
    %191 = vector.extract_strided_slice %188 {offsets = [0, 0], sizes = [8, 128], strides = [1, 1]} : vector<8x384xf32> to vector<8x128xf32>
    %192 = arith.addf %190, %191 : vector<8x128xf32>
    %193 = arith.negf %192 : vector<8x128xf32>
    %194 = math.exp %193 : vector<8x128xf32>
    %cst_70 = arith.constant 1.000000e+00 : f32
    %195 = vector.broadcast %cst_70 : f32 to vector<8x128xf32>
    %196 = arith.addf %195, %194 : vector<8x128xf32>
    %197 = arith.divf %195, %196 : vector<8x128xf32>
    %198 = vector.extract_strided_slice %189 {offsets = [0, 128], sizes = [8, 128], strides = [1, 1]} : vector<8x384xf32> to vector<8x128xf32>
    %199 = vector.extract_strided_slice %188 {offsets = [0, 128], sizes = [8, 128], strides = [1, 1]} : vector<8x384xf32> to vector<8x128xf32>
    %200 = arith.addf %198, %199 : vector<8x128xf32>
    %201 = arith.negf %200 : vector<8x128xf32>
    %202 = math.exp %201 : vector<8x128xf32>
    %cst_71 = arith.constant 1.000000e+00 : f32
    %203 = vector.broadcast %cst_71 : f32 to vector<8x128xf32>
    %204 = arith.addf %203, %202 : vector<8x128xf32>
    %205 = arith.divf %203, %204 : vector<8x128xf32>
    %206 = vector.extract_strided_slice %189 {offsets = [0, 256], sizes = [8, 128], strides = [1, 1]} : vector<8x384xf32> to vector<8x128xf32>
    %207 = vector.extract_strided_slice %188 {offsets = [0, 256], sizes = [8, 128], strides = [1, 1]} : vector<8x384xf32> to vector<8x128xf32>
    %208 = arith.addf %207, %3 : vector<8x128xf32>
    %209 = arith.mulf %197, %208 : vector<8x128xf32>
    %210 = arith.addf %206, %209 : vector<8x128xf32>
    %211 = math.tanh %210 : vector<8x128xf32>
    %cst_72 = arith.constant 1.000000e+00 : f32
    %212 = vector.broadcast %cst_72 : f32 to vector<8x128xf32>
    %213 = arith.subf %212, %205 : vector<8x128xf32>
    %214 = arith.mulf %213, %211 : vector<8x128xf32>
    %215 = arith.mulf %205, %182 : vector<8x128xf32>
    %216 = arith.addf %214, %215 : vector<8x128xf32>
    %217 = arith.truncf %216 : vector<8x128xf32> to vector<8x128xbf16>
    %c40_73 = arith.constant 40 : index
    %c0_74 = arith.constant 0 : index
    %218 = vector.load %arg7[%c40_73, %c0_74] : memref<64x128xbf16, #tpu.memory_space<vmem>>, vector<8x128xbf16>
    tpu.vector_store %arg7[%c40_73, %c0_74], %217 {strides = array<i32>} : memref<64x128xbf16, #tpu.memory_space<vmem>>, vector<8x128xbf16>,
    %219 = arith.truncf %216 : vector<8x128xf32> to vector<8x128xbf16>
    %c0_75 = arith.constant 0 : index
    %c0_76 = arith.constant 0 : index
    %c0_77 = arith.constant 0 : index
    %220 = vector.load %arg3[%c0_75, %c0_76, %c0_77] : memref<2x128x384xbf16, #tpu.memory_space<vmem>>, vector<1x128x384xbf16>
    %221 = vector.shape_cast %220 : vector<1x128x384xbf16> to vector<128x384xbf16>
    %cst_78 = arith.constant dense<0.000000e+00> : vector<8x384xf32>
    %222 = tpu.matmul %219, %221, %cst_78 {dimension_numbers = #tpu.dot_dimension_numbers<[1], [0], [0], [1], [0, 0, 1, 1], [], []>} : vector<8x128xbf16>, vector<128x384xbf16>, vector<8x384xf32> -> vector<8x384xf32>
    %c48 = arith.constant 48 : index
    %c0_79 = arith.constant 0 : index
    %223 = vector.load %arg8[%c48, %c0_79] : memref<64x384xf32, #tpu.memory_space<vmem>>, vector<8x384xf32>
    %224 = vector.extract_strided_slice %223 {offsets = [0, 0], sizes = [8, 128], strides = [1, 1]} : vector<8x384xf32> to vector<8x128xf32>
    %225 = vector.extract_strided_slice %222 {offsets = [0, 0], sizes = [8, 128], strides = [1, 1]} : vector<8x384xf32> to vector<8x128xf32>
    %226 = arith.addf %224, %225 : vector<8x128xf32>
    %227 = arith.negf %226 : vector<8x128xf32>
    %228 = math.exp %227 : vector<8x128xf32>
    %cst_80 = arith.constant 1.000000e+00 : f32
    %229 = vector.broadcast %cst_80 : f32 to vector<8x128xf32>
    %230 = arith.addf %229, %228 : vector<8x128xf32>
    %231 = arith.divf %229, %230 : vector<8x128xf32>
    %232 = vector.extract_strided_slice %223 {offsets = [0, 128], sizes = [8, 128], strides = [1, 1]} : vector<8x384xf32> to vector<8x128xf32>
    %233 = vector.extract_strided_slice %222 {offsets = [0, 128], sizes = [8, 128], strides = [1, 1]} : vector<8x384xf32> to vector<8x128xf32>
    %234 = arith.addf %232, %233 : vector<8x128xf32>
    %235 = arith.negf %234 : vector<8x128xf32>
    %236 = math.exp %235 : vector<8x128xf32>
    %cst_81 = arith.constant 1.000000e+00 : f32
    %237 = vector.broadcast %cst_81 : f32 to vector<8x128xf32>
    %238 = arith.addf %237, %236 : vector<8x128xf32>
    %239 = arith.divf %237, %238 : vector<8x128xf32>
    %240 = vector.extract_strided_slice %223 {offsets = [0, 256], sizes = [8, 128], strides = [1, 1]} : vector<8x384xf32> to vector<8x128xf32>
    %241 = vector.extract_strided_slice %222 {offsets = [0, 256], sizes = [8, 128], strides = [1, 1]} : vector<8x384xf32> to vector<8x128xf32>
    %242 = arith.addf %241, %3 : vector<8x128xf32>
    %243 = arith.mulf %231, %242 : vector<8x128xf32>
    %244 = arith.addf %240, %243 : vector<8x128xf32>
    %245 = math.tanh %244 : vector<8x128xf32>
    %cst_82 = arith.constant 1.000000e+00 : f32
    %246 = vector.broadcast %cst_82 : f32 to vector<8x128xf32>
    %247 = arith.subf %246, %239 : vector<8x128xf32>
    %248 = arith.mulf %247, %245 : vector<8x128xf32>
    %249 = arith.mulf %239, %216 : vector<8x128xf32>
    %250 = arith.addf %248, %249 : vector<8x128xf32>
    %251 = arith.truncf %250 : vector<8x128xf32> to vector<8x128xbf16>
    %c48_83 = arith.constant 48 : index
    %c0_84 = arith.constant 0 : index
    %252 = vector.load %arg7[%c48_83, %c0_84] : memref<64x128xbf16, #tpu.memory_space<vmem>>, vector<8x128xbf16>
    tpu.vector_store %arg7[%c48_83, %c0_84], %251 {strides = array<i32>} : memref<64x128xbf16, #tpu.memory_space<vmem>>, vector<8x128xbf16>,
    %253 = arith.truncf %250 : vector<8x128xf32> to vector<8x128xbf16>
    %c0_85 = arith.constant 0 : index
    %c0_86 = arith.constant 0 : index
    %c0_87 = arith.constant 0 : index
    %254 = vector.load %arg3[%c0_85, %c0_86, %c0_87] : memref<2x128x384xbf16, #tpu.memory_space<vmem>>, vector<1x128x384xbf16>
    %255 = vector.shape_cast %254 : vector<1x128x384xbf16> to vector<128x384xbf16>
    %cst_88 = arith.constant dense<0.000000e+00> : vector<8x384xf32>
    %256 = tpu.matmul %253, %255, %cst_88 {dimension_numbers = #tpu.dot_dimension_numbers<[1], [0], [0], [1], [0, 0, 1, 1], [], []>} : vector<8x128xbf16>, vector<128x384xbf16>, vector<8x384xf32> -> vector<8x384xf32>
    %c56 = arith.constant 56 : index
    %c0_89 = arith.constant 0 : index
    %257 = vector.load %arg8[%c56, %c0_89] : memref<64x384xf32, #tpu.memory_space<vmem>>, vector<8x384xf32>
    %258 = vector.extract_strided_slice %257 {offsets = [0, 0], sizes = [8, 128], strides = [1, 1]} : vector<8x384xf32> to vector<8x128xf32>
    %259 = vector.extract_strided_slice %256 {offsets = [0, 0], sizes = [8, 128], strides = [1, 1]} : vector<8x384xf32> to vector<8x128xf32>
    %260 = arith.addf %258, %259 : vector<8x128xf32>
    %261 = arith.negf %260 : vector<8x128xf32>
    %262 = math.exp %261 : vector<8x128xf32>
    %cst_90 = arith.constant 1.000000e+00 : f32
    %263 = vector.broadcast %cst_90 : f32 to vector<8x128xf32>
    %264 = arith.addf %263, %262 : vector<8x128xf32>
    %265 = arith.divf %263, %264 : vector<8x128xf32>
    %266 = vector.extract_strided_slice %257 {offsets = [0, 128], sizes = [8, 128], strides = [1, 1]} : vector<8x384xf32> to vector<8x128xf32>
    %267 = vector.extract_strided_slice %256 {offsets = [0, 128], sizes = [8, 128], strides = [1, 1]} : vector<8x384xf32> to vector<8x128xf32>
    %268 = arith.addf %266, %267 : vector<8x128xf32>
    %269 = arith.negf %268 : vector<8x128xf32>
    %270 = math.exp %269 : vector<8x128xf32>
    %cst_91 = arith.constant 1.000000e+00 : f32
    %271 = vector.broadcast %cst_91 : f32 to vector<8x128xf32>
    %272 = arith.addf %271, %270 : vector<8x128xf32>
    %273 = arith.divf %271, %272 : vector<8x128xf32>
    %274 = vector.extract_strided_slice %257 {offsets = [0, 256], sizes = [8, 128], strides = [1, 1]} : vector<8x384xf32> to vector<8x128xf32>
    %275 = vector.extract_strided_slice %256 {offsets = [0, 256], sizes = [8, 128], strides = [1, 1]} : vector<8x384xf32> to vector<8x128xf32>
    %276 = arith.addf %275, %3 : vector<8x128xf32>
    %277 = arith.mulf %265, %276 : vector<8x128xf32>
    %278 = arith.addf %274, %277 : vector<8x128xf32>
    %279 = math.tanh %278 : vector<8x128xf32>
    %cst_92 = arith.constant 1.000000e+00 : f32
    %280 = vector.broadcast %cst_92 : f32 to vector<8x128xf32>
    %281 = arith.subf %280, %273 : vector<8x128xf32>
    %282 = arith.mulf %281, %279 : vector<8x128xf32>
    %283 = arith.mulf %273, %250 : vector<8x128xf32>
    %284 = arith.addf %282, %283 : vector<8x128xf32>
    %285 = arith.truncf %284 : vector<8x128xf32> to vector<8x128xbf16>
    %c56_93 = arith.constant 56 : index
    %c0_94 = arith.constant 0 : index
    %286 = vector.load %arg7[%c56_93, %c0_94] : memref<64x128xbf16, #tpu.memory_space<vmem>>, vector<8x128xbf16>
    tpu.vector_store %arg7[%c56_93, %c0_94], %285 {strides = array<i32>} : memref<64x128xbf16, #tpu.memory_space<vmem>>, vector<8x128xbf16>,
    %c1 = arith.constant 1 : index
    %c0_95 = arith.constant 0 : index
    %c0_96 = arith.constant 0 : index
    %287 = vector.load %arg5[%c1, %c0_95, %c0_96] : memref<2x1x128xf32, #tpu.memory_space<vmem>>, vector<1x1x128xf32>
    %288 = vector.shape_cast %287 : vector<1x1x128xf32> to vector<1x128xf32>
    %289 = vector.shape_cast %288 : vector<1x128xf32> to vector<1x128xf32>
    %290 = vector.broadcast %289 : vector<1x128xf32> to vector<8x128xf32>
    %c1_97 = arith.constant 1 : index
    %c0_98 = arith.constant 0 : index
    %c0_99 = arith.constant 0 : index
    %291 = vector.load %arg4[%c1_97, %c0_98, %c0_99] : memref<2x1x384xf32, #tpu.memory_space<vmem>>, vector<1x1x384xf32>
    %292 = vector.shape_cast %291 : vector<1x1x384xf32> to vector<1x384xf32>
    %cst_100 = arith.constant 0.000000e+00 : f32
    %293 = vector.broadcast %cst_100 : f32 to vector<8x128xf32>
    %c0_101 = arith.constant 0 : index
    %c0_102 = arith.constant 0 : index
    %294 = vector.load %arg7[%c0_101, %c0_102] : memref<64x128xbf16, #tpu.memory_space<vmem>>, vector<64x128xbf16>
    %c1_103 = arith.constant 1 : index
    %c0_104 = arith.constant 0 : index
    %c0_105 = arith.constant 0 : index
    %295 = vector.load %arg2[%c1_103, %c0_104, %c0_105] : memref<2x128x384xbf16, #tpu.memory_space<vmem>>, vector<1x128x384xbf16>
    %296 = vector.shape_cast %295 : vector<1x128x384xbf16> to vector<128x384xbf16>
    %cst_106 = arith.constant dense<0.000000e+00> : vector<64x384xf32>
    %297 = tpu.matmul %294, %296, %cst_106 {dimension_numbers = #tpu.dot_dimension_numbers<[1], [0], [0], [1], [0, 0, 1, 1], [], []>} : vector<64x128xbf16>, vector<128x384xbf16>, vector<64x384xf32> -> vector<64x384xf32>
    %298 = vector.broadcast %292 : vector<1x384xf32> to vector<64x384xf32>
    %299 = arith.addf %297, %298 : vector<64x384xf32>
    %c0_107 = arith.constant 0 : index
    %c0_108 = arith.constant 0 : index
    %300 = vector.load %arg8[%c0_107, %c0_108] : memref<64x384xf32, #tpu.memory_space<vmem>>, vector<64x384xf32>
    tpu.vector_store %arg8[%c0_107, %c0_108], %299 {strides = array<i32>} : memref<64x384xf32, #tpu.memory_space<vmem>>, vector<64x384xf32>,
    %301 = arith.truncf %293 : vector<8x128xf32> to vector<8x128xbf16>
    %c1_109 = arith.constant 1 : index
    %c0_110 = arith.constant 0 : index
    %c0_111 = arith.constant 0 : index
    %302 = vector.load %arg3[%c1_109, %c0_110, %c0_111] : memref<2x128x384xbf16, #tpu.memory_space<vmem>>, vector<1x128x384xbf16>
    %303 = vector.shape_cast %302 : vector<1x128x384xbf16> to vector<128x384xbf16>
    %cst_112 = arith.constant dense<0.000000e+00> : vector<8x384xf32>
    %304 = tpu.matmul %301, %303, %cst_112 {dimension_numbers = #tpu.dot_dimension_numbers<[1], [0], [0], [1], [0, 0, 1, 1], [], []>} : vector<8x128xbf16>, vector<128x384xbf16>, vector<8x384xf32> -> vector<8x384xf32>
    %c0_113 = arith.constant 0 : index
    %c0_114 = arith.constant 0 : index
    %305 = vector.load %arg8[%c0_113, %c0_114] : memref<64x384xf32, #tpu.memory_space<vmem>>, vector<8x384xf32>
    %306 = vector.extract_strided_slice %305 {offsets = [0, 0], sizes = [8, 128], strides = [1, 1]} : vector<8x384xf32> to vector<8x128xf32>
    %307 = vector.extract_strided_slice %304 {offsets = [0, 0], sizes = [8, 128], strides = [1, 1]} : vector<8x384xf32> to vector<8x128xf32>
    %308 = arith.addf %306, %307 : vector<8x128xf32>
    %309 = arith.negf %308 : vector<8x128xf32>
    %310 = math.exp %309 : vector<8x128xf32>
    %cst_115 = arith.constant 1.000000e+00 : f32
    %311 = vector.broadcast %cst_115 : f32 to vector<8x128xf32>
    %312 = arith.addf %311, %310 : vector<8x128xf32>
    %313 = arith.divf %311, %312 : vector<8x128xf32>
    %314 = vector.extract_strided_slice %305 {offsets = [0, 128], sizes = [8, 128], strides = [1, 1]} : vector<8x384xf32> to vector<8x128xf32>
    %315 = vector.extract_strided_slice %304 {offsets = [0, 128], sizes = [8, 128], strides = [1, 1]} : vector<8x384xf32> to vector<8x128xf32>
    %316 = arith.addf %314, %315 : vector<8x128xf32>
    %317 = arith.negf %316 : vector<8x128xf32>
    %318 = math.exp %317 : vector<8x128xf32>
    %cst_116 = arith.constant 1.000000e+00 : f32
    %319 = vector.broadcast %cst_116 : f32 to vector<8x128xf32>
    %320 = arith.addf %319, %318 : vector<8x128xf32>
    %321 = arith.divf %319, %320 : vector<8x128xf32>
    %322 = vector.extract_strided_slice %305 {offsets = [0, 256], sizes = [8, 128], strides = [1, 1]} : vector<8x384xf32> to vector<8x128xf32>
    %323 = vector.extract_strided_slice %304 {offsets = [0, 256], sizes = [8, 128], strides = [1, 1]} : vector<8x384xf32> to vector<8x128xf32>
    %324 = arith.addf %323, %290 : vector<8x128xf32>
    %325 = arith.mulf %313, %324 : vector<8x128xf32>
    %326 = arith.addf %322, %325 : vector<8x128xf32>
    %327 = math.tanh %326 : vector<8x128xf32>
    %cst_117 = arith.constant 1.000000e+00 : f32
    %328 = vector.broadcast %cst_117 : f32 to vector<8x128xf32>
    %329 = arith.subf %328, %321 : vector<8x128xf32>
    %330 = arith.mulf %329, %327 : vector<8x128xf32>
    %331 = arith.mulf %321, %293 : vector<8x128xf32>
    %332 = arith.addf %330, %331 : vector<8x128xf32>
    %c0_118 = arith.constant 0 : index
    %c0_119 = arith.constant 0 : index
    %c0_120 = arith.constant 0 : index
    %333 = vector.load %arg6[%c0_118, %c0_119, %c0_120] : memref<8x8x128xf32, #tpu.memory_space<vmem>>, vector<1x8x128xf32>
    %334 = vector.shape_cast %333 : vector<1x8x128xf32> to vector<8x128xf32>
    %335 = vector.shape_cast %332 : vector<8x128xf32> to vector<1x8x128xf32>
    tpu.vector_store %arg6[%c0_118, %c0_119, %c0_120], %335 {strides = array<i32>} : memref<8x8x128xf32, #tpu.memory_space<vmem>>, vector<1x8x128xf32>,
    %336 = arith.truncf %332 : vector<8x128xf32> to vector<8x128xbf16>
    %c1_121 = arith.constant 1 : index
    %c0_122 = arith.constant 0 : index
    %c0_123 = arith.constant 0 : index
    %337 = vector.load %arg3[%c1_121, %c0_122, %c0_123] : memref<2x128x384xbf16, #tpu.memory_space<vmem>>, vector<1x128x384xbf16>
    %338 = vector.shape_cast %337 : vector<1x128x384xbf16> to vector<128x384xbf16>
    %cst_124 = arith.constant dense<0.000000e+00> : vector<8x384xf32>
    %339 = tpu.matmul %336, %338, %cst_124 {dimension_numbers = #tpu.dot_dimension_numbers<[1], [0], [0], [1], [0, 0, 1, 1], [], []>} : vector<8x128xbf16>, vector<128x384xbf16>, vector<8x384xf32> -> vector<8x384xf32>
    %c8_125 = arith.constant 8 : index
    %c0_126 = arith.constant 0 : index
    %340 = vector.load %arg8[%c8_125, %c0_126] : memref<64x384xf32, #tpu.memory_space<vmem>>, vector<8x384xf32>
    %341 = vector.extract_strided_slice %340 {offsets = [0, 0], sizes = [8, 128], strides = [1, 1]} : vector<8x384xf32> to vector<8x128xf32>
    %342 = vector.extract_strided_slice %339 {offsets = [0, 0], sizes = [8, 128], strides = [1, 1]} : vector<8x384xf32> to vector<8x128xf32>
    %343 = arith.addf %341, %342 : vector<8x128xf32>
    %344 = arith.negf %343 : vector<8x128xf32>
    %345 = math.exp %344 : vector<8x128xf32>
    %cst_127 = arith.constant 1.000000e+00 : f32
    %346 = vector.broadcast %cst_127 : f32 to vector<8x128xf32>
    %347 = arith.addf %346, %345 : vector<8x128xf32>
    %348 = arith.divf %346, %347 : vector<8x128xf32>
    %349 = vector.extract_strided_slice %340 {offsets = [0, 128], sizes = [8, 128], strides = [1, 1]} : vector<8x384xf32> to vector<8x128xf32>
    %350 = vector.extract_strided_slice %339 {offsets = [0, 128], sizes = [8, 128], strides = [1, 1]} : vector<8x384xf32> to vector<8x128xf32>
    %351 = arith.addf %349, %350 : vector<8x128xf32>
    %352 = arith.negf %351 : vector<8x128xf32>
    %353 = math.exp %352 : vector<8x128xf32>
    %cst_128 = arith.constant 1.000000e+00 : f32
    %354 = vector.broadcast %cst_128 : f32 to vector<8x128xf32>
    %355 = arith.addf %354, %353 : vector<8x128xf32>
    %356 = arith.divf %354, %355 : vector<8x128xf32>
    %357 = vector.extract_strided_slice %340 {offsets = [0, 256], sizes = [8, 128], strides = [1, 1]} : vector<8x384xf32> to vector<8x128xf32>
    %358 = vector.extract_strided_slice %339 {offsets = [0, 256], sizes = [8, 128], strides = [1, 1]} : vector<8x384xf32> to vector<8x128xf32>
    %359 = arith.addf %358, %290 : vector<8x128xf32>
    %360 = arith.mulf %348, %359 : vector<8x128xf32>
    %361 = arith.addf %357, %360 : vector<8x128xf32>
    %362 = math.tanh %361 : vector<8x128xf32>
    %cst_129 = arith.constant 1.000000e+00 : f32
    %363 = vector.broadcast %cst_129 : f32 to vector<8x128xf32>
    %364 = arith.subf %363, %356 : vector<8x128xf32>
    %365 = arith.mulf %364, %362 : vector<8x128xf32>
    %366 = arith.mulf %356, %332 : vector<8x128xf32>
    %367 = arith.addf %365, %366 : vector<8x128xf32>
    %c1_130 = arith.constant 1 : index
    %c0_131 = arith.constant 0 : index
    %c0_132 = arith.constant 0 : index
    %368 = vector.load %arg6[%c1_130, %c0_131, %c0_132] : memref<8x8x128xf32, #tpu.memory_space<vmem>>, vector<1x8x128xf32>
    %369 = vector.shape_cast %368 : vector<1x8x128xf32> to vector<8x128xf32>
    %370 = vector.shape_cast %367 : vector<8x128xf32> to vector<1x8x128xf32>
    tpu.vector_store %arg6[%c1_130, %c0_131, %c0_132], %370 {strides = array<i32>} : memref<8x8x128xf32, #tpu.memory_space<vmem>>, vector<1x8x128xf32>,
    %371 = arith.truncf %367 : vector<8x128xf32> to vector<8x128xbf16>
    %c1_133 = arith.constant 1 : index
    %c0_134 = arith.constant 0 : index
    %c0_135 = arith.constant 0 : index
    %372 = vector.load %arg3[%c1_133, %c0_134, %c0_135] : memref<2x128x384xbf16, #tpu.memory_space<vmem>>, vector<1x128x384xbf16>
    %373 = vector.shape_cast %372 : vector<1x128x384xbf16> to vector<128x384xbf16>
    %cst_136 = arith.constant dense<0.000000e+00> : vector<8x384xf32>
    %374 = tpu.matmul %371, %373, %cst_136 {dimension_numbers = #tpu.dot_dimension_numbers<[1], [0], [0], [1], [0, 0, 1, 1], [], []>} : vector<8x128xbf16>, vector<128x384xbf16>, vector<8x384xf32> -> vector<8x384xf32>
    %c16_137 = arith.constant 16 : index
    %c0_138 = arith.constant 0 : index
    %375 = vector.load %arg8[%c16_137, %c0_138] : memref<64x384xf32, #tpu.memory_space<vmem>>, vector<8x384xf32>
    %376 = vector.extract_strided_slice %375 {offsets = [0, 0], sizes = [8, 128], strides = [1, 1]} : vector<8x384xf32> to vector<8x128xf32>
    %377 = vector.extract_strided_slice %374 {offsets = [0, 0], sizes = [8, 128], strides = [1, 1]} : vector<8x384xf32> to vector<8x128xf32>
    %378 = arith.addf %376, %377 : vector<8x128xf32>
    %379 = arith.negf %378 : vector<8x128xf32>
    %380 = math.exp %379 : vector<8x128xf32>
    %cst_139 = arith.constant 1.000000e+00 : f32
    %381 = vector.broadcast %cst_139 : f32 to vector<8x128xf32>
    %382 = arith.addf %381, %380 : vector<8x128xf32>
    %383 = arith.divf %381, %382 : vector<8x128xf32>
    %384 = vector.extract_strided_slice %375 {offsets = [0, 128], sizes = [8, 128], strides = [1, 1]} : vector<8x384xf32> to vector<8x128xf32>
    %385 = vector.extract_strided_slice %374 {offsets = [0, 128], sizes = [8, 128], strides = [1, 1]} : vector<8x384xf32> to vector<8x128xf32>
    %386 = arith.addf %384, %385 : vector<8x128xf32>
    %387 = arith.negf %386 : vector<8x128xf32>
    %388 = math.exp %387 : vector<8x128xf32>
    %cst_140 = arith.constant 1.000000e+00 : f32
    %389 = vector.broadcast %cst_140 : f32 to vector<8x128xf32>
    %390 = arith.addf %389, %388 : vector<8x128xf32>
    %391 = arith.divf %389, %390 : vector<8x128xf32>
    %392 = vector.extract_strided_slice %375 {offsets = [0, 256], sizes = [8, 128], strides = [1, 1]} : vector<8x384xf32> to vector<8x128xf32>
    %393 = vector.extract_strided_slice %374 {offsets = [0, 256], sizes = [8, 128], strides = [1, 1]} : vector<8x384xf32> to vector<8x128xf32>
    %394 = arith.addf %393, %290 : vector<8x128xf32>
    %395 = arith.mulf %383, %394 : vector<8x128xf32>
    %396 = arith.addf %392, %395 : vector<8x128xf32>
    %397 = math.tanh %396 : vector<8x128xf32>
    %cst_141 = arith.constant 1.000000e+00 : f32
    %398 = vector.broadcast %cst_141 : f32 to vector<8x128xf32>
    %399 = arith.subf %398, %391 : vector<8x128xf32>
    %400 = arith.mulf %399, %397 : vector<8x128xf32>
    %401 = arith.mulf %391, %367 : vector<8x128xf32>
    %402 = arith.addf %400, %401 : vector<8x128xf32>
    %c2 = arith.constant 2 : index
    %c0_142 = arith.constant 0 : index
    %c0_143 = arith.constant 0 : index
    %403 = vector.load %arg6[%c2, %c0_142, %c0_143] : memref<8x8x128xf32, #tpu.memory_space<vmem>>, vector<1x8x128xf32>
    %404 = vector.shape_cast %403 : vector<1x8x128xf32> to vector<8x128xf32>
    %405 = vector.shape_cast %402 : vector<8x128xf32> to vector<1x8x128xf32>
    tpu.vector_store %arg6[%c2, %c0_142, %c0_143], %405 {strides = array<i32>} : memref<8x8x128xf32, #tpu.memory_space<vmem>>, vector<1x8x128xf32>,
    %406 = arith.truncf %402 : vector<8x128xf32> to vector<8x128xbf16>
    %c1_144 = arith.constant 1 : index
    %c0_145 = arith.constant 0 : index
    %c0_146 = arith.constant 0 : index
    %407 = vector.load %arg3[%c1_144, %c0_145, %c0_146] : memref<2x128x384xbf16, #tpu.memory_space<vmem>>, vector<1x128x384xbf16>
    %408 = vector.shape_cast %407 : vector<1x128x384xbf16> to vector<128x384xbf16>
    %cst_147 = arith.constant dense<0.000000e+00> : vector<8x384xf32>
    %409 = tpu.matmul %406, %408, %cst_147 {dimension_numbers = #tpu.dot_dimension_numbers<[1], [0], [0], [1], [0, 0, 1, 1], [], []>} : vector<8x128xbf16>, vector<128x384xbf16>, vector<8x384xf32> -> vector<8x384xf32>
    %c24_148 = arith.constant 24 : index
    %c0_149 = arith.constant 0 : index
    %410 = vector.load %arg8[%c24_148, %c0_149] : memref<64x384xf32, #tpu.memory_space<vmem>>, vector<8x384xf32>
    %411 = vector.extract_strided_slice %410 {offsets = [0, 0], sizes = [8, 128], strides = [1, 1]} : vector<8x384xf32> to vector<8x128xf32>
    %412 = vector.extract_strided_slice %409 {offsets = [0, 0], sizes = [8, 128], strides = [1, 1]} : vector<8x384xf32> to vector<8x128xf32>
    %413 = arith.addf %411, %412 : vector<8x128xf32>
    %414 = arith.negf %413 : vector<8x128xf32>
    %415 = math.exp %414 : vector<8x128xf32>
    %cst_150 = arith.constant 1.000000e+00 : f32
    %416 = vector.broadcast %cst_150 : f32 to vector<8x128xf32>
    %417 = arith.addf %416, %415 : vector<8x128xf32>
    %418 = arith.divf %416, %417 : vector<8x128xf32>
    %419 = vector.extract_strided_slice %410 {offsets = [0, 128], sizes = [8, 128], strides = [1, 1]} : vector<8x384xf32> to vector<8x128xf32>
    %420 = vector.extract_strided_slice %409 {offsets = [0, 128], sizes = [8, 128], strides = [1, 1]} : vector<8x384xf32> to vector<8x128xf32>
    %421 = arith.addf %419, %420 : vector<8x128xf32>
    %422 = arith.negf %421 : vector<8x128xf32>
    %423 = math.exp %422 : vector<8x128xf32>
    %cst_151 = arith.constant 1.000000e+00 : f32
    %424 = vector.broadcast %cst_151 : f32 to vector<8x128xf32>
    %425 = arith.addf %424, %423 : vector<8x128xf32>
    %426 = arith.divf %424, %425 : vector<8x128xf32>
    %427 = vector.extract_strided_slice %410 {offsets = [0, 256], sizes = [8, 128], strides = [1, 1]} : vector<8x384xf32> to vector<8x128xf32>
    %428 = vector.extract_strided_slice %409 {offsets = [0, 256], sizes = [8, 128], strides = [1, 1]} : vector<8x384xf32> to vector<8x128xf32>
    %429 = arith.addf %428, %290 : vector<8x128xf32>
    %430 = arith.mulf %418, %429 : vector<8x128xf32>
    %431 = arith.addf %427, %430 : vector<8x128xf32>
    %432 = math.tanh %431 : vector<8x128xf32>
    %cst_152 = arith.constant 1.000000e+00 : f32
    %433 = vector.broadcast %cst_152 : f32 to vector<8x128xf32>
    %434 = arith.subf %433, %426 : vector<8x128xf32>
    %435 = arith.mulf %434, %432 : vector<8x128xf32>
    %436 = arith.mulf %426, %402 : vector<8x128xf32>
    %437 = arith.addf %435, %436 : vector<8x128xf32>
    %c3 = arith.constant 3 : index
    %c0_153 = arith.constant 0 : index
    %c0_154 = arith.constant 0 : index
    %438 = vector.load %arg6[%c3, %c0_153, %c0_154] : memref<8x8x128xf32, #tpu.memory_space<vmem>>, vector<1x8x128xf32>
    %439 = vector.shape_cast %438 : vector<1x8x128xf32> to vector<8x128xf32>
    %440 = vector.shape_cast %437 : vector<8x128xf32> to vector<1x8x128xf32>
    tpu.vector_store %arg6[%c3, %c0_153, %c0_154], %440 {strides = array<i32>} : memref<8x8x128xf32, #tpu.memory_space<vmem>>, vector<1x8x128xf32>,
    %441 = arith.truncf %437 : vector<8x128xf32> to vector<8x128xbf16>
    %c1_155 = arith.constant 1 : index
    %c0_156 = arith.constant 0 : index
    %c0_157 = arith.constant 0 : index
    %442 = vector.load %arg3[%c1_155, %c0_156, %c0_157] : memref<2x128x384xbf16, #tpu.memory_space<vmem>>, vector<1x128x384xbf16>
    %443 = vector.shape_cast %442 : vector<1x128x384xbf16> to vector<128x384xbf16>
    %cst_158 = arith.constant dense<0.000000e+00> : vector<8x384xf32>
    %444 = tpu.matmul %441, %443, %cst_158 {dimension_numbers = #tpu.dot_dimension_numbers<[1], [0], [0], [1], [0, 0, 1, 1], [], []>} : vector<8x128xbf16>, vector<128x384xbf16>, vector<8x384xf32> -> vector<8x384xf32>
    %c32_159 = arith.constant 32 : index
    %c0_160 = arith.constant 0 : index
    %445 = vector.load %arg8[%c32_159, %c0_160] : memref<64x384xf32, #tpu.memory_space<vmem>>, vector<8x384xf32>
    %446 = vector.extract_strided_slice %445 {offsets = [0, 0], sizes = [8, 128], strides = [1, 1]} : vector<8x384xf32> to vector<8x128xf32>
    %447 = vector.extract_strided_slice %444 {offsets = [0, 0], sizes = [8, 128], strides = [1, 1]} : vector<8x384xf32> to vector<8x128xf32>
    %448 = arith.addf %446, %447 : vector<8x128xf32>
    %449 = arith.negf %448 : vector<8x128xf32>
    %450 = math.exp %449 : vector<8x128xf32>
    %cst_161 = arith.constant 1.000000e+00 : f32
    %451 = vector.broadcast %cst_161 : f32 to vector<8x128xf32>
    %452 = arith.addf %451, %450 : vector<8x128xf32>
    %453 = arith.divf %451, %452 : vector<8x128xf32>
    %454 = vector.extract_strided_slice %445 {offsets = [0, 128], sizes = [8, 128], strides = [1, 1]} : vector<8x384xf32> to vector<8x128xf32>
    %455 = vector.extract_strided_slice %444 {offsets = [0, 128], sizes = [8, 128], strides = [1, 1]} : vector<8x384xf32> to vector<8x128xf32>
    %456 = arith.addf %454, %455 : vector<8x128xf32>
    %457 = arith.negf %456 : vector<8x128xf32>
    %458 = math.exp %457 : vector<8x128xf32>
    %cst_162 = arith.constant 1.000000e+00 : f32
    %459 = vector.broadcast %cst_162 : f32 to vector<8x128xf32>
    %460 = arith.addf %459, %458 : vector<8x128xf32>
    %461 = arith.divf %459, %460 : vector<8x128xf32>
    %462 = vector.extract_strided_slice %445 {offsets = [0, 256], sizes = [8, 128], strides = [1, 1]} : vector<8x384xf32> to vector<8x128xf32>
    %463 = vector.extract_strided_slice %444 {offsets = [0, 256], sizes = [8, 128], strides = [1, 1]} : vector<8x384xf32> to vector<8x128xf32>
    %464 = arith.addf %463, %290 : vector<8x128xf32>
    %465 = arith.mulf %453, %464 : vector<8x128xf32>
    %466 = arith.addf %462, %465 : vector<8x128xf32>
    %467 = math.tanh %466 : vector<8x128xf32>
    %cst_163 = arith.constant 1.000000e+00 : f32
    %468 = vector.broadcast %cst_163 : f32 to vector<8x128xf32>
    %469 = arith.subf %468, %461 : vector<8x128xf32>
    %470 = arith.mulf %469, %467 : vector<8x128xf32>
    %471 = arith.mulf %461, %437 : vector<8x128xf32>
    %472 = arith.addf %470, %471 : vector<8x128xf32>
    %c4 = arith.constant 4 : index
    %c0_164 = arith.constant 0 : index
    %c0_165 = arith.constant 0 : index
    %473 = vector.load %arg6[%c4, %c0_164, %c0_165] : memref<8x8x128xf32, #tpu.memory_space<vmem>>, vector<1x8x128xf32>
    %474 = vector.shape_cast %473 : vector<1x8x128xf32> to vector<8x128xf32>
    %475 = vector.shape_cast %472 : vector<8x128xf32> to vector<1x8x128xf32>
    tpu.vector_store %arg6[%c4, %c0_164, %c0_165], %475 {strides = array<i32>} : memref<8x8x128xf32, #tpu.memory_space<vmem>>, vector<1x8x128xf32>,
    %476 = arith.truncf %472 : vector<8x128xf32> to vector<8x128xbf16>
    %c1_166 = arith.constant 1 : index
    %c0_167 = arith.constant 0 : index
    %c0_168 = arith.constant 0 : index
    %477 = vector.load %arg3[%c1_166, %c0_167, %c0_168] : memref<2x128x384xbf16, #tpu.memory_space<vmem>>, vector<1x128x384xbf16>
    %478 = vector.shape_cast %477 : vector<1x128x384xbf16> to vector<128x384xbf16>
    %cst_169 = arith.constant dense<0.000000e+00> : vector<8x384xf32>
    %479 = tpu.matmul %476, %478, %cst_169 {dimension_numbers = #tpu.dot_dimension_numbers<[1], [0], [0], [1], [0, 0, 1, 1], [], []>} : vector<8x128xbf16>, vector<128x384xbf16>, vector<8x384xf32> -> vector<8x384xf32>
    %c40_170 = arith.constant 40 : index
    %c0_171 = arith.constant 0 : index
    %480 = vector.load %arg8[%c40_170, %c0_171] : memref<64x384xf32, #tpu.memory_space<vmem>>, vector<8x384xf32>
    %481 = vector.extract_strided_slice %480 {offsets = [0, 0], sizes = [8, 128], strides = [1, 1]} : vector<8x384xf32> to vector<8x128xf32>
    %482 = vector.extract_strided_slice %479 {offsets = [0, 0], sizes = [8, 128], strides = [1, 1]} : vector<8x384xf32> to vector<8x128xf32>
    %483 = arith.addf %481, %482 : vector<8x128xf32>
    %484 = arith.negf %483 : vector<8x128xf32>
    %485 = math.exp %484 : vector<8x128xf32>
    %cst_172 = arith.constant 1.000000e+00 : f32
    %486 = vector.broadcast %cst_172 : f32 to vector<8x128xf32>
    %487 = arith.addf %486, %485 : vector<8x128xf32>
    %488 = arith.divf %486, %487 : vector<8x128xf32>
    %489 = vector.extract_strided_slice %480 {offsets = [0, 128], sizes = [8, 128], strides = [1, 1]} : vector<8x384xf32> to vector<8x128xf32>
    %490 = vector.extract_strided_slice %479 {offsets = [0, 128], sizes = [8, 128], strides = [1, 1]} : vector<8x384xf32> to vector<8x128xf32>
    %491 = arith.addf %489, %490 : vector<8x128xf32>
    %492 = arith.negf %491 : vector<8x128xf32>
    %493 = math.exp %492 : vector<8x128xf32>
    %cst_173 = arith.constant 1.000000e+00 : f32
    %494 = vector.broadcast %cst_173 : f32 to vector<8x128xf32>
    %495 = arith.addf %494, %493 : vector<8x128xf32>
    %496 = arith.divf %494, %495 : vector<8x128xf32>
    %497 = vector.extract_strided_slice %480 {offsets = [0, 256], sizes = [8, 128], strides = [1, 1]} : vector<8x384xf32> to vector<8x128xf32>
    %498 = vector.extract_strided_slice %479 {offsets = [0, 256], sizes = [8, 128], strides = [1, 1]} : vector<8x384xf32> to vector<8x128xf32>
    %499 = arith.addf %498, %290 : vector<8x128xf32>
    %500 = arith.mulf %488, %499 : vector<8x128xf32>
    %501 = arith.addf %497, %500 : vector<8x128xf32>
    %502 = math.tanh %501 : vector<8x128xf32>
    %cst_174 = arith.constant 1.000000e+00 : f32
    %503 = vector.broadcast %cst_174 : f32 to vector<8x128xf32>
    %504 = arith.subf %503, %496 : vector<8x128xf32>
    %505 = arith.mulf %504, %502 : vector<8x128xf32>
    %506 = arith.mulf %496, %472 : vector<8x128xf32>
    %507 = arith.addf %505, %506 : vector<8x128xf32>
    %c5 = arith.constant 5 : index
    %c0_175 = arith.constant 0 : index
    %c0_176 = arith.constant 0 : index
    %508 = vector.load %arg6[%c5, %c0_175, %c0_176] : memref<8x8x128xf32, #tpu.memory_space<vmem>>, vector<1x8x128xf32>
    %509 = vector.shape_cast %508 : vector<1x8x128xf32> to vector<8x128xf32>
    %510 = vector.shape_cast %507 : vector<8x128xf32> to vector<1x8x128xf32>
    tpu.vector_store %arg6[%c5, %c0_175, %c0_176], %510 {strides = array<i32>} : memref<8x8x128xf32, #tpu.memory_space<vmem>>, vector<1x8x128xf32>,
    %511 = arith.truncf %507 : vector<8x128xf32> to vector<8x128xbf16>
    %c1_177 = arith.constant 1 : index
    %c0_178 = arith.constant 0 : index
    %c0_179 = arith.constant 0 : index
    %512 = vector.load %arg3[%c1_177, %c0_178, %c0_179] : memref<2x128x384xbf16, #tpu.memory_space<vmem>>, vector<1x128x384xbf16>
    %513 = vector.shape_cast %512 : vector<1x128x384xbf16> to vector<128x384xbf16>
    %cst_180 = arith.constant dense<0.000000e+00> : vector<8x384xf32>
    %514 = tpu.matmul %511, %513, %cst_180 {dimension_numbers = #tpu.dot_dimension_numbers<[1], [0], [0], [1], [0, 0, 1, 1], [], []>} : vector<8x128xbf16>, vector<128x384xbf16>, vector<8x384xf32> -> vector<8x384xf32>
    %c48_181 = arith.constant 48 : index
    %c0_182 = arith.constant 0 : index
    %515 = vector.load %arg8[%c48_181, %c0_182] : memref<64x384xf32, #tpu.memory_space<vmem>>, vector<8x384xf32>
    %516 = vector.extract_strided_slice %515 {offsets = [0, 0], sizes = [8, 128], strides = [1, 1]} : vector<8x384xf32> to vector<8x128xf32>
    %517 = vector.extract_strided_slice %514 {offsets = [0, 0], sizes = [8, 128], strides = [1, 1]} : vector<8x384xf32> to vector<8x128xf32>
    %518 = arith.addf %516, %517 : vector<8x128xf32>
    %519 = arith.negf %518 : vector<8x128xf32>
    %520 = math.exp %519 : vector<8x128xf32>
    %cst_183 = arith.constant 1.000000e+00 : f32
    %521 = vector.broadcast %cst_183 : f32 to vector<8x128xf32>
    %522 = arith.addf %521, %520 : vector<8x128xf32>
    %523 = arith.divf %521, %522 : vector<8x128xf32>
    %524 = vector.extract_strided_slice %515 {offsets = [0, 128], sizes = [8, 128], strides = [1, 1]} : vector<8x384xf32> to vector<8x128xf32>
    %525 = vector.extract_strided_slice %514 {offsets = [0, 128], sizes = [8, 128], strides = [1, 1]} : vector<8x384xf32> to vector<8x128xf32>
    %526 = arith.addf %524, %525 : vector<8x128xf32>
    %527 = arith.negf %526 : vector<8x128xf32>
    %528 = math.exp %527 : vector<8x128xf32>
    %cst_184 = arith.constant 1.000000e+00 : f32
    %529 = vector.broadcast %cst_184 : f32 to vector<8x128xf32>
    %530 = arith.addf %529, %528 : vector<8x128xf32>
    %531 = arith.divf %529, %530 : vector<8x128xf32>
    %532 = vector.extract_strided_slice %515 {offsets = [0, 256], sizes = [8, 128], strides = [1, 1]} : vector<8x384xf32> to vector<8x128xf32>
    %533 = vector.extract_strided_slice %514 {offsets = [0, 256], sizes = [8, 128], strides = [1, 1]} : vector<8x384xf32> to vector<8x128xf32>
    %534 = arith.addf %533, %290 : vector<8x128xf32>
    %535 = arith.mulf %523, %534 : vector<8x128xf32>
    %536 = arith.addf %532, %535 : vector<8x128xf32>
    %537 = math.tanh %536 : vector<8x128xf32>
    %cst_185 = arith.constant 1.000000e+00 : f32
    %538 = vector.broadcast %cst_185 : f32 to vector<8x128xf32>
    %539 = arith.subf %538, %531 : vector<8x128xf32>
    %540 = arith.mulf %539, %537 : vector<8x128xf32>
    %541 = arith.mulf %531, %507 : vector<8x128xf32>
    %542 = arith.addf %540, %541 : vector<8x128xf32>
    %c6 = arith.constant 6 : index
    %c0_186 = arith.constant 0 : index
    %c0_187 = arith.constant 0 : index
    %543 = vector.load %arg6[%c6, %c0_186, %c0_187] : memref<8x8x128xf32, #tpu.memory_space<vmem>>, vector<1x8x128xf32>
    %544 = vector.shape_cast %543 : vector<1x8x128xf32> to vector<8x128xf32>
    %545 = vector.shape_cast %542 : vector<8x128xf32> to vector<1x8x128xf32>
    tpu.vector_store %arg6[%c6, %c0_186, %c0_187], %545 {strides = array<i32>} : memref<8x8x128xf32, #tpu.memory_space<vmem>>, vector<1x8x128xf32>,
    %546 = arith.truncf %542 : vector<8x128xf32> to vector<8x128xbf16>
    %c1_188 = arith.constant 1 : index
    %c0_189 = arith.constant 0 : index
    %c0_190 = arith.constant 0 : index
    %547 = vector.load %arg3[%c1_188, %c0_189, %c0_190] : memref<2x128x384xbf16, #tpu.memory_space<vmem>>, vector<1x128x384xbf16>
    %548 = vector.shape_cast %547 : vector<1x128x384xbf16> to vector<128x384xbf16>
    %cst_191 = arith.constant dense<0.000000e+00> : vector<8x384xf32>
    %549 = tpu.matmul %546, %548, %cst_191 {dimension_numbers = #tpu.dot_dimension_numbers<[1], [0], [0], [1], [0, 0, 1, 1], [], []>} : vector<8x128xbf16>, vector<128x384xbf16>, vector<8x384xf32> -> vector<8x384xf32>
    %c56_192 = arith.constant 56 : index
    %c0_193 = arith.constant 0 : index
    %550 = vector.load %arg8[%c56_192, %c0_193] : memref<64x384xf32, #tpu.memory_space<vmem>>, vector<8x384xf32>
    %551 = vector.extract_strided_slice %550 {offsets = [0, 0], sizes = [8, 128], strides = [1, 1]} : vector<8x384xf32> to vector<8x128xf32>
    %552 = vector.extract_strided_slice %549 {offsets = [0, 0], sizes = [8, 128], strides = [1, 1]} : vector<8x384xf32> to vector<8x128xf32>
    %553 = arith.addf %551, %552 : vector<8x128xf32>
    %554 = arith.negf %553 : vector<8x128xf32>
    %555 = math.exp %554 : vector<8x128xf32>
    %cst_194 = arith.constant 1.000000e+00 : f32
    %556 = vector.broadcast %cst_194 : f32 to vector<8x128xf32>
    %557 = arith.addf %556, %555 : vector<8x128xf32>
    %558 = arith.divf %556, %557 : vector<8x128xf32>
    %559 = vector.extract_strided_slice %550 {offsets = [0, 128], sizes = [8, 128], strides = [1, 1]} : vector<8x384xf32> to vector<8x128xf32>
    %560 = vector.extract_strided_slice %549 {offsets = [0, 128], sizes = [8, 128], strides = [1, 1]} : vector<8x384xf32> to vector<8x128xf32>
    %561 = arith.addf %559, %560 : vector<8x128xf32>
    %562 = arith.negf %561 : vector<8x128xf32>
    %563 = math.exp %562 : vector<8x128xf32>
    %cst_195 = arith.constant 1.000000e+00 : f32
    %564 = vector.broadcast %cst_195 : f32 to vector<8x128xf32>
    %565 = arith.addf %564, %563 : vector<8x128xf32>
    %566 = arith.divf %564, %565 : vector<8x128xf32>
    %567 = vector.extract_strided_slice %550 {offsets = [0, 256], sizes = [8, 128], strides = [1, 1]} : vector<8x384xf32> to vector<8x128xf32>
    %568 = vector.extract_strided_slice %549 {offsets = [0, 256], sizes = [8, 128], strides = [1, 1]} : vector<8x384xf32> to vector<8x128xf32>
    %569 = arith.addf %568, %290 : vector<8x128xf32>
    %570 = arith.mulf %558, %569 : vector<8x128xf32>
    %571 = arith.addf %567, %570 : vector<8x128xf32>
    %572 = math.tanh %571 : vector<8x128xf32>
    %cst_196 = arith.constant 1.000000e+00 : f32
    %573 = vector.broadcast %cst_196 : f32 to vector<8x128xf32>
    %574 = arith.subf %573, %566 : vector<8x128xf32>
    %575 = arith.mulf %574, %572 : vector<8x128xf32>
    %576 = arith.mulf %566, %542 : vector<8x128xf32>
    %577 = arith.addf %575, %576 : vector<8x128xf32>
    %c7 = arith.constant 7 : index
    %c0_197 = arith.constant 0 : index
    %c0_198 = arith.constant 0 : index
    %578 = vector.load %arg6[%c7, %c0_197, %c0_198] : memref<8x8x128xf32, #tpu.memory_space<vmem>>, vector<1x8x128xf32>
    %579 = vector.shape_cast %578 : vector<1x8x128xf32> to vector<8x128xf32>
    %580 = vector.shape_cast %577 : vector<8x128xf32> to vector<1x8x128xf32>
    tpu.vector_store %arg6[%c7, %c0_197, %c0_198], %580 {strides = array<i32>} : memref<8x8x128xf32, #tpu.memory_space<vmem>>, vector<1x8x128xf32>,
    return
  }
  func.func @transform_0(%arg0: i32) -> (i32, i32, i32) {
    %c0_i32 = arith.constant 0 : i32
    %c0_i32_0 = arith.constant 0 : i32
    %c0_i32_1 = arith.constant 0 : i32
    return %arg0, %c0_i32, %c0_i32_0 : i32, i32, i32
  }
  func.func @transform_1(%arg0: i32) -> (i32, i32, i32) {
    %c0_i32 = arith.constant 0 : i32
    %c0_i32_0 = arith.constant 0 : i32
    %c0_i32_1 = arith.constant 0 : i32
    %c0_i32_2 = arith.constant 0 : i32
    return %c0_i32, %c0_i32_0, %c0_i32_1 : i32, i32, i32
  }
  func.func @transform_2(%arg0: i32) -> (i32, i32, i32) {
    %c0_i32 = arith.constant 0 : i32
    %c0_i32_0 = arith.constant 0 : i32
    %c0_i32_1 = arith.constant 0 : i32
    %c0_i32_2 = arith.constant 0 : i32
    return %c0_i32, %c0_i32_0, %c0_i32_1 : i32, i32, i32
  }
  func.func @transform_3(%arg0: i32) -> (i32, i32, i32) {
    %c0_i32 = arith.constant 0 : i32
    %c0_i32_0 = arith.constant 0 : i32
    %c0_i32_1 = arith.constant 0 : i32
    %c0_i32_2 = arith.constant 0 : i32
    return %c0_i32, %c0_i32_0, %c0_i32_1 : i32, i32, i32
  }
  func.func @transform_4(%arg0: i32) -> (i32, i32, i32) {
    %c0_i32 = arith.constant 0 : i32
    %c0_i32_0 = arith.constant 0 : i32
    %c0_i32_1 = arith.constant 0 : i32
    %c0_i32_2 = arith.constant 0 : i32
    return %c0_i32, %c0_i32_0, %c0_i32_1 : i32, i32, i32
  }
  func.func @transform_5(%arg0: i32) -> (i32, i32, i32) {
    %c0_i32 = arith.constant 0 : i32
    %c0_i32_0 = arith.constant 0 : i32
    %c0_i32_1 = arith.constant 0 : i32
    return %c0_i32, %arg0, %c0_i32_0 : i32, i32, i32
  }
}

</mosaic_0001>

<bundles_post_ra>
// kernel: discriminator_forward.1
= control target key start
LH: loop header
LB: loop body
LE: loop exit
PB: predicated region body
PF: predicated region fallthrough
CT: control target
= control target key end

     0   :  { %v6839_v1 = vmov 0   ;;  %v6840_v36 = vmov 0.0   ;;  %vm6841_vm0 = vmmov 0   ;;  %v70_v62 = vlaneseq  ;;  %s8555_s1 = inlined_call_operand.vmem [shape: bf16[2,128,384], index: 1, kind: input, shape index: {}]   ;;  %s8556_s0 = inlined_call_operand.vmem [shape: bf16[1,64,128], index: 0, kind: input, shape index: {}]   ;;  %s8557_s2 = inlined_call_operand.vmem [shape: bf16[2,128,384], index: 2, kind: input, shape index: {}]   ;;  %s8558_s3 = inlined_call_operand.vmem [shape: f32[2,1,384], index: 3, kind: input, shape index: {}]   ;;  %s8559_s4 = inlined_call_operand.vmem [shape: f32[2,1,128], index: 4, kind: input, shape index: {}]   ;;  %s8560_s5 = inlined_call_operand.vmem [shape: f32[8,8,128], index: 5, kind: output, shape index: {}]  }
   0x1   :  { %v6369_v0 = vld [vmem:[%s8555_s1 + $0x4] ss:$12 sps:$4 sm:$0xff]   ;;  %269 = vmatprep.mubr.bf16.mxu0 %v6839_v1  ;;  %v6371_v2 = vld [vmem:[%s8555_s1] ss:$12 sps:$4 sm:$0xff]   ;;  %v6372_v3 = vld [vmem:[%s8555_s1 + $0x1c] ss:$12 sps:$4 sm:$0xff]  }
   0x2   :  { %237 = vmatprep.subr.bf16.mxu0 %v6369_v0  ;;  %v6374_v4 = vld [vmem:[%s8555_s1 + $0x18] ss:$12 sps:$4 sm:$0xff]   ;;  %v6375_v5 = vld [vmem:[%s8555_s1 + $0x34] ss:$12 sps:$4 sm:$0xff]   ;;  %v6377_v6 = vld [vmem:[%s8555_s1 + $0x30] ss:$12 sps:$4 sm:$0xff]  }
   0x3   :  { %238 = vmatpush1.bf16.msra.mxu0 %v6371_v2  ;;  %v6378_v7 = vld [vmem:[%s8555_s1 + $0x4c] ss:$12 sps:$4 sm:$0xff]   ;;  %v6389_v8 = vld [vmem:[%s8555_s1 + $0x8] ss:$12 sps:$4 sm:$0xff]   ;;  %v6381_v10 = vld [vmem:[%s8555_s1 + $0x64] ss:$12 sps:$4 sm:$0xff]  }
   0x4   :  { %239 = vmatprep.subr.bf16.mxu0 %v6372_v3  ;;  %v6380_v9 = vld [vmem:[%s8555_s1 + $0x48] ss:$12 sps:$4 sm:$0xff]   ;;  %5998 = vmatprep.subr.bf16.mxu1 %v6389_v8  ;;  %v6393_v11 = vld [vmem:[%s8555_s1 + $0x20] ss:$12 sps:$4 sm:$0xff]   ;;  %v6396_v13 = vld [vmem:[%s8555_s1 + $0x38] ss:$12 sps:$4 sm:$0xff]  }
   0x5   :  { %5999 = vmatpush3.bf16.msra.mxu1 %v6389_v8  ;;  %v6395_v12 = vld [vmem:[%s8556_s0] sm:$0xff]   ;;  %v6384_v15 = vld [vmem:[%s8555_s1 + $0x7c] ss:$12 sps:$4 sm:$0xff]   ;;  %v6391_v21 = vld [vmem:[%s8555_s1 + $0xac] ss:$12 sps:$4 sm:$0xff]   ;;  %v7146_v63 = vshrl.u32 %v70_v62, 7 }
   0x6   :  { %6000 = vmatprep.subr.bf16.mxu1 %v6393_v11  ;;  %v6383_v14 = vld [vmem:[%s8555_s1 + $0x60] ss:$12 sps:$4 sm:$0xff]   ;;  %6014 = vmatprep.mubr.bf16.mxu1 %v6395_v12  ;;  %v6400_v16 = vld [vmem:[%s8555_s1 + $0x50] ss:$12 sps:$4 sm:$0xff]   ;;  %v6386_v17 = vld [vmem:[%s8555_s1 + $0x78] ss:$12 sps:$4 sm:$0xff]  }
   0x7   :  { %240 = vmatpush1.bf16.msra.mxu0 %v6374_v4  ;;  %v6387_v18 = vld [vmem:[%s8555_s1 + $0x94] ss:$12 sps:$4 sm:$0xff]   ;;  %v6390_v20 = vld [vmem:[%s8555_s1 + $0x90] ss:$12 sps:$4 sm:$0xff]   ;;  %v6414_v25 = vld [vmem:[%s8555_s1 + $0x98] ss:$12 sps:$4 sm:$0xff]  }
   0x8   :  { %241 = vmatprep.subr.bf16.mxu0 %v6375_v5  ;;  %v6405_v19 = vld [vmem:[%s8555_s1 + $0x68] ss:$12 sps:$4 sm:$0xff]   ;;  %v6409_v22 = vld [vmem:[%s8555_s1 + $0x80] ss:$12 sps:$4 sm:$0xff]   ;;  %v6945_v24 = vld [vmem:[%s8557_s2 + $0x4] ss:$12 sps:$4 sm:$0xff]  }
   0x9   :  { %6001 = vmatpush3.bf16.msra.mxu1 %v6393_v11  ;;  %v6394_v23 = vld [vmem:[%s8555_s1 + $0xa8] ss:$12 sps:$4 sm:$0xff]   ;;  %v6953_v26 = vld [vmem:[%s8557_s2] ss:$12 sps:$4 sm:$0xff]   ;;  %v6418_v28 = vld [vmem:[%s8555_s1 + $0xb0] ss:$12 sps:$4 sm:$0xff]  }
   0xa   :  { %6002 = vmatprep.subr.bf16.mxu1 %v6396_v13  ;;  %v6959_v27 = vld [vmem:[%s8557_s2 + $0x1c] ss:$12 sps:$4 sm:$0xff]   ;;  %v6968_v29 = vld [vmem:[%s8557_s2 + $0x18] ss:$12 sps:$4 sm:$0xff]   ;;  %v6975_v30 = vld [vmem:[%s8557_s2 + $0x34] ss:$12 sps:$4 sm:$0xff]  }
   0xb   :  { %242 = vmatpush1.bf16.msra.mxu0 %v6377_v6  ;;  %v6404_v31 = vld [vmem:[%s8556_s0 + $0x8] sm:$0xff]   ;;  %v6984_v32 = vld [vmem:[%s8557_s2 + $0x30] ss:$12 sps:$4 sm:$0xff]   ;;  %v6431_v42 = vld [vmem:[%s8557_s2 + $0x38] ss:$12 sps:$4 sm:$0xff]   ;;  %v72_v0 = vsub.s32 0, %v7146_v63 }
   0xc   :  { %243 = vmatprep.subr.bf16.mxu0 %v6378_v7  ;;  %v6990_v33 = vld [vmem:[%s8557_s2 + $0x4c] ss:$12 sps:$4 sm:$0xff]   ;;  %v6995_v34 = vld [vmem:[%s8557_s2 + $0x48] ss:$12 sps:$4 sm:$0xff]   ;;  %v7007_v38 = vld [vmem:[%s8557_s2 + $0x64] ss:$12 sps:$4 sm:$0xff]  }
   0xd   :  { %6003 = vmatpush3.bf16.msra.mxu1 %v6396_v13  ;;  %v6413_v35 = vld [vmem:[%s8556_s0 + $0x10] sm:$0xff]   ;;  %v6430_v39 = vld [vmem:[%s8557_s2 + $0x20] ss:$12 sps:$4 sm:$0xff]   ;;  %v7023_v41 = vld [vmem:[%s8557_s2 + $0x7c] ss:$12 sps:$4 sm:$0xff]   ;;  %v76_v3 = vsub.s32 1, %v7146_v63 }
   0xe   :  { %6004 = vmatprep.subr.bf16.mxu1 %v6400_v16  ;;  %v6426_v37 = vld [vmem:[%s8557_s2 + $0x8] ss:$12 sps:$4 sm:$0xff]   ;;  %v7018_v40 = vld [vmem:[%s8557_s2 + $0x60] ss:$12 sps:$4 sm:$0xff]   ;;  %v6422_v43 = vld [vmem:[%s8556_s0 + $0x18] sm:$0xff]   ;;  %v80_v11 = vsub.s32 2, %v7146_v63 }
   0xf   :  { %244 = vmatpush1.bf16.msra.mxu0 %v6380_v9  ;;  %v7037_v44 = vld [vmem:[%s8557_s2 + $0x78] ss:$12 sps:$4 sm:$0xff]   ;;  %v7042_v45 = vld [vmem:[%s8557_s2 + $0x94] ss:$12 sps:$4 sm:$0xff]   ;;  %v6432_v46 = vld [vmem:[%s8557_s2 + $0x50] ss:$12 sps:$4 sm:$0xff]  }
  0x10   :  { %245 = vmatprep.subr.bf16.mxu0 %v6381_v10  ;;  %v7054_v47 = vld [vmem:[%s8557_s2 + $0x90] ss:$12 sps:$4 sm:$0xff]   ;;  %v7061_v48 = vld [vmem:[%s8557_s2 + $0xac] ss:$12 sps:$4 sm:$0xff]   ;;  %v6433_v49 = vld [vmem:[%s8557_s2 + $0x68] ss:$12 sps:$4 sm:$0xff]  }
  0x11   :  { %6005 = vmatpush3.bf16.msra.mxu1 %v6400_v16  ;;  %v7072_v50 = vld [vmem:[%s8557_s2 + $0xa8] ss:$12 sps:$4 sm:$0xff]   ;;  %v6434_v51 = vld [vmem:[%s8557_s2 + $0x80] ss:$12 sps:$4 sm:$0xff]   ;;  %v6435_v52 = vld [vmem:[%s8557_s2 + $0x98] ss:$12 sps:$4 sm:$0xff]  }
  0x12   :  { %6006 = vmatprep.subr.bf16.mxu1 %v6405_v19  ;;  %v6436_v53 = vld [vmem:[%s8557_s2 + $0xb0] ss:$12 sps:$4 sm:$0xff]   ;;  %v6437_v54 = vld [vmem:[%s8557_s2 + $0x8] ss:$12 sps:$4 sm:$0xff]   ;;  %v6438_v55 = vld [vmem:[%s8557_s2 + $0x20] ss:$12 sps:$4 sm:$0xff]  }
  0x13   :  { %246 = vmatpush1.bf16.msra.mxu0 %v6383_v14  ;;  %v6439_v56 = vld [vmem:[%s8557_s2 + $0x38] ss:$12 sps:$4 sm:$0xff]   ;;  %v6440_v57 = vld [vmem:[%s8557_s2 + $0x50] ss:$12 sps:$4 sm:$0xff]   ;;  %v6441_v58 = vld [vmem:[%s8557_s2 + $0x68] ss:$12 sps:$4 sm:$0xff]  }
  0x14   :  { %247 = vmatprep.subr.bf16.mxu0 %v6384_v15  ;;  %v6442_v59 = vld [vmem:[%s8557_s2 + $0x80] ss:$12 sps:$4 sm:$0xff]   ;;  %v6443_v60 = vld [vmem:[%s8557_s2 + $0x98] ss:$12 sps:$4 sm:$0xff]   ;;  %v6444_v61 = vld [vmem:[%s8557_s2 + $0xb0] ss:$12 sps:$4 sm:$0xff]  }
  0x15   :  { %6007 = vmatpush3.bf16.msra.mxu1 %v6405_v19  ;;  %v28_v2 = vld [vmem:[%s8558_s3] sm:$0x7] }
  0x16   :  { %6008 = vmatprep.subr.bf16.mxu1 %v6409_v22  ;;  %v73_v5 = vrot.slane %v28_v2, %v72_v0  ;;  %v77_v7 = vrot.slane %v28_v2, %v76_v3  ;;  %v7164_v13 = vrot.slane %v28_v2, %v80_v11 }
  0x17   :  { %248 = vmatpush1.bf16.msra.mxu0 %v6386_v17 }
  0x18   :  { %249 = vmatprep.subr.bf16.mxu0 %v6387_v18 }
  0x19   :  { %6009 = vmatpush3.bf16.msra.mxu1 %v6409_v22 }
  0x1a   :  { %6010 = vmatprep.subr.bf16.mxu1 %v6414_v25 }
  0x1b   :  { %250 = vmatpush1.bf16.msra.mxu0 %v6390_v20 }
  0x1c   :  { %251 = vmatprep.subr.bf16.mxu0 %v6391_v21 }
  0x1d   :  { %6011 = vmatpush3.bf16.msra.mxu1 %v6414_v25 }
  0x1e   :  { %6012 = vmatprep.subr.bf16.mxu1 %v6418_v28 }
  0x1f   :  { %252 = vmatpush1.bf16.msra.mxu0 %v6394_v23 }
  0x20   :  { %559 = vmatprep.subr.bf16.mxu0 %v6945_v24 }
  0x21   :  { %6013 = vmatpush3.bf16.msra.mxu1 %v6418_v28 }
  0x22   :  { %270 = vmatmul.mubr.bf16.vlgmr.msra.gmra.mrb[0].mxu0 %v6395_v12  ;;  %6022 = vmatprep.subr.bf16.mxu1 %v6840_v36 }
  0x23   :  { %560 = vmatpush1.bf16.msra.mxu0 %v6953_v26  ;;  %279 = vmatprep.mubr.bf16.mxu0 %v6839_v1 }
  0x24   :  { %561 = vmatprep.subr.bf16.mxu0 %v6959_v27  ;;  %6015 = vmatmul.mubr.bf16.vlgmr.msra.gmra.mrb[0].mxu1 %v6404_v31 }
  0x25   :  { %6023 = vmatpush3.bf16.msra.mxu1 %v6426_v37  ;;  %6018 = vmatprep.mubr.bf16.mxu1 %v6413_v35 }
  0x26   :  { %6024 = vmatprep.subr.bf16.mxu1 %v6840_v36 }
  0x27   :  { %562 = vmatpush1.bf16.msra.mxu0 %v6968_v29 }
  0x28   :  { %563 = vmatprep.subr.bf16.mxu0 %v6975_v30 }
  0x29   :  { %6025 = vmatpush3.bf16.msra.mxu1 %v6430_v39 }
  0x2a   :  { %280 = vmatmul.mubr.bf16.gmra.mrb[4].mxu0 %v6404_v31  ;;  %6026 = vmatprep.subr.bf16.mxu1 %v6840_v36 }
  0x2b   :  { %564 = vmatpush1.bf16.msra.mxu0 %v6984_v32  ;;  %289 = vmatprep.mubr.bf16.mxu0 %v6839_v1 }
  0x2c   :  { %565 = vmatprep.subr.bf16.mxu0 %v6990_v33  ;;  %6019 = vmatmul.mubr.bf16.gmra.mrb[4].mxu1 %v6422_v43 }
  0x2d   :  { %6027 = vmatpush3.bf16.msra.mxu1 %v6431_v42  ;;  %6038 = vmatprep.mubr.msk.bf16.mxu1 %vm6841_vm0, %v6840_v36 }
  0x2e   :  { %6028 = vmatprep.subr.bf16.mxu1 %v6840_v36 }
  0x2f   :  { %566 = vmatpush1.bf16.msra.mxu0 %v6995_v34 }
  0x30   :  { %567 = vmatprep.subr.bf16.mxu0 %v7007_v38 }
  0x31   :  { %6029 = vmatpush3.bf16.msra.mxu1 %v6432_v46 }
  0x32   :  { %290 = vmatmul.mubr.bf16.gmra.mrb[8].mxu0 %v6413_v35  ;;  %6030 = vmatprep.subr.bf16.mxu1 %v6840_v36 }
  0x33   :  { %568 = vmatpush1.bf16.msra.mxu0 %v7018_v40  ;;  %299 = vmatprep.mubr.bf16.mxu0 %v6839_v1 }
  0x34   :  { %569 = vmatprep.subr.bf16.mxu0 %v7023_v41 }
  0x35   :  { %6031 = vmatpush3.bf16.msra.mxu1 %v6433_v49 }
  0x36   :  { %6032 = vmatprep.subr.bf16.mxu1 %v6840_v36 }
  0x37   :  { %570 = vmatpush1.bf16.msra.mxu0 %v7037_v44 }
  0x38   :  { %571 = vmatprep.subr.bf16.mxu0 %v7042_v45 }
  0x39   :  { %6033 = vmatpush3.bf16.msra.mxu1 %v6434_v51 }
  0x3a   :  { %300 = vmatmul.mubr.bf16.gmra.mrb[12].mxu0 %v6422_v43  ;;  %6034 = vmatprep.subr.bf16.mxu1 %v6840_v36 }
  0x3b   :  { %572 = vmatpush1.bf16.msra.mxu0 %v7054_v47  ;;  %591 = vmatprep.mubr.bf16.mxu0 %v6839_v1 }
  0x3c   :  { %573 = vmatprep.subr.bf16.mxu0 %v7061_v48 }
  0x3d   :  { %6035 = vmatpush3.bf16.msra.mxu1 %v6435_v52 }
  0x3e   :  { %6036 = vmatprep.subr.bf16.mxu1 %v6840_v36 }
  0x3f   :  { %574 = vmatpush1.bf16.msra.mxu0 %v7072_v50 }
  0x40   :  { %827 = vmatprep.subr.bf16.mxu0 %v6945_v24 }
  0x41   :  { %6037 = vmatpush3.bf16.msra.mxu1 %v6436_v53 }
  0x42   :  { %592 = vmatmul.mubr.bf16.vlgmr.msra.gmra.mrb[16].mxu0 %v6839_v1  ;;  %6042 = vmatprep.subr.bf16.mxu1 %v6840_v36 }
  0x43   :  { %828 = vmatpush1.bf16.msra.mxu0 %v6953_v26  ;;  %859 = vmatprep.mubr.bf16.mxu0 %v6839_v1 }
  0x44   :  { %829 = vmatprep.subr.bf16.mxu0 %v6959_v27  ;;  %6039 = vmatmul.mubr.bf16.vlgmr.msra.gmra.mrb[8].mxu1 %v6839_v1 }
  0x45   :  { %6058 = vmatprep.mubr.msk.bf16.mxu1 %vm6841_vm0, %v6840_v36  ;;  %6043 = vmatpush3.bf16.msra.mxu1 %v6437_v54 }
  0x46   :  { %6044 = vmatprep.subr.bf16.mxu1 %v6840_v36 }
  0x47   :  { %830 = vmatpush1.bf16.msra.mxu0 %v6968_v29 }
  0x48   :  { %831 = vmatprep.subr.bf16.mxu0 %v6975_v30 }
  0x49   :  { %6045 = vmatpush3.bf16.msra.mxu1 %v6438_v55 }
  0x4a   :  { %6046 = vmatprep.subr.bf16.mxu1 %v6840_v36 }
  0x4b   :  { %832 = vmatpush1.bf16.msra.mxu0 %v6984_v32 }
  0x4c   :  { %833 = vmatprep.subr.bf16.mxu0 %v6990_v33 }
  0x4d   :  { %6047 = vmatpush3.bf16.msra.mxu1 %v6439_v56 }
  0x4e   :  { %6048 = vmatprep.subr.bf16.mxu1 %v6840_v36 }
  0x4f   :  { %834 = vmatpush1.bf16.msra.mxu0 %v6995_v34 }
  0x50   :  { %835 = vmatprep.subr.bf16.mxu0 %v7007_v38 }
  0x51   :  { %6049 = vmatpush3.bf16.msra.mxu1 %v6440_v57 }
  0x52   :  { %6050 = vmatprep.subr.bf16.mxu1 %v6840_v36 }
  0x53   :  { %836 = vmatpush1.bf16.msra.mxu0 %v7018_v40 }
  0x54   :  { %837 = vmatprep.subr.bf16.mxu0 %v7023_v41 }
  0x55   :  { %6051 = vmatpush3.bf16.msra.mxu1 %v6441_v58 }
  0x56   :  { %6052 = vmatprep.subr.bf16.mxu1 %v6840_v36 }
  0x57   :  { %838 = vmatpush1.bf16.msra.mxu0 %v7037_v44 }
  0x58   :  { %839 = vmatprep.subr.bf16.mxu0 %v7042_v45 }
  0x59   :  { %6053 = vmatpush3.bf16.msra.mxu1 %v6442_v59 }
  0x5a   :  { %6054 = vmatprep.subr.bf16.mxu1 %v6840_v36 }
  0x5b   :  { %840 = vmatpush1.bf16.msra.mxu0 %v7054_v47 }
  0x5c   :  { %841 = vmatprep.subr.bf16.mxu0 %v7061_v48 }
  0x5d   :  { %6055 = vmatpush3.bf16.msra.mxu1 %v6443_v60 }
  0x5e   :  { %6056 = vmatprep.subr.bf16.mxu1 %v6840_v36 }
  0x5f   :  { %842 = vmatpush1.bf16.msra.mxu0 %v7072_v50 }
  0x60   :  { %1098 = vmatprep.subr.bf16.mxu0 %v6945_v24 }
  0x61   :  { %6057 = vmatpush3.bf16.msra.mxu1 %v6444_v61 }
  0x62   :  { %6062 = vmatprep.subr.bf16.mxu1 %v6840_v36 }
  0xf5   :  { %v271_v4 = vpop.f32.mrb[0].mxu0 }
  0xf6   :  { %v273_v6 = vpop.f32.mrb[1].mxu0  ;;  %v272_v61 = vadd.f32 %v271_v4, %v73_v5  ;;  %v7214_v4 = vld [vmem:[%s8559_s4] ss:$0 sm:$0xff] }
  0xf7   :  { %v275_v8 = vpop.f32.mrb[2].mxu0  ;;  %v6016_v19 = vpop.f32.mrb[0].mxu1  ;;  %v274_v62 = vadd.f32 %v273_v6, %v77_v7 }
  0xf8   :  { %v7157_v9 = vadd.f32 %v275_v8, %v73_v5  ;;  %v277_v10 = vpop.f32.mrb[3].mxu0  ;;  %v7173_v22 = vadd.f32 %v6016_v19, %v7164_v13  ;;  %v344_v23 = vpop.f32.mrb[1].mxu1 }
  0xf9   :  { %v7160_v12 = vadd.f32 %v277_v10, %v77_v7  ;;  %v6017_v25 = vpop.f32.mrb[2].mxu1 }
  0xfa   :  { %v7178_v26 = vadd.f32 %v6017_v25, %v7164_v13  ;;  %v347_v27 = vpop.f32.mrb[3].mxu1 }
  0xfb   :  { %v7181_v28 = vadd.f32 %v347_v27, %v7164_v13 }
  0xfd   :  { %v281_v14 = vpop.f32.mrb[4].mxu0 }
  0xfe   :  { %v7166_v15 = vadd.f32 %v281_v14, %v73_v5  ;;  %v283_v16 = vpop.f32.mrb[5].mxu0 }
  0xff   :  { %v7168_v17 = vadd.f32 %v283_v16, %v77_v7  ;;  %v285_v18 = vpop.f32.mrb[6].mxu0  ;;  %v6020_v34 = vpop.f32.mrb[4].mxu1 }
 0x100   :  { %v7170_v20 = vadd.f32 %v285_v18, %v73_v5  ;;  %v287_v21 = vpop.f32.mrb[7].mxu0  ;;  %v7190_v38 = vadd.f32 %v6020_v34, %v7164_v13  ;;  %v360_v39 = vpop.f32.mrb[5].mxu1 }
 0x101   :  { %v7175_v24 = vadd.f32 %v287_v21, %v77_v7  ;;  %v7195_v43 = vadd.f32 %v360_v39, %v7164_v13  ;;  %v6021_v46 = vpop.f32.mrb[6].mxu1  ;;  %v345_v39 = vadd.f32 %v344_v23, %v7164_v13  ;;  %v7232_v23 = vld [vmem:[%s8557_s2 + $0x1c] ss:$12 sps:$4 sm:$0xff]  }
 0x102   :  { %v7198_v49 = vadd.f32 %v6021_v46, %v7164_v13  ;;  %v363_v51 = vpop.f32.mrb[7].mxu1 }
 0x103   :  { %v7201_v52 = vadd.f32 %v363_v51, %v7164_v13  ;;  %v7225_v13 = vld [vmem:[%s8557_s2] ss:$12 sps:$4 sm:$0xff]  }
 0x105   :  { %v291_v29 = vpop.f32.mrb[8].mxu0 }
 0x106   :  { %v7183_v30 = vadd.f32 %v291_v29, %v73_v5  ;;  %v293_v31 = vpop.f32.mrb[9].mxu0 }
 0x107   :  { %v7185_v32 = vadd.f32 %v293_v31, %v77_v7  ;;  %v295_v33 = vpop.f32.mrb[10].mxu0 }
 0x108   :  { %v7187_v35 = vadd.f32 %v295_v33, %v73_v5  ;;  %v297_v37 = vpop.f32.mrb[11].mxu0 }
 0x109   :  { %v7192_v42 = vadd.f32 %v297_v37, %v77_v7 }
 0x10d   :  { %v301_v53 = vpop.f32.mrb[12].mxu0 }
 0x10e   :  { %v7203_v54 = vadd.f32 %v301_v53, %v73_v5  ;;  %v303_v55 = vpop.f32.mrb[13].mxu0 }
 0x10f   :  { %v7205_v56 = vadd.f32 %v303_v55, %v77_v7  ;;  %v305_v57 = vpop.f32.mrb[14].mxu0 }
 0x110   :  { %v7207_v58 = vadd.f32 %v305_v57, %v73_v5  ;;  %v307_v59 = vpop.f32.mrb[15].mxu0 }
 0x111   :  { %v7209_v60 = vadd.f32 %v307_v59, %v77_v7 }
 0x115   :  { %v593_v2 = vpop.f32.mrb[16].mxu0 }
 0x116   :  { %v643_v8 = vadd.f32 %v593_v2, %v272_v61  ;;  %v595_v10 = vpop.f32.mrb[17].mxu0 }
 0x117   :  { %v650_v14 = vadd.f32 %v595_v10, %v274_v62  ;;  %v597_v16 = vpop.f32.mrb[18].mxu0  ;;  %v634_v25 = vpop.f32.mrb[8].mxu1  ;;  %v7246_v10 = vld [vmem:[%s8557_s2 + $0x34] ss:$12 sps:$4 sm:$0xff]  }
 0x118   :  { %v5116_v18 = vmul.f32 -1.442695, %v643_v8  ;;  %v598_v19 = vpop.f32.mrb[19].mxu0  ;;  %v6040_v27 = vpop.f32.mrb[9].mxu1  ;;  %v657_v6 = vadd.f32 %v7214_v4, %v634_v25  ;;  %v7240_v8 = vld [vmem:[%s8557_s2 + $0x18] ss:$12 sps:$4 sm:$0xff]  }
 0x119   :  { %v5117_v21 = vmul.f32 -1.442695, %v650_v14  ;;  %v637_v29 = vpop.f32.mrb[10].mxu1  ;;  %v7252_v14 = vld [vmem:[%s8557_s2 + $0x30] ss:$12 sps:$4 sm:$0xff]  }
 0x11a   :  { %6661 = vpow2.f32 %v5116_v18  ;;  %v6041_v31 = vpop.f32.mrb[11].mxu1  ;;  %v7258_v16 = vld [vmem:[%s8557_s2 + $0x4c] ss:$12 sps:$4 sm:$0xff]   ;;  %v7264_v18 = vld [vmem:[%s8557_s2 + $0x48] ss:$12 sps:$4 sm:$0xff]  }
 0x11b   :  { %6663 = vpow2.f32 %v5117_v21  ;;  %v7270_v19 = vld [vmem:[%s8557_s2 + $0x64] ss:$12 sps:$4 sm:$0xff]  }
 0x11c   :  { %v6829_v21 = vld [vmem:[%s8557_s2 + $0x4] ss:$12 sps:$4 sm:$0xff]  }
 0x11d   :  { %v6452_v25 = vld [vmem:[%s8557_s2 + $0xb0] ss:$12 sps:$4 sm:$0xff]  }
 0x124   :  { %v6662_v33 = vpop.eup %6661 }
 0x125   :  { %v647_v34 = vadd.f32 1.0, %v6662_v33  ;;  %v6664_v37 = vpop.eup %6663 }
 0x126   :  { %v654_v5 = vadd.f32 1.0, %v6664_v37 }
 0x127   :  { %6665 = vrcp.f32 %v647_v34 }
 0x128   :  { %6667 = vrcp.f32 %v654_v5 }
 0x131   :  { %v6666_v7 = vpop.eup %6665 }
 0x132   :  { %v658_v46 = vmul.f32 %v6666_v7, %v657_v6  ;;  %v6668_v53 = vpop.eup %6667 }
 0x133   :  { %v661_v55 = vsub.f32 1.0, %v6668_v53  ;;  %v663_v61 = vmul.f32 0.0, %v6668_v53 }
 0x134   :  { %v659_v51 = vadd.f32 %v658_v46, %v345_v39 }
 0x136   :  { %6669 = vtanh.f32 %v659_v51 }
 0x140   :  { %v6670_v57 = vpop.eup %6669 }
 0x141   :  { %v662_v59 = vmul.f32 %v6670_v57, %v661_v55 }
 0x143   :  { %v7218_v62 = vadd.f32 %v663_v61, %v662_v59 }
 0x145   :  { %v665_v2 = vpack.c.bf16 %v7218_v62, %v7218_v62 }
 0x147   :  { %666 = vst [vmem:[#allocation2] sm:$0xf] %v665_v2  ;;  %860 = vmatmul.mubr.bf16.vlgmr.msra.gmra.mrb[20].mxu0 %v665_v2  ;;  %6059 = vmatmul.mubr.bf16.vlgmr.msra.gmra.mrb[12].mxu1 %v665_v2 }
 0x148   :  { %1099 = vmatpush1.bf16.msra.mxu0 %v7225_v13  ;;  %1130 = vmatprep.mubr.bf16.mxu0 %v6839_v1 }
 0x149   :  { %1100 = vmatprep.subr.bf16.mxu0 %v7232_v23  ;;  %6078 = vmatprep.mubr.msk.bf16.mxu1 %vm6841_vm0, %v6840_v36 }
 0x14c   :  { %1101 = vmatpush1.bf16.msra.mxu0 %v7240_v8 }
 0x14d   :  { %1102 = vmatprep.subr.bf16.mxu0 %v7246_v10 }
 0x150   :  { %1103 = vmatpush1.bf16.msra.mxu0 %v7252_v14 }
 0x151   :  { %1104 = vmatprep.subr.bf16.mxu0 %v7258_v16 }
 0x154   :  { %1105 = vmatpush1.bf16.msra.mxu0 %v7264_v18 }
 0x155   :  { %1106 = vmatprep.subr.bf16.mxu0 %v7270_v19 }
 0x158   :  { %1107 = vmatpush1.bf16.msra.mxu0 %v7018_v40  ;;  %v6445_v40 = vld [vmem:[%s8557_s2 + $0x8] ss:$12 sps:$4 sm:$0xff]  }
 0x159   :  { %1108 = vmatprep.subr.bf16.mxu0 %v7023_v41  ;;  %6063 = vmatpush3.bf16.msra.mxu1 %v6445_v40  ;;  %v6446_v41 = vld [vmem:[%s8557_s2 + $0x20] ss:$12 sps:$4 sm:$0xff]  }
 0x15a   :  { %6064 = vmatprep.subr.bf16.mxu1 %v6840_v36 }
 0x15c   :  { %1109 = vmatpush1.bf16.msra.mxu0 %v7037_v44  ;;  %v6447_v44 = vld [vmem:[%s8557_s2 + $0x38] ss:$12 sps:$4 sm:$0xff]  }
 0x15d   :  { %1110 = vmatprep.subr.bf16.mxu0 %v7042_v45  ;;  %6065 = vmatpush3.bf16.msra.mxu1 %v6446_v41  ;;  %v6448_v45 = vld [vmem:[%s8557_s2 + $0x50] ss:$12 sps:$4 sm:$0xff]  }
 0x15e   :  { %6066 = vmatprep.subr.bf16.mxu1 %v6840_v36 }
 0x160   :  { %1111 = vmatpush1.bf16.msra.mxu0 %v7054_v47  ;;  %v6449_v47 = vld [vmem:[%s8557_s2 + $0x68] ss:$12 sps:$4 sm:$0xff]  }
 0x161   :  { %1112 = vmatprep.subr.bf16.mxu0 %v7061_v48  ;;  %6067 = vmatpush3.bf16.msra.mxu1 %v6447_v44  ;;  %v6450_v48 = vld [vmem:[%s8557_s2 + $0x80] ss:$12 sps:$4 sm:$0xff]  }
 0x162   :  { %6068 = vmatprep.subr.bf16.mxu1 %v6840_v36 }
 0x164   :  { %1113 = vmatpush1.bf16.msra.mxu0 %v7072_v50  ;;  %v6451_v50 = vld [vmem:[%s8557_s2 + $0x98] ss:$12 sps:$4 sm:$0xff]  }
 0x165   :  { %1366 = vmatprep.subr.bf16.mxu0 %v6829_v21  ;;  %6069 = vmatpush3.bf16.msra.mxu1 %v6448_v45 }
 0x166   :  { %6070 = vmatprep.subr.bf16.mxu1 %v6840_v36 }
 0x169   :  { %6071 = vmatpush3.bf16.msra.mxu1 %v6449_v47 }
 0x16a   :  { %6072 = vmatprep.subr.bf16.mxu1 %v6840_v36 }
 0x16d   :  { %6073 = vmatpush3.bf16.msra.mxu1 %v6450_v48 }
 0x16e   :  { %6074 = vmatprep.subr.bf16.mxu1 %v6840_v36 }
 0x171   :  { %6075 = vmatpush3.bf16.msra.mxu1 %v6451_v50 }
 0x172   :  { %6076 = vmatprep.subr.bf16.mxu1 %v6840_v36 }
 0x175   :  { %6077 = vmatpush3.bf16.msra.mxu1 %v6452_v25  ;;  %v6456_v25 = vld [vmem:[%s8557_s2 + $0x50] ss:$12 sps:$4 sm:$0xff]  }
 0x176   :  { %6082 = vmatprep.subr.bf16.mxu1 %v6840_v36 }
 0x21a   :  { %v861_v27 = vpop.f32.mrb[20].mxu0  ;;  %v902_v29 = vpop.f32.mrb[12].mxu1 }
 0x21b   :  { %v911_v31 = vadd.f32 %v861_v27, %v7157_v9  ;;  %v863_v33 = vpop.f32.mrb[21].mxu0  ;;  %v6060_v34 = vpop.f32.mrb[13].mxu1  ;;  %v925_v61 = vadd.f32 %v7214_v4, %v902_v29  ;;  %v6457_v27 = vld [vmem:[%s8557_s2 + $0x68] ss:$12 sps:$4 sm:$0xff]   ;;  %v6458_v29 = vld [vmem:[%s8557_s2 + $0x80] ss:$12 sps:$4 sm:$0xff]  }
 0x21c   :  { %v918_v37 = vadd.f32 %v863_v33, %v7160_v12  ;;  %v865_v5 = vpop.f32.mrb[22].mxu0  ;;  %v905_v6 = vpop.f32.mrb[14].mxu1  ;;  %v6460_v33 = vld [vmem:[%s8557_s2 + $0xb0] ss:$12 sps:$4 sm:$0xff]  }
 0x21d   :  { %v5142_v7 = vmul.f32 -1.442695, %v911_v31  ;;  %v866_v39 = vpop.f32.mrb[23].mxu0  ;;  %v6061_v46 = vpop.f32.mrb[15].mxu1  ;;  %v6459_v31 = vld [vmem:[%s8557_s2 + $0x98] ss:$12 sps:$4 sm:$0xff]  }
 0x21e   :  { %v5143_v51 = vmul.f32 -1.442695, %v918_v37 }
 0x21f   :  { %6671 = vpow2.f32 %v5142_v7 }
 0x220   :  { %6673 = vpow2.f32 %v5143_v51 }
 0x229   :  { %v6672_v53 = vpop.eup %6671 }
 0x22a   :  { %v915_v55 = vadd.f32 1.0, %v6672_v53  ;;  %v6674_v57 = vpop.eup %6673 }
 0x22b   :  { %v922_v59 = vadd.f32 1.0, %v6674_v57 }
 0x22c   :  { %6675 = vrcp.f32 %v915_v55 }
 0x22d   :  { %6677 = vrcp.f32 %v922_v59 }
 0x236   :  { %v6676_v9 = vpop.eup %6675 }
 0x237   :  { %v926_v2 = vmul.f32 %v6676_v9, %v925_v61  ;;  %v6678_v21 = vpop.eup %6677 }
 0x238   :  { %v929_v40 = vsub.f32 1.0, %v6678_v21  ;;  %v931_v45 = vmul.f32 %v6678_v21, %v7218_v62  ;;  %v6831_v62 = vld [vmem:[%s8557_s2 + $0x7c] ss:$12 sps:$4 sm:$0xff]  }
 0x239   :  { %v927_v12 = vadd.f32 %v926_v2, %v7181_v28  ;;  %v6830_v28 = vld [vmem:[%s8557_s2 + $0x60] ss:$12 sps:$4 sm:$0xff]  }
 0x23b   :  { %6679 = vtanh.f32 %v927_v12 }
 0x245   :  { %v6680_v41 = vpop.eup %6679 }
 0x246   :  { %v930_v44 = vmul.f32 %v6680_v41, %v929_v40 }
 0x248   :  { %v7320_v47 = vadd.f32 %v931_v45, %v930_v44 }
 0x24a   :  { %v933_v48 = vpack.c.bf16 %v7320_v47, %v7320_v47 }
 0x24c   :  { %v935_v50 = vrot.slane %v933_v48, 4  ;;  %1131 = vmatmul.mubr.bf16.vlgmr.msra.gmra.mrb[24].mxu0 %v933_v48  ;;  %6079 = vmatmul.mubr.bf16.vlgmr.msra.gmra.mrb[16].mxu1 %v933_v48 }
 0x24d   :  { %1367 = vmatpush1.bf16.msra.mxu0 %v7225_v13  ;;  %1398 = vmatprep.mubr.bf16.mxu0 %v6839_v1  ;;  %v6832_v13 = vld [vmem:[%s8557_s2 + $0x78] ss:$12 sps:$4 sm:$0xff]  }
 0x24e   :  { %937 = vst [vmem:[#allocation2] sm:$0xf0] %v935_v50  ;;  %1368 = vmatprep.subr.bf16.mxu0 %v7232_v23  ;;  %6098 = vmatprep.mubr.msk.bf16.mxu1 %vm6841_vm0, %v6840_v36  ;;  %v6833_v23 = vld [vmem:[%s8557_s2 + $0x94] ss:$12 sps:$4 sm:$0xff]  }
 0x251   :  { %1369 = vmatpush1.bf16.msra.mxu0 %v7240_v8  ;;  %v6834_v8 = vld [vmem:[%s8557_s2 + $0x90] ss:$12 sps:$4 sm:$0xff]  }
 0x252   :  { %1370 = vmatprep.subr.bf16.mxu0 %v7246_v10  ;;  %v6835_v10 = vld [vmem:[%s8557_s2 + $0xac] ss:$12 sps:$4 sm:$0xff]  }
 0x255   :  { %1371 = vmatpush1.bf16.msra.mxu0 %v7252_v14  ;;  %v6836_v14 = vld [vmem:[%s8557_s2 + $0xa8] ss:$12 sps:$4 sm:$0xff]  }
 0x256   :  { %1372 = vmatprep.subr.bf16.mxu0 %v7258_v16  ;;  %v6453_v16 = vld [vmem:[%s8557_s2 + $0x8] ss:$12 sps:$4 sm:$0xff]  }
 0x257   :  { %6083 = vmatpush3.bf16.msra.mxu1 %v6453_v16  ;;  %v7440_v16 = vld [vmem:[%s8557_s2 + $0x30] ss:$12 sps:$4 sm:$0xff]  }
 0x258   :  { %6084 = vmatprep.subr.bf16.mxu1 %v6840_v36 }
 0x259   :  { %1373 = vmatpush1.bf16.msra.mxu0 %v7264_v18  ;;  %v6454_v18 = vld [vmem:[%s8557_s2 + $0x20] ss:$12 sps:$4 sm:$0xff]  }
 0x25a   :  { %1374 = vmatprep.subr.bf16.mxu0 %v7270_v19  ;;  %v6455_v19 = vld [vmem:[%s8557_s2 + $0x38] ss:$12 sps:$4 sm:$0xff]  }
 0x25b   :  { %6085 = vmatpush3.bf16.msra.mxu1 %v6454_v18  ;;  %v6472_v18 = vld [vmem:[%s8557_s2 + $0x38] ss:$12 sps:$4 sm:$0xff]  }
 0x25c   :  { %6086 = vmatprep.subr.bf16.mxu1 %v6840_v36 }
 0x25d   :  { %1375 = vmatpush1.bf16.msra.mxu0 %v6830_v28 }
 0x25e   :  { %1376 = vmatprep.subr.bf16.mxu0 %v6831_v62 }
 0x25f   :  { %6087 = vmatpush3.bf16.msra.mxu1 %v6455_v19  ;;  %v7450_v19 = vld [vmem:[%s8557_s2 + $0x4c] ss:$12 sps:$4 sm:$0xff]  }
 0x260   :  { %6088 = vmatprep.subr.bf16.mxu1 %v6840_v36 }
 0x261   :  { %1377 = vmatpush1.bf16.msra.mxu0 %v6832_v13  ;;  %v6464_v13 = vld [vmem:[%s8557_s2 + $0x8] ss:$12 sps:$4 sm:$0xff]  }
 0x262   :  { %1378 = vmatprep.subr.bf16.mxu0 %v6833_v23  ;;  %v7418_v23 = vld [vmem:[%s8557_s2 + $0x1c] ss:$12 sps:$4 sm:$0xff]  }
 0x263   :  { %6089 = vmatpush3.bf16.msra.mxu1 %v6456_v25  ;;  %v7456_v25 = vld [vmem:[%s8557_s2 + $0x48] ss:$12 sps:$4 sm:$0xff]  }
 0x264   :  { %6090 = vmatprep.subr.bf16.mxu1 %v6840_v36 }
 0x265   :  { %1379 = vmatpush1.bf16.msra.mxu0 %v6834_v8  ;;  %v7424_v8 = vld [vmem:[%s8557_s2 + $0x18] ss:$12 sps:$4 sm:$0xff]  }
 0x266   :  { %1380 = vmatprep.subr.bf16.mxu0 %v6835_v10  ;;  %v6468_v10 = vld [vmem:[%s8557_s2 + $0x20] ss:$12 sps:$4 sm:$0xff]  }
 0x267   :  { %6091 = vmatpush3.bf16.msra.mxu1 %v6457_v27  ;;  %v6476_v27 = vld [vmem:[%s8557_s2 + $0x50] ss:$12 sps:$4 sm:$0xff]  }
 0x268   :  { %6092 = vmatprep.subr.bf16.mxu1 %v6840_v36 }
 0x269   :  { %1381 = vmatpush1.bf16.msra.mxu0 %v6836_v14  ;;  %v7434_v14 = vld [vmem:[%s8557_s2 + $0x34] ss:$12 sps:$4 sm:$0xff]  }
 0x26b   :  { %6093 = vmatpush3.bf16.msra.mxu1 %v6458_v29  ;;  %v7466_v29 = vld [vmem:[%s8557_s2 + $0x64] ss:$12 sps:$4 sm:$0xff]  }
 0x26c   :  { %6094 = vmatprep.subr.bf16.mxu1 %v6840_v36 }
 0x26f   :  { %6095 = vmatpush3.bf16.msra.mxu1 %v6459_v31  ;;  %v7472_v31 = vld [vmem:[%s8557_s2 + $0x60] ss:$12 sps:$4 sm:$0xff]  }
 0x270   :  { %6096 = vmatprep.subr.bf16.mxu1 %v6840_v36 }
 0x273   :  { %6097 = vmatpush3.bf16.msra.mxu1 %v6460_v33  ;;  %v6480_v33 = vld [vmem:[%s8557_s2 + $0x68] ss:$12 sps:$4 sm:$0xff]  }
 0x274   :  { %6102 = vmatprep.subr.bf16.mxu1 %v6840_v36 }
 0x31f   :  { %v1132_v34 = vpop.f32.mrb[24].mxu0  ;;  %v1173_v37 = vpop.f32.mrb[16].mxu1 }
 0x320   :  { %v1182_v5 = vadd.f32 %v1132_v34, %v7166_v15  ;;  %v1134_v6 = vpop.f32.mrb[25].mxu0  ;;  %v6080_v7 = vpop.f32.mrb[17].mxu1  ;;  %v1196_v21 = vadd.f32 %v7214_v4, %v1173_v37  ;;  %v7481_v34 = vld [vmem:[%s8557_s2 + $0x7c] ss:$12 sps:$4 sm:$0xff]   ;;  %v7487_v37 = vld [vmem:[%s8557_s2 + $0x78] ss:$12 sps:$4 sm:$0xff]  }
 0x321   :  { %v1189_v39 = vadd.f32 %v1134_v6, %v7168_v17  ;;  %v1136_v46 = vpop.f32.mrb[26].mxu0  ;;  %v1176_v51 = vpop.f32.mrb[18].mxu1  ;;  %v7497_v6 = vld [vmem:[%s8557_s2 + $0x94] ss:$12 sps:$4 sm:$0xff]   ;;  %v7503_v7 = vld [vmem:[%s8557_s2 + $0x90] ss:$12 sps:$4 sm:$0xff]  }
 0x322   :  { %v5168_v53 = vmul.f32 -1.442695, %v1182_v5  ;;  %v1137_v55 = vpop.f32.mrb[27].mxu0  ;;  %v6081_v57 = vpop.f32.mrb[19].mxu1  ;;  %v6484_v5 = vld [vmem:[%s8557_s2 + $0x80] ss:$12 sps:$4 sm:$0xff]  }
 0x323   :  { %v5169_v59 = vmul.f32 -1.442695, %v1189_v39  ;;  %v6488_v39 = vld [vmem:[%s8557_s2 + $0x98] ss:$12 sps:$4 sm:$0xff]   ;;  %v7519_v51 = vld [vmem:[%s8557_s2 + $0xa8] ss:$12 sps:$4 sm:$0xff]  }
 0x324   :  { %6681 = vpow2.f32 %v5168_v53  ;;  %v7513_v46 = vld [vmem:[%s8557_s2 + $0xac] ss:$12 sps:$4 sm:$0xff]   ;;  %v6492_v53 = vld [vmem:[%s8557_s2 + $0xb0] ss:$12 sps:$4 sm:$0xff]  }
 0x325   :  { %6683 = vpow2.f32 %v5169_v59 }
 0x32e   :  { %v6682_v61 = vpop.eup %6681 }
 0x32f   :  { %v1186_v9 = vadd.f32 1.0, %v6682_v61  ;;  %v6684_v2 = vpop.eup %6683 }
 0x330   :  { %v1193_v12 = vadd.f32 1.0, %v6684_v2 }
 0x331   :  { %6685 = vrcp.f32 %v1186_v9 }
 0x332   :  { %6687 = vrcp.f32 %v1193_v12 }
 0x33b   :  { %v6686_v15 = vpop.eup %6685 }
 0x33c   :  { %v1197_v40 = vmul.f32 %v6686_v15, %v1196_v21  ;;  %v6688_v41 = vpop.eup %6687 }
 0x33d   :  { %v1200_v44 = vsub.f32 1.0, %v6688_v41  ;;  %v1202_v50 = vmul.f32 %v6688_v41, %v7320_v47  ;;  %v7408_v47 = vld [vmem:[%s8557_s2] ss:$12 sps:$4 sm:$0xff]  }
 0x33e   :  { %v1198_v17 = vadd.f32 %v1197_v40, %v7173_v22  ;;  %v7403_v22 = vld [vmem:[%s8557_s2 + $0x4] ss:$12 sps:$4 sm:$0xff]  }
 0x33f   :  { %1637 = vmatprep.subr.bf16.mxu0 %v7403_v22 }
 0x340   :  { %6689 = vtanh.f32 %v1198_v17 }
 0x34a   :  { %v6690_v45 = vpop.eup %6689 }
 0x34b   :  { %v1201_v48 = vmul.f32 %v6690_v45, %v1200_v44 }
 0x34d   :  { %v7393_v28 = vadd.f32 %v1202_v50, %v1201_v48 }
 0x34f   :  { %v1204_v62 = vpack.c.bf16 %v7393_v28, %v7393_v28 }
 0x351   :  { %1205 = vst [vmem:[#allocation2 + $0x8] sm:$0xf] %v1204_v62  ;;  %1399 = vmatmul.mubr.bf16.vlgmr.msra.gmra.mrb[28].mxu0 %v1204_v62  ;;  %6099 = vmatmul.mubr.bf16.vlgmr.msra.gmra.mrb[20].mxu1 %v1204_v62 }
 0x352   :  { %1669 = vmatprep.mubr.bf16.mxu0 %v6839_v1  ;;  %6118 = vmatprep.mubr.msk.bf16.mxu1 %vm6841_vm0, %v6840_v36 }
 0x353   :  { %1638 = vmatpush1.bf16.msra.mxu0 %v7408_v47  ;;  %6103 = vmatpush3.bf16.msra.mxu1 %v6464_v13 }
 0x354   :  { %6104 = vmatprep.subr.bf16.mxu1 %v6840_v36  ;;  %1639 = vmatprep.subr.bf16.mxu0 %v7418_v23 }
 0x357   :  { %1640 = vmatpush1.bf16.msra.mxu0 %v7424_v8  ;;  %6105 = vmatpush3.bf16.msra.mxu1 %v6468_v10 }
 0x358   :  { %6106 = vmatprep.subr.bf16.mxu1 %v6840_v36  ;;  %1641 = vmatprep.subr.bf16.mxu0 %v7434_v14 }
 0x35b   :  { %1642 = vmatpush1.bf16.msra.mxu0 %v7440_v16  ;;  %6107 = vmatpush3.bf16.msra.mxu1 %v6472_v18 }
 0x35c   :  { %6108 = vmatprep.subr.bf16.mxu1 %v6840_v36  ;;  %1643 = vmatprep.subr.bf16.mxu0 %v7450_v19 }
 0x35f   :  { %1644 = vmatpush1.bf16.msra.mxu0 %v7456_v25  ;;  %6109 = vmatpush3.bf16.msra.mxu1 %v6476_v27 }
 0x360   :  { %6110 = vmatprep.subr.bf16.mxu1 %v6840_v36  ;;  %1645 = vmatprep.subr.bf16.mxu0 %v7466_v29 }
 0x363   :  { %1646 = vmatpush1.bf16.msra.mxu0 %v7472_v31  ;;  %6111 = vmatpush3.bf16.msra.mxu1 %v6480_v33 }
 0x364   :  { %1647 = vmatprep.subr.bf16.mxu0 %v7481_v34  ;;  %6112 = vmatprep.subr.bf16.mxu1 %v6840_v36 }
 0x367   :  { %1648 = vmatpush1.bf16.msra.mxu0 %v7487_v37  ;;  %6113 = vmatpush3.bf16.msra.mxu1 %v6484_v5 }
 0x368   :  { %1649 = vmatprep.subr.bf16.mxu0 %v7497_v6  ;;  %6114 = vmatprep.subr.bf16.mxu1 %v6840_v36 }
 0x36b   :  { %1650 = vmatpush1.bf16.msra.mxu0 %v7503_v7  ;;  %6115 = vmatpush3.bf16.msra.mxu1 %v6488_v39 }
 0x36c   :  { %1651 = vmatprep.subr.bf16.mxu0 %v7513_v46  ;;  %6116 = vmatprep.subr.bf16.mxu1 %v6840_v36 }
 0x36f   :  { %1652 = vmatpush1.bf16.msra.mxu0 %v7519_v51  ;;  %6117 = vmatpush3.bf16.msra.mxu1 %v6492_v53 }
 0x370   :  { %1905 = vmatprep.subr.bf16.mxu0 %v7403_v22  ;;  %6122 = vmatprep.subr.bf16.mxu1 %v6840_v36 }
 0x424   :  { %v1400_v55 = vpop.f32.mrb[28].mxu0  ;;  %v1441_v57 = vpop.f32.mrb[20].mxu1 }
 0x425   :  { %v1450_v59 = vadd.f32 %v1400_v55, %v7170_v20  ;;  %v1402_v61 = vpop.f32.mrb[29].mxu0  ;;  %v6100_v9 = vpop.f32.mrb[21].mxu1  ;;  %v1464_v62 = vadd.f32 %v7214_v4, %v1441_v57  ;;  %v6495_v57 = vld [vmem:[%s8557_s2 + $0x38] ss:$12 sps:$4 sm:$0xff]  }
 0x426   :  { %v1457_v2 = vadd.f32 %v1402_v61, %v7175_v24  ;;  %v1404_v12 = vpop.f32.mrb[30].mxu0  ;;  %v1444_v21 = vpop.f32.mrb[22].mxu1  ;;  %v6497_v61 = vld [vmem:[%s8557_s2 + $0x68] ss:$12 sps:$4 sm:$0xff]   ;;  %v6498_v9 = vld [vmem:[%s8557_s2 + $0x80] ss:$12 sps:$4 sm:$0xff]  }
 0x427   :  { %v5194_v15 = vmul.f32 -1.442695, %v1450_v59  ;;  %v1405_v40 = vpop.f32.mrb[31].mxu0  ;;  %v6101_v17 = vpop.f32.mrb[23].mxu1  ;;  %v6496_v59 = vld [vmem:[%s8557_s2 + $0x50] ss:$12 sps:$4 sm:$0xff]  }
 0x428   :  { %v5195_v41 = vmul.f32 -1.442695, %v1457_v2  ;;  %v6499_v2 = vld [vmem:[%s8557_s2 + $0x98] ss:$12 sps:$4 sm:$0xff]   ;;  %v6500_v12 = vld [vmem:[%s8557_s2 + $0xb0] ss:$12 sps:$4 sm:$0xff]  }
 0x429   :  { %6691 = vpow2.f32 %v5194_v15 }
 0x42a   :  { %6693 = vpow2.f32 %v5195_v41 }
 0x433   :  { %v6692_v44 = vpop.eup %6691 }
 0x434   :  { %v1454_v45 = vadd.f32 1.0, %v6692_v44  ;;  %v6694_v48 = vpop.eup %6693 }
 0x435   :  { %v1461_v50 = vadd.f32 1.0, %v6694_v48 }
 0x436   :  { %6695 = vrcp.f32 %v1454_v45 }
 0x437   :  { %6697 = vrcp.f32 %v1461_v50 }
 0x440   :  { %v6696_v20 = vpop.eup %6695 }
 0x441   :  { %v1465_v13 = vmul.f32 %v6696_v20, %v1464_v62  ;;  %v6698_v10 = vpop.eup %6697 }
 0x442   :  { %v1468_v18 = vsub.f32 1.0, %v6698_v10  ;;  %v1470_v5 = vmul.f32 %v6698_v10, %v7393_v28  ;;  %v6494_v28 = vld [vmem:[%s8557_s2 + $0x20] ss:$12 sps:$4 sm:$0xff]  }
 0x443   :  { %v1466_v24 = vadd.f32 %v1465_v13, %v7178_v26  ;;  %v6493_v26 = vld [vmem:[%s8557_s2 + $0x8] ss:$12 sps:$4 sm:$0xff]  }
 0x445   :  { %6699 = vtanh.f32 %v1466_v24 }
 0x44f   :  { %v6700_v27 = vpop.eup %6699 }
 0x450   :  { %v1469_v33 = vmul.f32 %v6700_v27, %v1468_v18 }
 0x452   :  { %v7534_v39 = vadd.f32 %v1470_v5, %v1469_v33 }
 0x454   :  { %v1472_v53 = vpack.c.bf16 %v7534_v39, %v7534_v39 }
 0x456   :  { %v1474_v55 = vrot.slane %v1472_v53, 4  ;;  %1670 = vmatmul.mubr.bf16.vlgmr.msra.gmra.mrb[32].mxu0 %v1472_v53  ;;  %6119 = vmatmul.mubr.bf16.vlgmr.msra.gmra.mrb[24].mxu1 %v1472_v53 }
 0x457   :  { %1906 = vmatpush1.bf16.msra.mxu0 %v7408_v47  ;;  %1937 = vmatprep.mubr.bf16.mxu0 %v6839_v1 }
 0x458   :  { %1476 = vst [vmem:[#allocation2 + $0x8] sm:$0xf0] %v1474_v55  ;;  %1907 = vmatprep.subr.bf16.mxu0 %v7418_v23  ;;  %6138 = vmatprep.mubr.msk.bf16.mxu1 %vm6841_vm0, %v6840_v36 }
 0x459   :  { %6123 = vmatpush3.bf16.msra.mxu1 %v6493_v26 }
 0x45a   :  { %6124 = vmatprep.subr.bf16.mxu1 %v6840_v36 }
 0x45b   :  { %1908 = vmatpush1.bf16.msra.mxu0 %v7424_v8 }
 0x45c   :  { %1909 = vmatprep.subr.bf16.mxu0 %v7434_v14 }
 0x45d   :  { %6125 = vmatpush3.bf16.msra.mxu1 %v6494_v28 }
 0x45e   :  { %6126 = vmatprep.subr.bf16.mxu1 %v6840_v36 }
 0x45f   :  { %1910 = vmatpush1.bf16.msra.mxu0 %v7440_v16 }
 0x460   :  { %1911 = vmatprep.subr.bf16.mxu0 %v7450_v19 }
 0x461   :  { %6127 = vmatpush3.bf16.msra.mxu1 %v6495_v57 }
 0x462   :  { %6128 = vmatprep.subr.bf16.mxu1 %v6840_v36 }
 0x463   :  { %1912 = vmatpush1.bf16.msra.mxu0 %v7456_v25 }
 0x464   :  { %1913 = vmatprep.subr.bf16.mxu0 %v7466_v29 }
 0x465   :  { %6129 = vmatpush3.bf16.msra.mxu1 %v6496_v59 }
 0x466   :  { %6130 = vmatprep.subr.bf16.mxu1 %v6840_v36 }
 0x467   :  { %1914 = vmatpush1.bf16.msra.mxu0 %v7472_v31 }
 0x468   :  { %1915 = vmatprep.subr.bf16.mxu0 %v7481_v34 }
 0x469   :  { %6131 = vmatpush3.bf16.msra.mxu1 %v6497_v61 }
 0x46a   :  { %6132 = vmatprep.subr.bf16.mxu1 %v6840_v36 }
 0x46b   :  { %1916 = vmatpush1.bf16.msra.mxu0 %v7487_v37 }
 0x46c   :  { %1917 = vmatprep.subr.bf16.mxu0 %v7497_v6 }
 0x46d   :  { %6133 = vmatpush3.bf16.msra.mxu1 %v6498_v9  ;;  %v6503_v9 = vld [vmem:[%s8557_s2 + $0x38] ss:$12 sps:$4 sm:$0xff]  }
 0x46e   :  { %6134 = vmatprep.subr.bf16.mxu1 %v6840_v36 }
 0x46f   :  { %1918 = vmatpush1.bf16.msra.mxu0 %v7503_v7 }
 0x470   :  { %1919 = vmatprep.subr.bf16.mxu0 %v7513_v46 }
 0x471   :  { %6135 = vmatpush3.bf16.msra.mxu1 %v6499_v2  ;;  %v6505_v2 = vld [vmem:[%s8557_s2 + $0x68] ss:$12 sps:$4 sm:$0xff]  }
 0x472   :  { %6136 = vmatprep.subr.bf16.mxu1 %v6840_v36 }
 0x473   :  { %1920 = vmatpush1.bf16.msra.mxu0 %v7519_v51 }
 0x474   :  { %2176 = vmatprep.subr.bf16.mxu0 %v7403_v22 }
 0x475   :  { %6137 = vmatpush3.bf16.msra.mxu1 %v6500_v12  ;;  %v6506_v12 = vld [vmem:[%s8557_s2 + $0x80] ss:$12 sps:$4 sm:$0xff]  }
 0x476   :  { %6142 = vmatprep.subr.bf16.mxu1 %v6840_v36 }
 0x529   :  { %v1671_v21 = vpop.f32.mrb[32].mxu0  ;;  %v1712_v15 = vpop.f32.mrb[24].mxu1 }
 0x52a   :  { %v1721_v40 = vadd.f32 %v1671_v21, %v7183_v30  ;;  %v1673_v17 = vpop.f32.mrb[33].mxu0  ;;  %v6120_v41 = vpop.f32.mrb[25].mxu1  ;;  %v1735_v33 = vadd.f32 %v7214_v4, %v1712_v15  ;;  %v6507_v21 = vld [vmem:[%s8557_s2 + $0x98] ss:$12 sps:$4 sm:$0xff]   ;;  %v6508_v15 = vld [vmem:[%s8557_s2 + $0xb0] ss:$12 sps:$4 sm:$0xff]  }
 0x52b   :  { %v1728_v44 = vadd.f32 %v1673_v17, %v7185_v32  ;;  %v1675_v45 = vpop.f32.mrb[34].mxu0  ;;  %v1715_v48 = vpop.f32.mrb[26].mxu1 }
 0x52c   :  { %v5220_v50 = vmul.f32 -1.442695, %v1721_v40  ;;  %v1676_v62 = vpop.f32.mrb[35].mxu0  ;;  %v6121_v20 = vpop.f32.mrb[27].mxu1 }
 0x52d   :  { %v5221_v13 = vmul.f32 -1.442695, %v1728_v44 }
 0x52e   :  { %6701 = vpow2.f32 %v5220_v50 }
 0x52f   :  { %6703 = vpow2.f32 %v5221_v13 }
 0x538   :  { %v6702_v24 = vpop.eup %6701 }
 0x539   :  { %v1725_v10 = vadd.f32 1.0, %v6702_v24  ;;  %v6704_v18 = vpop.eup %6703 }
 0x53a   :  { %v1732_v27 = vadd.f32 1.0, %v6704_v18 }
 0x53b   :  { %6705 = vrcp.f32 %v1725_v10 }
 0x53c   :  { %6707 = vrcp.f32 %v1732_v27 }
 0x545   :  { %v6706_v30 = vpop.eup %6705 }
 0x546   :  { %v1736_v5 = vmul.f32 %v6706_v30, %v1735_v33  ;;  %v6708_v53 = vpop.eup %6707 }
 0x547   :  { %v1739_v55 = vsub.f32 1.0, %v6708_v53  ;;  %v1741_v57 = vmul.f32 %v6708_v53, %v7534_v39  ;;  %v6502_v39 = vld [vmem:[%s8557_s2 + $0x20] ss:$12 sps:$4 sm:$0xff]  }
 0x548   :  { %v1737_v32 = vadd.f32 %v1736_v5, %v7195_v43  ;;  %v6501_v43 = vld [vmem:[%s8557_s2 + $0x8] ss:$12 sps:$4 sm:$0xff]  }
 0x54a   :  { %6709 = vtanh.f32 %v1737_v32 }
 0x554   :  { %v6710_v26 = vpop.eup %6709 }
 0x555   :  { %v1740_v28 = vmul.f32 %v6710_v26, %v1739_v55 }
 0x557   :  { %v7594_v59 = vadd.f32 %v1741_v57, %v1740_v28 }
 0x559   :  { %v1743_v61 = vpack.c.bf16 %v7594_v59, %v7594_v59 }
 0x55b   :  { %1744 = vst [vmem:[#allocation2 + $0x10] sm:$0xf] %v1743_v61  ;;  %1938 = vmatmul.mubr.bf16.vlgmr.msra.gmra.mrb[36].mxu0 %v1743_v61  ;;  %6139 = vmatmul.mubr.bf16.vlgmr.msra.gmra.mrb[28].mxu1 %v1743_v61 }
 0x55c   :  { %2177 = vmatpush1.bf16.msra.mxu0 %v7408_v47  ;;  %2208 = vmatprep.mubr.bf16.mxu0 %v6839_v1 }
 0x55d   :  { %2178 = vmatprep.subr.bf16.mxu0 %v7418_v23  ;;  %6158 = vmatprep.mubr.msk.bf16.mxu1 %vm6841_vm0, %v6840_v36 }
 0x55e   :  { %6143 = vmatpush3.bf16.msra.mxu1 %v6501_v43 }
 0x55f   :  { %6144 = vmatprep.subr.bf16.mxu1 %v6840_v36 }
 0x560   :  { %2179 = vmatpush1.bf16.msra.mxu0 %v7424_v8 }
 0x561   :  { %2180 = vmatprep.subr.bf16.mxu0 %v7434_v14 }
 0x562   :  { %6145 = vmatpush3.bf16.msra.mxu1 %v6502_v39 }
 0x563   :  { %6146 = vmatprep.subr.bf16.mxu1 %v6840_v36 }
 0x564   :  { %2181 = vmatpush1.bf16.msra.mxu0 %v7440_v16 }
 0x565   :  { %2182 = vmatprep.subr.bf16.mxu0 %v7450_v19 }
 0x566   :  { %6147 = vmatpush3.bf16.msra.mxu1 %v6503_v9 }
 0x567   :  { %6148 = vmatprep.subr.bf16.mxu1 %v6840_v36 }
 0x568   :  { %2183 = vmatpush1.bf16.msra.mxu0 %v7456_v25 }
 0x569   :  { %2184 = vmatprep.subr.bf16.mxu0 %v7466_v29 }
 0x56c   :  { %2185 = vmatpush1.bf16.msra.mxu0 %v7472_v31 }
 0x56d   :  { %2186 = vmatprep.subr.bf16.mxu0 %v7481_v34 }
 0x570   :  { %2187 = vmatpush1.bf16.msra.mxu0 %v7487_v37 }
 0x571   :  { %2188 = vmatprep.subr.bf16.mxu0 %v7497_v6 }
 0x574   :  { %2189 = vmatpush1.bf16.msra.mxu0 %v7503_v7 }
 0x575   :  { %2190 = vmatprep.subr.bf16.mxu0 %v7513_v46 }
 0x578   :  { %2191 = vmatpush1.bf16.msra.mxu0 %v7519_v51 }
 0x579   :  { %2444 = vmatprep.subr.bf16.mxu0 %v7403_v22  ;;  %v6504_v22 = vld [vmem:[%s8557_s2 + $0x50] ss:$12 sps:$4 sm:$0xff]  }
 0x57a   :  { %6149 = vmatpush3.bf16.msra.mxu1 %v6504_v22 }
 0x57b   :  { %6150 = vmatprep.subr.bf16.mxu1 %v6840_v36 }
 0x57e   :  { %6151 = vmatpush3.bf16.msra.mxu1 %v6505_v2 }
 0x57f   :  { %6152 = vmatprep.subr.bf16.mxu1 %v6840_v36 }
 0x582   :  { %6153 = vmatpush3.bf16.msra.mxu1 %v6506_v12 }
 0x583   :  { %6154 = vmatprep.subr.bf16.mxu1 %v6840_v36 }
 0x586   :  { %6155 = vmatpush3.bf16.msra.mxu1 %v6507_v21 }
 0x587   :  { %6156 = vmatprep.subr.bf16.mxu1 %v6840_v36 }
 0x58a   :  { %6157 = vmatpush3.bf16.msra.mxu1 %v6508_v15 }
 0x58b   :  { %6162 = vmatprep.subr.bf16.mxu1 %v6840_v36 }
 0x62e   :  { %v1939_v40 = vpop.f32.mrb[36].mxu0  ;;  %v1980_v17 = vpop.f32.mrb[28].mxu1 }
 0x62f   :  { %v1989_v41 = vadd.f32 %v1939_v40, %v7187_v35  ;;  %v1941_v44 = vpop.f32.mrb[37].mxu0  ;;  %v6140_v45 = vpop.f32.mrb[29].mxu1  ;;  %v2003_v5 = vadd.f32 %v7214_v4, %v1980_v17 }
 0x630   :  { %v1996_v48 = vadd.f32 %v1941_v44, %v7192_v42  ;;  %v1943_v50 = vpop.f32.mrb[38].mxu0  ;;  %v1983_v62 = vpop.f32.mrb[30].mxu1 }
 0x631   :  { %v5246_v20 = vmul.f32 -1.442695, %v1989_v41  ;;  %v1944_v13 = vpop.f32.mrb[39].mxu0  ;;  %v6141_v24 = vpop.f32.mrb[31].mxu1 }
 0x632   :  { %v5247_v10 = vmul.f32 -1.442695, %v1996_v48 }
 0x633   :  { %6711 = vpow2.f32 %v5246_v20 }
 0x634   :  { %6713 = vpow2.f32 %v5247_v10  ;;  %v6517_v10 = vld [vmem:[%s8555_s1 + $0xc0] ss:$12 sps:$4 sm:$0xff]  }
 0x63d   :  { %v6712_v18 = vpop.eup %6711 }
 0x63e   :  { %v1993_v27 = vadd.f32 1.0, %v6712_v18  ;;  %v6714_v33 = vpop.eup %6713  ;;  %v6524_v18 = vld [vmem:[%s8555_s1 + $0xe0] ss:$12 sps:$4 sm:$0xff]  }
 0x63f   :  { %v2000_v30 = vadd.f32 1.0, %v6714_v33  ;;  %v6521_v33 = vld [vmem:[%s8555_s1 + $0xd8] ss:$12 sps:$4 sm:$0xff]  }
 0x640   :  { %6715 = vrcp.f32 %v1993_v27  ;;  %v2565_v27 = vld [vmem:[#allocation2] sm:$0xff] }
 0x641   :  { %6717 = vrcp.f32 %v2000_v30  ;;  %v6527_v30 = vld [vmem:[%s8555_s1 + $0xf4] ss:$12 sps:$4 sm:$0xff]  }
 0x64a   :  { %v6716_v35 = vpop.eup %6715 }
 0x64b   :  { %v2004_v32 = vmul.f32 %v6716_v35, %v2003_v5  ;;  %v6718_v53 = vpop.eup %6717  ;;  %v6528_v5 = vld [vmem:[%s8555_s1 + $0xf8] ss:$12 sps:$4 sm:$0xff]   ;;  %v6525_v35 = vld [vmem:[%s8555_s1 + $0xf0] ss:$12 sps:$4 sm:$0xff]  }
 0x64c   :  { %v2007_v55 = vsub.f32 1.0, %v6718_v53  ;;  %v2009_v57 = vmul.f32 %v6718_v53, %v7594_v59  ;;  %v6529_v53 = vld [vmem:[%s8555_s1 + $0x108] ss:$12 sps:$4 sm:$0xff]  }
 0x64d   :  { %v2005_v42 = vadd.f32 %v2004_v32, %v7201_v52  ;;  %v6509_v52 = vld [vmem:[%s8557_s2 + $0x8] ss:$12 sps:$4 sm:$0xff]   ;;  %v6531_v32 = vld [vmem:[%s8555_s1 + $0x10c] ss:$12 sps:$4 sm:$0xff]  }
 0x64f   :  { %6719 = vtanh.f32 %v2005_v42  ;;  %v6532_v42 = vld [vmem:[%s8555_s1 + $0x110] ss:$12 sps:$4 sm:$0xff]  }
 0x659   :  { %v6720_v26 = vpop.eup %6719 }
 0x65a   :  { %v2008_v28 = vmul.f32 %v6720_v26, %v2007_v55  ;;  %v6535_v55 = vld [vmem:[%s8555_s1 + $0x124] ss:$12 sps:$4 sm:$0xff]   ;;  %v6536_v26 = vld [vmem:[%s8555_s1 + $0x128] ss:$12 sps:$4 sm:$0xff]  }
 0x65c   :  { %v7654_v61 = vadd.f32 %v2009_v57, %v2008_v28  ;;  %v6533_v28 = vld [vmem:[%s8555_s1 + $0x120] ss:$12 sps:$4 sm:$0xff]   ;;  %v6539_v57 = vld [vmem:[%s8555_s1 + $0x13c] ss:$12 sps:$4 sm:$0xff]  }
 0x65e   :  { %v2011_v43 = vpack.c.bf16 %v7654_v61, %v7654_v61 }
 0x660   :  { %v2013_v39 = vrot.slane %v2011_v43, 4  ;;  %2209 = vmatmul.mubr.bf16.vlgmr.msra.gmra.mrb[40].mxu0 %v2011_v43  ;;  %6159 = vmatmul.mubr.bf16.vlgmr.msra.gmra.mrb[32].mxu1 %v2011_v43  ;;  %v6537_v43 = vld [vmem:[%s8555_s1 + $0x138] ss:$12 sps:$4 sm:$0xff]  }
 0x661   :  { %2445 = vmatpush1.bf16.msra.mxu0 %v7408_v47  ;;  %2476 = vmatprep.mubr.bf16.mxu0 %v6839_v1  ;;  %v6510_v47 = vld [vmem:[%s8557_s2 + $0x20] ss:$12 sps:$4 sm:$0xff]  }
 0x662   :  { %2015 = vst [vmem:[#allocation2 + $0x10] sm:$0xf0] %v2013_v39  ;;  %2446 = vmatprep.subr.bf16.mxu0 %v7418_v23  ;;  %6178 = vmatprep.mubr.msk.bf16.mxu1 %vm6841_vm0, %v6840_v36  ;;  %v6511_v23 = vld [vmem:[%s8557_s2 + $0x38] ss:$12 sps:$4 sm:$0xff]   ;;  %v6543_v39 = vld [vmem:[%s8555_s1 + $0x154] ss:$12 sps:$4 sm:$0xff]  }
 0x663   :  { %6163 = vmatpush3.bf16.msra.mxu1 %v6509_v52  ;;  %v6544_v52 = vld [vmem:[%s8555_s1 + $0x158] ss:$12 sps:$4 sm:$0xff]  }
 0x664   :  { %6164 = vmatprep.subr.bf16.mxu1 %v6840_v36 }
 0x665   :  { %2447 = vmatpush1.bf16.msra.mxu0 %v7424_v8  ;;  %v6512_v8 = vld [vmem:[%s8557_s2 + $0x50] ss:$12 sps:$4 sm:$0xff]  }
 0x666   :  { %2448 = vmatprep.subr.bf16.mxu0 %v7434_v14  ;;  %v6513_v14 = vld [vmem:[%s8557_s2 + $0x68] ss:$12 sps:$4 sm:$0xff]  }
 0x667   :  { %6165 = vmatpush3.bf16.msra.mxu1 %v6510_v47  ;;  %v6541_v47 = vld [vmem:[%s8555_s1 + $0x150] ss:$12 sps:$4 sm:$0xff]  }
 0x668   :  { %6166 = vmatprep.subr.bf16.mxu1 %v6840_v36 }
 0x669   :  { %2449 = vmatpush1.bf16.msra.mxu0 %v7440_v16  ;;  %v6514_v16 = vld [vmem:[%s8557_s2 + $0x80] ss:$12 sps:$4 sm:$0xff]  }
 0x66a   :  { %2450 = vmatprep.subr.bf16.mxu0 %v7450_v19  ;;  %v6519_v19 = vld [vmem:[%s8555_s1 + $0xc4] ss:$12 sps:$4 sm:$0xff]  }
 0x66b   :  { %6167 = vmatpush3.bf16.msra.mxu1 %v6511_v23  ;;  %v6547_v23 = vld [vmem:[%s8555_s1 + $0x16c] ss:$12 sps:$4 sm:$0xff]  }
 0x66c   :  { %6168 = vmatprep.subr.bf16.mxu1 %v6840_v36 }
 0x66d   :  { %2451 = vmatpush1.bf16.msra.mxu0 %v7456_v25  ;;  %v6515_v25 = vld [vmem:[%s8557_s2 + $0x98] ss:$12 sps:$4 sm:$0xff]  }
 0x66e   :  { %2452 = vmatprep.subr.bf16.mxu0 %v7466_v29  ;;  %v6516_v29 = vld [vmem:[%s8557_s2 + $0xb0] ss:$12 sps:$4 sm:$0xff]  }
 0x66f   :  { %6169 = vmatpush3.bf16.msra.mxu1 %v6512_v8  ;;  %v6548_v8 = vld [vmem:[%s8555_s1 + $0x170] ss:$12 sps:$4 sm:$0xff]  }
 0x670   :  { %6170 = vmatprep.subr.bf16.mxu1 %v6840_v36 }
 0x671   :  { %2453 = vmatpush1.bf16.msra.mxu0 %v7472_v31  ;;  %v6520_v31 = vld [vmem:[%s8555_s1 + $0xc8] ss:$12 sps:$4 sm:$0xff]  }
 0x672   :  { %2454 = vmatprep.subr.bf16.mxu0 %v7481_v34 }
 0x673   :  { %6171 = vmatpush3.bf16.msra.mxu1 %v6513_v14  ;;  %v6545_v14 = vld [vmem:[%s8555_s1 + $0x168] ss:$12 sps:$4 sm:$0xff]  }
 0x674   :  { %6172 = vmatprep.subr.bf16.mxu1 %v6840_v36 }
 0x675   :  { %2455 = vmatpush1.bf16.msra.mxu0 %v7487_v37 }
 0x676   :  { %2456 = vmatprep.subr.bf16.mxu0 %v7497_v6 }
 0x677   :  { %6173 = vmatpush3.bf16.msra.mxu1 %v6514_v16  ;;  %v2566_v16 = vld [vmem:[#allocation2 + $0x8] sm:$0xff] }
 0x678   :  { %6174 = vmatprep.subr.bf16.mxu1 %v6840_v36 }
 0x679   :  { %2457 = vmatpush1.bf16.msra.mxu0 %v7503_v7 }
 0x67a   :  { %2458 = vmatprep.subr.bf16.mxu0 %v7513_v46 }
 0x67b   :  { %6175 = vmatpush3.bf16.msra.mxu1 %v6515_v25  ;;  %v7796_v25 = vld [vmem:[%s8557_s2 + $0xc4] ss:$12 sps:$4 sm:$0xff]  }
 0x67c   :  { %6176 = vmatprep.subr.bf16.mxu1 %v6840_v36 }
 0x67d   :  { %2459 = vmatpush1.bf16.msra.mxu0 %v7519_v51 }
 0x67e   :  { %2746 = vmatprep.subr.bf16.mxu0 %v6519_v19  ;;  %v2567_v19 = vld [vmem:[#allocation2 + $0x10] sm:$0xff] }
 0x67f   :  { %6177 = vmatpush3.bf16.msra.mxu1 %v6516_v29  ;;  %v7801_v29 = vld [vmem:[%s8557_s2 + $0xc0] ss:$12 sps:$4 sm:$0xff]  }
 0x680   :  { %6182 = vmatprep.subr.bf16.mxu1 %v6520_v31 }
 0x733   :  { %v2210_v34 = vpop.f32.mrb[40].mxu0  ;;  %v2251_v37 = vpop.f32.mrb[32].mxu1 }
 0x734   :  { %v2260_v6 = vadd.f32 %v2210_v34, %v7203_v54  ;;  %v2212_v7 = vpop.f32.mrb[41].mxu0  ;;  %v6160_v46 = vpop.f32.mrb[33].mxu1  ;;  %v2274_v44 = vadd.f32 %v7214_v4, %v2251_v37  ;;  %v7813_v34 = vld [vmem:[%s8557_s2 + $0xd8] ss:$12 sps:$4 sm:$0xff]   ;;  %v7820_v37 = vld [vmem:[%s8557_s2 + $0xf4] ss:$12 sps:$4 sm:$0xff]  }
 0x735   :  { %v2267_v51 = vadd.f32 %v2212_v7, %v7205_v56  ;;  %v2214_v59 = vpop.f32.mrb[42].mxu0  ;;  %v2254_v9 = vpop.f32.mrb[34].mxu1  ;;  %v7832_v7 = vld [vmem:[%s8557_s2 + $0x10c] ss:$12 sps:$4 sm:$0xff]   ;;  %v7837_v46 = vld [vmem:[%s8557_s2 + $0x108] ss:$12 sps:$4 sm:$0xff]  }
 0x736   :  { %v5272_v22 = vmul.f32 -1.442695, %v2260_v6  ;;  %v2215_v2 = vpop.f32.mrb[43].mxu0  ;;  %v6161_v12 = vpop.f32.mrb[35].mxu1  ;;  %v7825_v6 = vld [vmem:[%s8557_s2 + $0xf0] ss:$12 sps:$4 sm:$0xff]  }
 0x737   :  { %v5273_v21 = vmul.f32 -1.442695, %v2267_v51  ;;  %v7844_v51 = vld [vmem:[%s8557_s2 + $0x124] ss:$12 sps:$4 sm:$0xff]   ;;  %v7849_v59 = vld [vmem:[%s8557_s2 + $0x120] ss:$12 sps:$4 sm:$0xff]  }
 0x738   :  { %6721 = vpow2.f32 %v5272_v22  ;;  %v7854_v9 = vld [vmem:[%s8557_s2 + $0x13c] ss:$12 sps:$4 sm:$0xff]   ;;  %v7861_v22 = vld [vmem:[%s8557_s2 + $0x138] ss:$12 sps:$4 sm:$0xff]   ;;  %v7868_v2 = vld [vmem:[%s8557_s2 + $0x154] ss:$12 sps:$4 sm:$0xff]  }
 0x739   :  { %6723 = vpow2.f32 %v5273_v21  ;;  %v6570_v12 = vld [vmem:[%s8557_s2 + $0xc8] ss:$12 sps:$4 sm:$0xff]   ;;  %v7876_v21 = vld [vmem:[%s8557_s2 + $0x150] ss:$12 sps:$4 sm:$0xff]  }
 0x742   :  { %v6722_v15 = vpop.eup %6721 }
 0x743   :  { %v2264_v40 = vadd.f32 1.0, %v6722_v15  ;;  %v6724_v17 = vpop.eup %6723  ;;  %v7881_v15 = vld [vmem:[%s8557_s2 + $0x16c] ss:$12 sps:$4 sm:$0xff]  }
 0x744   :  { %v2271_v41 = vadd.f32 1.0, %v6724_v17  ;;  %v7891_v17 = vld [vmem:[%s8557_s2 + $0x168] ss:$12 sps:$4 sm:$0xff]  }
 0x745   :  { %6725 = vrcp.f32 %v2264_v40  ;;  %v6574_v40 = vld [vmem:[%s8557_s2 + $0xe0] ss:$12 sps:$4 sm:$0xff]  }
 0x746   :  { %6727 = vrcp.f32 %v2271_v41  ;;  %v6575_v41 = vld [vmem:[%s8557_s2 + $0xf8] ss:$12 sps:$4 sm:$0xff]  }
 0x74f   :  { %v6726_v54 = vpop.eup %6725 }
 0x750   :  { %v2275_v45 = vmul.f32 %v6726_v54, %v2274_v44  ;;  %v6728_v48 = vpop.eup %6727  ;;  %v6576_v44 = vld [vmem:[%s8557_s2 + $0x110] ss:$12 sps:$4 sm:$0xff]   ;;  %v6577_v54 = vld [vmem:[%s8557_s2 + $0x128] ss:$12 sps:$4 sm:$0xff]  }
 0x751   :  { %v2278_v50 = vsub.f32 1.0, %v6728_v48  ;;  %v2280_v13 = vmul.f32 %v6728_v48, %v7654_v61  ;;  %v6540_v61 = vld [vmem:[%s8555_s1 + $0x140] ss:$12 sps:$4 sm:$0xff]   ;;  %v6580_v48 = vld [vmem:[%s8557_s2 + $0x170] ss:$12 sps:$4 sm:$0xff]  }
 0x752   :  { %v2276_v56 = vadd.f32 %v2275_v45, %v7190_v38  ;;  %v6523_v38 = vld [vmem:[%s8555_s1 + $0xdc] ss:$12 sps:$4 sm:$0xff]   ;;  %v6578_v45 = vld [vmem:[%s8557_s2 + $0x140] ss:$12 sps:$4 sm:$0xff]  }
 0x754   :  { %6729 = vtanh.f32 %v2276_v56  ;;  %v6579_v56 = vld [vmem:[%s8557_s2 + $0x158] ss:$12 sps:$4 sm:$0xff]  }
 0x75e   :  { %v6730_v62 = vpop.eup %6729 }
 0x75f   :  { %v2279_v20 = vmul.f32 %v6730_v62, %v2278_v50 }
 0x761   :  { %v7718_v24 = vadd.f32 %v2280_v13, %v2279_v20 }
 0x763   :  { %v2282_v4 = vpack.c.bf16 %v7718_v24, %v7718_v24 }
 0x765   :  { %2283 = vst [vmem:[#allocation2 + $0x18] sm:$0xf] %v2282_v4  ;;  %2477 = vmatmul.mubr.bf16.vlgmr.msra.gmra.mrb[44].mxu0 %v2282_v4  ;;  %6179 = vmatmul.mubr.bf16.vlgmr.msra.gmra.mrb[36].mxu1 %v2282_v4 }
 0x766   :  { %2747 = vmatpush1.bf16.msra.mxu0 %v6517_v10  ;;  %6183 = vmatpush3.bf16.msra.mxu1 %v6520_v31  ;;  %v7808_v31 = vld [vmem:[%s8557_s2 + $0xdc] ss:$12 sps:$4 sm:$0xff]  }
 0x767   :  { %6198 = vmatprep.mubr.bf16.mxu1 %v2565_v27  ;;  %2748 = vmatprep.subr.bf16.mxu0 %v6523_v38 }
 0x768   :  { %6184 = vmatprep.subr.bf16.mxu1 %v6524_v18  ;;  %2778 = vmatprep.mubr.bf16.mxu0 %v6839_v1 }
 0x76a   :  { %2749 = vmatpush1.bf16.msra.mxu0 %v6521_v33  ;;  %6185 = vmatpush3.bf16.msra.mxu1 %v6524_v18 }
 0x76b   :  { %2750 = vmatprep.subr.bf16.mxu0 %v6527_v30  ;;  %6186 = vmatprep.subr.bf16.mxu1 %v6528_v5 }
 0x76e   :  { %2751 = vmatpush1.bf16.msra.mxu0 %v6525_v35  ;;  %6187 = vmatpush3.bf16.msra.mxu1 %v6528_v5 }
 0x76f   :  { %2752 = vmatprep.subr.bf16.mxu0 %v6531_v32  ;;  %6188 = vmatprep.subr.bf16.mxu1 %v6532_v42 }
 0x772   :  { %2753 = vmatpush1.bf16.msra.mxu0 %v6529_v53  ;;  %6189 = vmatpush3.bf16.msra.mxu1 %v6532_v42 }
 0x773   :  { %2754 = vmatprep.subr.bf16.mxu0 %v6535_v55  ;;  %6190 = vmatprep.subr.bf16.mxu1 %v6536_v26 }
 0x776   :  { %2755 = vmatpush1.bf16.msra.mxu0 %v6533_v28  ;;  %6191 = vmatpush3.bf16.msra.mxu1 %v6536_v26 }
 0x777   :  { %2756 = vmatprep.subr.bf16.mxu0 %v6539_v57  ;;  %6192 = vmatprep.subr.bf16.mxu1 %v6540_v61 }
 0x77a   :  { %2757 = vmatpush1.bf16.msra.mxu0 %v6537_v43  ;;  %6193 = vmatpush3.bf16.msra.mxu1 %v6540_v61 }
 0x77b   :  { %2758 = vmatprep.subr.bf16.mxu0 %v6543_v39  ;;  %6194 = vmatprep.subr.bf16.mxu1 %v6544_v52 }
 0x77e   :  { %2759 = vmatpush1.bf16.msra.mxu0 %v6541_v47  ;;  %6195 = vmatpush3.bf16.msra.mxu1 %v6544_v52 }
 0x77f   :  { %2760 = vmatprep.subr.bf16.mxu0 %v6547_v23  ;;  %6196 = vmatprep.subr.bf16.mxu1 %v6548_v8 }
 0x782   :  { %2761 = vmatpush1.bf16.msra.mxu0 %v6545_v14  ;;  %6197 = vmatpush3.bf16.msra.mxu1 %v6548_v8 }
 0x783   :  { %6206 = vmatprep.subr.bf16.mxu1 %v6840_v36  ;;  %3069 = vmatprep.subr.bf16.mxu0 %v7796_v25 }
 0x785   :  { %2779 = vmatmul.mubr.bf16.vlgmr.msra.gmra.mrb[48].mxu0 %v2565_v27  ;;  %6199 = vmatmul.mubr.bf16.vlgmr.msra.gmra.mrb[40].mxu1 %v2566_v16 }
 0x786   :  { %6202 = vmatprep.mubr.bf16.mxu1 %v2567_v19  ;;  %2788 = vmatprep.mubr.bf16.mxu0 %v6839_v1 }
 0x787   :  { %3070 = vmatpush1.bf16.msra.mxu0 %v7801_v29  ;;  %6207 = vmatpush3.bf16.msra.mxu1 %v6570_v12 }
 0x788   :  { %3071 = vmatprep.subr.bf16.mxu0 %v7808_v31  ;;  %6208 = vmatprep.subr.bf16.mxu1 %v6840_v36 }
 0x78b   :  { %3072 = vmatpush1.bf16.msra.mxu0 %v7813_v34  ;;  %6209 = vmatpush3.bf16.msra.mxu1 %v6574_v40 }
 0x78c   :  { %3073 = vmatprep.subr.bf16.mxu0 %v7820_v37  ;;  %6210 = vmatprep.subr.bf16.mxu1 %v6840_v36 }
 0x78d   :  { %2789 = vmatmul.mubr.bf16.gmra.mrb[52].mxu0 %v2566_v16 }
 0x78e   :  { %2798 = vmatprep.mubr.bf16.mxu0 %v6839_v1 }
 0x78f   :  { %3074 = vmatpush1.bf16.msra.mxu0 %v7825_v6  ;;  %6211 = vmatpush3.bf16.msra.mxu1 %v6575_v41 }
 0x790   :  { %3075 = vmatprep.subr.bf16.mxu0 %v7832_v7  ;;  %6212 = vmatprep.subr.bf16.mxu1 %v6840_v36 }
 0x793   :  { %3076 = vmatpush1.bf16.msra.mxu0 %v7837_v46  ;;  %6213 = vmatpush3.bf16.msra.mxu1 %v6576_v44 }
 0x794   :  { %3077 = vmatprep.subr.bf16.mxu0 %v7844_v51  ;;  %6214 = vmatprep.subr.bf16.mxu1 %v6840_v36 }
 0x795   :  { %2799 = vmatmul.mubr.bf16.gmra.mrb[56].mxu0 %v2567_v19 }
 0x796   :  { %2808 = vmatprep.mubr.bf16.mxu0 %v6839_v1 }
 0x797   :  { %3078 = vmatpush1.bf16.msra.mxu0 %v7849_v59  ;;  %6215 = vmatpush3.bf16.msra.mxu1 %v6577_v54 }
 0x798   :  { %3079 = vmatprep.subr.bf16.mxu0 %v7854_v9  ;;  %6216 = vmatprep.subr.bf16.mxu1 %v6840_v36 }
 0x79b   :  { %3080 = vmatpush1.bf16.msra.mxu0 %v7861_v22  ;;  %6217 = vmatpush3.bf16.msra.mxu1 %v6578_v45 }
 0x79c   :  { %3081 = vmatprep.subr.bf16.mxu0 %v7868_v2  ;;  %6218 = vmatprep.subr.bf16.mxu1 %v6840_v36 }
 0x79f   :  { %3082 = vmatpush1.bf16.msra.mxu0 %v7876_v21  ;;  %6219 = vmatpush3.bf16.msra.mxu1 %v6579_v56 }
 0x7a0   :  { %3083 = vmatprep.subr.bf16.mxu0 %v7881_v15  ;;  %6220 = vmatprep.subr.bf16.mxu1 %v6840_v36 }
 0x7a3   :  { %3084 = vmatpush1.bf16.msra.mxu0 %v7891_v17  ;;  %6221 = vmatpush3.bf16.msra.mxu1 %v6580_v48 }
 0x7a4   :  { %3337 = vmatprep.subr.bf16.mxu0 %v7796_v25  ;;  %6226 = vmatprep.subr.bf16.mxu1 %v6840_v36 }
 0x838   :  { %v2478_v50 = vpop.f32.mrb[44].mxu0  ;;  %v2519_v62 = vpop.f32.mrb[36].mxu1 }
 0x839   :  { %v2528_v20 = vadd.f32 %v2478_v50, %v7207_v58  ;;  %v2480_v13 = vpop.f32.mrb[45].mxu0  ;;  %v6180_v10 = vpop.f32.mrb[37].mxu1  ;;  %v6837_v58 = vld [vmem:[%s8559_s4] ss:$0 sm:$0xff] }
 0x83a   :  { %v2535_v4 = vadd.f32 %v2480_v13, %v7209_v60  ;;  %v2482_v38 = vpop.f32.mrb[46].mxu0  ;;  %v2522_v18 = vpop.f32.mrb[38].mxu1  ;;  %v2542_v55 = vadd.f32 %v6837_v58, %v2519_v62 }
 0x83b   :  { %v5298_v27 = vmul.f32 -1.442695, %v2528_v20  ;;  %v2483_v33 = vpop.f32.mrb[47].mxu0  ;;  %v6181_v30 = vpop.f32.mrb[39].mxu1  ;;  %v6583_v38 = vld [vmem:[%s8557_s2 + $0xf8] ss:$12 sps:$4 sm:$0xff]  }
 0x83c   :  { %v5299_v5 = vmul.f32 -1.442695, %v2535_v4  ;;  %v6582_v4 = vld [vmem:[%s8557_s2 + $0xe0] ss:$12 sps:$4 sm:$0xff]   ;;  %v6584_v18 = vld [vmem:[%s8557_s2 + $0x110] ss:$12 sps:$4 sm:$0xff]  }
 0x83d   :  { %6731 = vpow2.f32 %v5298_v27  ;;  %v6585_v27 = vld [vmem:[%s8557_s2 + $0x128] ss:$12 sps:$4 sm:$0xff]   ;;  %v6586_v33 = vld [vmem:[%s8557_s2 + $0x140] ss:$12 sps:$4 sm:$0xff]   ;;  %v6587_v30 = vld [vmem:[%s8557_s2 + $0x158] ss:$12 sps:$4 sm:$0xff]  }
 0x83e   :  { %6733 = vpow2.f32 %v5299_v5  ;;  %v6588_v5 = vld [vmem:[%s8557_s2 + $0x170] ss:$12 sps:$4 sm:$0xff]  }
 0x847   :  { %v6732_v35 = vpop.eup %6731 }
 0x848   :  { %v2532_v32 = vadd.f32 1.0, %v6732_v35  ;;  %v6734_v42 = vpop.eup %6733  ;;  %v5302_v35 = vld [vmem:[%s8558_s3 + $0x3] sm:$0x7] }
 0x849   :  { %v2539_v53 = vadd.f32 1.0, %v6734_v42 }
 0x84a   :  { %6735 = vrcp.f32 %v2532_v32 }
 0x84b   :  { %6737 = vrcp.f32 %v2539_v53 }
 0x854   :  { %v6736_v26 = vpop.eup %6735 }
 0x855   :  { %v2543_v60 = vmul.f32 %v6736_v26, %v2542_v55  ;;  %v6738_v14 = vpop.eup %6737 }
 0x856   :  { %v2546_v19 = vsub.f32 1.0, %v6738_v14  ;;  %v2548_v54 = vmul.f32 %v6738_v14, %v7718_v24  ;;  %v6581_v24 = vld [vmem:[%s8557_s2 + $0xc8] ss:$12 sps:$4 sm:$0xff]  }
 0x857   :  { %v2544_v28 = vadd.f32 %v2543_v60, %v7198_v49  ;;  %v8034_v60 = vrot.slane %v5302_v35, %v72_v0 }
 0x858   :  { %v7928_v57 = vpop.f32.mrb[48].mxu0  ;;  %v7930_v61 = vpop.f32.mrb[40].mxu1 }
 0x859   :  { %6739 = vtanh.f32 %v2544_v28  ;;  %v7932_v43 = vpop.f32.mrb[49].mxu0  ;;  %v7934_v39 = vpop.f32.mrb[41].mxu1 }
 0x85a   :  { %v7936_v52 = vpop.f32.mrb[50].mxu0  ;;  %v7938_v47 = vpop.f32.mrb[42].mxu1 }
 0x85b   :  { %v7940_v23 = vpop.f32.mrb[51].mxu0  ;;  %v7942_v8 = vpop.f32.mrb[43].mxu1 }
 0x860   :  { %v7944_v16 = vpop.f32.mrb[52].mxu0 }
 0x861   :  { %v7946_v49 = vpop.f32.mrb[53].mxu0 }
 0x862   :  { %v7948_v12 = vpop.f32.mrb[54].mxu0 }
 0x863   :  { %v6740_v40 = vpop.eup %6739  ;;  %v7950_v41 = vpop.f32.mrb[55].mxu0 }
 0x864   :  { %v2547_v44 = vmul.f32 %v6740_v40, %v2546_v19  ;;  %v8042_v19 = vrot.slane %v5302_v35, %v76_v3  ;;  %v2781_v40 = vadd.f32 %v7928_v57, %v8034_v60 }
 0x866   :  { %v2549_v45 = vadd.f32 %v2548_v54, %v2547_v44  ;;  %v2783_v44 = vadd.f32 %v7932_v43, %v8042_v19  ;;  %v8051_v43 = vld [vmem:[%s8559_s4 + $0x1] ss:$0 sm:$0xff] }
 0x868   :  { %v2550_v56 = vpack.c.bf16 %v2549_v45, %v2549_v45  ;;  %v7953_v48 = vpop.f32.mrb[56].mxu0 }
 0x869   :  { %v7955_v50 = vpop.f32.mrb[57].mxu0 }
 0x86a   :  { %v2552_v62 = vrot.slane %v2550_v56, 4  ;;  %v7957_v20 = vpop.f32.mrb[58].mxu0 }
 0x86b   :  { %v7959_v13 = vpop.f32.mrb[59].mxu0 }
 0x86c   :  { %2554 = vst [vmem:[#allocation2 + $0x18] sm:$0xf0] %v2552_v62 }
 0x873   :  { %v2568_v10 = vld [vmem:[#allocation2 + $0x18] sm:$0xff] }
 0x874   :  { %2809 = vmatmul.mubr.bf16.gmra.mrb[60].mxu0 %v2568_v10  ;;  %6203 = vmatmul.mubr.bf16.gmra.mrb[44].mxu1 %v2568_v10 }
 0x875   :  { %3101 = vmatprep.mubr.bf16.mxu0 %v6839_v1  ;;  %6222 = vmatprep.mubr.msk.bf16.mxu1 %vm6841_vm0, %v6840_v36 }
 0x87c   :  { %3102 = vmatmul.mubr.bf16.vlgmr.msra.gmra.mrb[64].mxu0 %v6839_v1  ;;  %6223 = vmatmul.mubr.bf16.vlgmr.msra.gmra.mrb[48].mxu1 %v6839_v1 }
 0x87d   :  { %3338 = vmatpush1.bf16.msra.mxu0 %v7801_v29  ;;  %3369 = vmatprep.mubr.bf16.mxu0 %v6839_v1 }
 0x87e   :  { %3339 = vmatprep.subr.bf16.mxu0 %v7808_v31  ;;  %6242 = vmatprep.mubr.msk.bf16.mxu1 %vm6841_vm0, %v6840_v36 }
 0x87f   :  { %6227 = vmatpush3.bf16.msra.mxu1 %v6581_v24 }
 0x880   :  { %6228 = vmatprep.subr.bf16.mxu1 %v6840_v36 }
 0x881   :  { %3340 = vmatpush1.bf16.msra.mxu0 %v7813_v34 }
 0x882   :  { %3341 = vmatprep.subr.bf16.mxu0 %v7820_v37 }
 0x883   :  { %6229 = vmatpush3.bf16.msra.mxu1 %v6582_v4 }
 0x884   :  { %6230 = vmatprep.subr.bf16.mxu1 %v6840_v36 }
 0x885   :  { %3342 = vmatpush1.bf16.msra.mxu0 %v7825_v6 }
 0x886   :  { %3343 = vmatprep.subr.bf16.mxu0 %v7832_v7 }
 0x887   :  { %6231 = vmatpush3.bf16.msra.mxu1 %v6583_v38 }
 0x888   :  { %6232 = vmatprep.subr.bf16.mxu1 %v6840_v36 }
 0x889   :  { %3344 = vmatpush1.bf16.msra.mxu0 %v7837_v46 }
 0x88a   :  { %3345 = vmatprep.subr.bf16.mxu0 %v7844_v51 }
 0x88b   :  { %6233 = vmatpush3.bf16.msra.mxu1 %v6584_v18 }
 0x88c   :  { %6234 = vmatprep.subr.bf16.mxu1 %v6840_v36 }
 0x88d   :  { %3346 = vmatpush1.bf16.msra.mxu0 %v7849_v59 }
 0x88e   :  { %3347 = vmatprep.subr.bf16.mxu0 %v7854_v9 }
 0x88f   :  { %6235 = vmatpush3.bf16.msra.mxu1 %v6585_v27 }
 0x890   :  { %6236 = vmatprep.subr.bf16.mxu1 %v6840_v36 }
 0x891   :  { %3348 = vmatpush1.bf16.msra.mxu0 %v7861_v22 }
 0x892   :  { %3349 = vmatprep.subr.bf16.mxu0 %v7868_v2 }
 0x893   :  { %6237 = vmatpush3.bf16.msra.mxu1 %v6586_v33 }
 0x894   :  { %6238 = vmatprep.subr.bf16.mxu1 %v6840_v36 }
 0x895   :  { %3350 = vmatpush1.bf16.msra.mxu0 %v7876_v21 }
 0x896   :  { %3351 = vmatprep.subr.bf16.mxu0 %v7881_v15 }
 0x897   :  { %6239 = vmatpush3.bf16.msra.mxu1 %v6587_v30 }
 0x898   :  { %6240 = vmatprep.subr.bf16.mxu1 %v6840_v36 }
 0x899   :  { %3352 = vmatpush1.bf16.msra.mxu0 %v7891_v17 }
 0x89a   :  { %3606 = vmatprep.subr.bf16.mxu0 %v7796_v25 }
 0x89b   :  { %6241 = vmatpush3.bf16.msra.mxu1 %v6588_v5  ;;  %v8055_v5 = vrot.slane %v5302_v35, %v80_v11  ;;  %v6589_v11 = vld [vmem:[%s8557_s2 + $0xc8] ss:$12 sps:$4 sm:$0xff]   ;;  %v6591_v35 = vld [vmem:[%s8557_s2 + $0xf8] ss:$12 sps:$4 sm:$0xff]  }
 0x89c   :  { %6246 = vmatprep.subr.bf16.mxu1 %v6840_v36 }
 0x947   :  { %v8020_v32 = vpop.f32.mrb[60].mxu0  ;;  %v8022_v42 = vpop.f32.mrb[44].mxu1 }
 0x948   :  { %v8024_v53 = vpop.f32.mrb[61].mxu0  ;;  %v8026_v58 = vpop.f32.mrb[45].mxu1 }
 0x949   :  { %v8028_v55 = vpop.f32.mrb[62].mxu0  ;;  %v8030_v26 = vpop.f32.mrb[46].mxu1 }
 0x94a   :  { %v8036_v28 = vpop.f32.mrb[63].mxu0  ;;  %v8038_v14 = vpop.f32.mrb[47].mxu1 }
 0x94f   :  { %v3103_v54 = vpop.f32.mrb[64].mxu0  ;;  %v3144_v45 = vpop.f32.mrb[48].mxu1 }
 0x950   :  { %v3153_v56 = vadd.f32 %v3103_v54, %v2781_v40  ;;  %v3105_v62 = vpop.f32.mrb[65].mxu0  ;;  %v6224_v0 = vpop.f32.mrb[49].mxu1 }
 0x951   :  { %v3160_v10 = vadd.f32 %v3105_v62, %v2783_v44  ;;  %v3107_v24 = vpop.f32.mrb[66].mxu0  ;;  %v3147_v4 = vpop.f32.mrb[50].mxu1  ;;  %v3167_v44 = vadd.f32 %v8051_v43, %v3144_v45  ;;  %v6593_v45 = vld [vmem:[%s8557_s2 + $0x128] ss:$12 sps:$4 sm:$0xff]  }
 0x952   :  { %v5415_v38 = vmul.f32 -1.442695, %v3153_v56  ;;  %v3108_v18 = vpop.f32.mrb[67].mxu0  ;;  %v6225_v27 = vpop.f32.mrb[51].mxu1  ;;  %v2854_v56 = vadd.f32 %v7934_v39, %v8055_v5  ;;  %v6590_v39 = vld [vmem:[%s8557_s2 + $0xe0] ss:$12 sps:$4 sm:$0xff]  }
 0x953   :  { %v5416_v3 = vmul.f32 -1.442695, %v3160_v10 }
 0x954   :  { %6741 = vpow2.f32 %v5415_v38 }
 0x955   :  { %6743 = vpow2.f32 %v5416_v3  ;;  %v6594_v3 = vld [vmem:[%s8557_s2 + $0x140] ss:$12 sps:$4 sm:$0xff]  }
 0x95e   :  { %v6742_v33 = vpop.eup %6741 }
 0x95f   :  { %v3157_v30 = vadd.f32 1.0, %v6742_v33  ;;  %v6744_v57 = vpop.eup %6743  ;;  %v6595_v33 = vld [vmem:[%s8557_s2 + $0x158] ss:$12 sps:$4 sm:$0xff]  }
 0x960   :  { %v3164_v40 = vadd.f32 1.0, %v6744_v57  ;;  %v2785_v57 = vadd.f32 %v7936_v52, %v8034_v60 }
 0x961   :  { %6745 = vrcp.f32 %v3157_v30  ;;  %v6596_v30 = vld [vmem:[%s8557_s2 + $0x170] ss:$12 sps:$4 sm:$0xff]  }
 0x962   :  { %6747 = vrcp.f32 %v3164_v40  ;;  %v2787_v40 = vadd.f32 %v7940_v23, %v8042_v19 }
 0x96b   :  { %v6746_v54 = vpop.eup %6745 }
 0x96c   :  { %v3168_v62 = vmul.f32 %v6746_v54, %v3167_v44  ;;  %v6748_v10 = vpop.eup %6747 }
 0x96d   :  { %v3171_v24 = vsub.f32 1.0, %v6748_v10  ;;  %v3173_v18 = vmul.f32 0.0, %v6748_v10 }
 0x96e   :  { %v3169_v0 = vadd.f32 %v3168_v62, %v2854_v56 }
 0x970   :  { %6749 = vtanh.f32 %v3169_v0 }
 0x97a   :  { %v6750_v4 = vpop.eup %6749 }
 0x97b   :  { %v3172_v38 = vmul.f32 %v6750_v4, %v3171_v24 }
 0x97d   :  { %v8060_v27 = vadd.f32 %v3173_v18, %v3172_v38 }
 0x97f   :  { %3175 = vst [vmem:[%s8560_s5] sm:$0xff] %v8060_v27  ;;  %v3176_v63 = vpack.c.bf16 %v8060_v27, %v8060_v27 }
 0x981   :  { %3370 = vmatmul.mubr.bf16.vlgmr.msra.gmra.mrb[68].mxu0 %v3176_v63  ;;  %6243 = vmatmul.mubr.bf16.vlgmr.msra.gmra.mrb[52].mxu1 %v3176_v63 }
 0x982   :  { %3607 = vmatpush1.bf16.msra.mxu0 %v7801_v29  ;;  %3638 = vmatprep.mubr.bf16.mxu0 %v6839_v1 }
 0x983   :  { %3608 = vmatprep.subr.bf16.mxu0 %v7808_v31  ;;  %6262 = vmatprep.mubr.msk.bf16.mxu1 %vm6841_vm0, %v6840_v36 }
 0x984   :  { %6247 = vmatpush3.bf16.msra.mxu1 %v6589_v11 }
 0x985   :  { %6248 = vmatprep.subr.bf16.mxu1 %v6840_v36 }
 0x986   :  { %3609 = vmatpush1.bf16.msra.mxu0 %v7813_v34 }
 0x987   :  { %3610 = vmatprep.subr.bf16.mxu0 %v7820_v37 }
 0x988   :  { %6249 = vmatpush3.bf16.msra.mxu1 %v6590_v39 }
 0x989   :  { %6250 = vmatprep.subr.bf16.mxu1 %v6840_v36 }
 0x98a   :  { %3611 = vmatpush1.bf16.msra.mxu0 %v7825_v6 }
 0x98b   :  { %3612 = vmatprep.subr.bf16.mxu0 %v7832_v7 }
 0x98c   :  { %6251 = vmatpush3.bf16.msra.mxu1 %v6591_v35 }
 0x98d   :  { %6252 = vmatprep.subr.bf16.mxu1 %v6840_v36 }
 0x98e   :  { %3613 = vmatpush1.bf16.msra.mxu0 %v7837_v46 }
 0x98f   :  { %3614 = vmatprep.subr.bf16.mxu0 %v7844_v51 }
 0x992   :  { %3615 = vmatpush1.bf16.msra.mxu0 %v7849_v59 }
 0x993   :  { %3616 = vmatprep.subr.bf16.mxu0 %v7854_v9 }
 0x996   :  { %3617 = vmatpush1.bf16.msra.mxu0 %v7861_v22 }
 0x997   :  { %3618 = vmatprep.subr.bf16.mxu0 %v7868_v2 }
 0x99a   :  { %3619 = vmatpush1.bf16.msra.mxu0 %v7876_v21 }
 0x99b   :  { %3620 = vmatprep.subr.bf16.mxu0 %v7881_v15 }
 0x99e   :  { %3621 = vmatpush1.bf16.msra.mxu0 %v7891_v17 }
 0x99f   :  { %3875 = vmatprep.subr.bf16.mxu0 %v7796_v25  ;;  %v6592_v25 = vld [vmem:[%s8557_s2 + $0x110] ss:$12 sps:$4 sm:$0xff]  }
 0x9a0   :  { %6253 = vmatpush3.bf16.msra.mxu1 %v6592_v25 }
 0x9a1   :  { %6254 = vmatprep.subr.bf16.mxu1 %v6840_v36 }
 0x9a4   :  { %6255 = vmatpush3.bf16.msra.mxu1 %v6593_v45 }
 0x9a5   :  { %6256 = vmatprep.subr.bf16.mxu1 %v6840_v36 }
 0x9a8   :  { %6257 = vmatpush3.bf16.msra.mxu1 %v6594_v3  ;;  %v2857_v3 = vadd.f32 %v7942_v8, %v8055_v5 }
 0x9a9   :  { %6258 = vmatprep.subr.bf16.mxu1 %v6840_v36 }
 0x9ac   :  { %6259 = vmatpush3.bf16.msra.mxu1 %v6595_v33 }
 0x9ad   :  { %6260 = vmatprep.subr.bf16.mxu1 %v6840_v36 }
 0x9b0   :  { %6261 = vmatpush3.bf16.msra.mxu1 %v6596_v30 }
 0x9b1   :  { %6266 = vmatprep.subr.bf16.mxu1 %v6840_v36 }
 0xa54   :  { %v3371_v44 = vpop.f32.mrb[68].mxu0  ;;  %v3412_v54 = vpop.f32.mrb[52].mxu1 }
 0xa55   :  { %v3421_v56 = vadd.f32 %v3371_v44, %v2785_v57  ;;  %v3373_v62 = vpop.f32.mrb[69].mxu0  ;;  %v6244_v0 = vpop.f32.mrb[53].mxu1  ;;  %v3435_v23 = vadd.f32 %v8051_v43, %v3412_v54 }
 0xa56   :  { %v3428_v10 = vadd.f32 %v3373_v62, %v2787_v40  ;;  %v3375_v24 = vpop.f32.mrb[70].mxu0  ;;  %v3415_v4 = vpop.f32.mrb[54].mxu1 }
 0xa57   :  { %v5473_v38 = vmul.f32 -1.442695, %v3421_v56  ;;  %v3376_v18 = vpop.f32.mrb[71].mxu0  ;;  %v6245_v63 = vpop.f32.mrb[55].mxu1 }
 0xa58   :  { %v5474_v11 = vmul.f32 -1.442695, %v3428_v10 }
 0xa59   :  { %6751 = vpow2.f32 %v5473_v38 }
 0xa5a   :  { %6753 = vpow2.f32 %v5474_v11 }
 0xa63   :  { %v6752_v39 = vpop.eup %6751 }
 0xa64   :  { %v3425_v35 = vadd.f32 1.0, %v6752_v39  ;;  %v6754_v52 = vpop.eup %6753 }
 0xa65   :  { %v3432_v25 = vadd.f32 1.0, %v6754_v52  ;;  %v2862_v52 = vadd.f32 %v7930_v61, %v8055_v5 }
 0xa66   :  { %6755 = vrcp.f32 %v3425_v35 }
 0xa67   :  { %6757 = vrcp.f32 %v3432_v25 }
 0xa70   :  { %v6756_v45 = vpop.eup %6755 }
 0xa71   :  { %v3436_v33 = vmul.f32 %v6756_v45, %v3435_v23  ;;  %v6758_v57 = vpop.eup %6757 }
 0xa72   :  { %v3439_v40 = vsub.f32 1.0, %v6758_v57  ;;  %v3441_v62 = vmul.f32 %v6758_v57, %v8060_v27 }
 0xa73   :  { %v3437_v30 = vadd.f32 %v3436_v33, %v2857_v3 }
 0xa75   :  { %6759 = vtanh.f32 %v3437_v30 }
 0xa7f   :  { %v6760_v44 = vpop.eup %6759 }
 0xa80   :  { %v3440_v56 = vmul.f32 %v6760_v44, %v3439_v40  ;;  %v8207_v44 = vld [vmem:[%s8557_s2 + $0xc4] ss:$12 sps:$4 sm:$0xff]  }
 0xa82   :  { %v8127_v0 = vadd.f32 %v3441_v62, %v3440_v56  ;;  %v8212_v56 = vld [vmem:[%s8557_s2 + $0xc0] ss:$12 sps:$4 sm:$0xff]   ;;  %v6608_v62 = vld [vmem:[%s8557_s2 + $0xc8] ss:$12 sps:$4 sm:$0xff]  }
 0xa84   :  { %5475 = vst [vmem:[%s8560_s5 + $0x8] sm:$0xff] %v8127_v0  ;;  %v3445_v8 = vpack.c.bf16 %v8127_v0, %v8127_v0 }
 0xa86   :  { %3639 = vmatmul.mubr.bf16.vlgmr.msra.gmra.mrb[72].mxu0 %v3445_v8  ;;  %6263 = vmatmul.mubr.bf16.vlgmr.msra.gmra.mrb[56].mxu1 %v3445_v8  ;;  %v8228_v8 = vld [vmem:[%s8557_s2 + $0xd8] ss:$12 sps:$4 sm:$0xff]  }
 0xa87   :  { %3876 = vmatpush1.bf16.msra.mxu0 %v7801_v29  ;;  %3907 = vmatprep.mubr.bf16.mxu0 %v6839_v1  ;;  %v6597_v29 = vld [vmem:[%s8557_s2 + $0xc8] ss:$12 sps:$4 sm:$0xff]  }
 0xa88   :  { %3877 = vmatprep.subr.bf16.mxu0 %v7808_v31  ;;  %6282 = vmatprep.mubr.msk.bf16.mxu1 %vm6841_vm0, %v6840_v36  ;;  %v6598_v31 = vld [vmem:[%s8557_s2 + $0xe0] ss:$12 sps:$4 sm:$0xff]  }
 0xa89   :  { %6267 = vmatpush3.bf16.msra.mxu1 %v6597_v29  ;;  %v6612_v29 = vld [vmem:[%s8557_s2 + $0xe0] ss:$12 sps:$4 sm:$0xff]  }
 0xa8a   :  { %6268 = vmatprep.subr.bf16.mxu1 %v6840_v36 }
 0xa8b   :  { %3878 = vmatpush1.bf16.msra.mxu0 %v7813_v34  ;;  %v6599_v34 = vld [vmem:[%s8557_s2 + $0xf8] ss:$12 sps:$4 sm:$0xff]  }
 0xa8c   :  { %3879 = vmatprep.subr.bf16.mxu0 %v7820_v37  ;;  %v6600_v37 = vld [vmem:[%s8557_s2 + $0x110] ss:$12 sps:$4 sm:$0xff]  }
 0xa8d   :  { %6269 = vmatpush3.bf16.msra.mxu1 %v6598_v31  ;;  %v8238_v31 = vld [vmem:[%s8557_s2 + $0xf4] ss:$12 sps:$4 sm:$0xff]  }
 0xa8e   :  { %6270 = vmatprep.subr.bf16.mxu1 %v6840_v36 }
 0xa8f   :  { %3880 = vmatpush1.bf16.msra.mxu0 %v7825_v6  ;;  %v6601_v6 = vld [vmem:[%s8557_s2 + $0x128] ss:$12 sps:$4 sm:$0xff]  }
 0xa90   :  { %3881 = vmatprep.subr.bf16.mxu0 %v7832_v7  ;;  %v6602_v7 = vld [vmem:[%s8557_s2 + $0x140] ss:$12 sps:$4 sm:$0xff]  }
 0xa91   :  { %6271 = vmatpush3.bf16.msra.mxu1 %v6599_v34  ;;  %v8244_v34 = vld [vmem:[%s8557_s2 + $0xf0] ss:$12 sps:$4 sm:$0xff]  }
 0xa92   :  { %6272 = vmatprep.subr.bf16.mxu1 %v6840_v36 }
 0xa93   :  { %3882 = vmatpush1.bf16.msra.mxu0 %v7837_v46  ;;  %v6603_v46 = vld [vmem:[%s8557_s2 + $0x158] ss:$12 sps:$4 sm:$0xff]  }
 0xa94   :  { %3883 = vmatprep.subr.bf16.mxu0 %v7844_v51  ;;  %v6604_v51 = vld [vmem:[%s8557_s2 + $0x170] ss:$12 sps:$4 sm:$0xff]  }
 0xa95   :  { %6273 = vmatpush3.bf16.msra.mxu1 %v6600_v37  ;;  %v6616_v37 = vld [vmem:[%s8557_s2 + $0xf8] ss:$12 sps:$4 sm:$0xff]  }
 0xa96   :  { %6274 = vmatprep.subr.bf16.mxu1 %v6840_v36 }
 0xa97   :  { %3884 = vmatpush1.bf16.msra.mxu0 %v7849_v59  ;;  %v2791_v59 = vadd.f32 %v7944_v16, %v8034_v60 }
 0xa98   :  { %3885 = vmatprep.subr.bf16.mxu0 %v7854_v9  ;;  %v2793_v9 = vadd.f32 %v7946_v49, %v8042_v19 }
 0xa99   :  { %6275 = vmatpush3.bf16.msra.mxu1 %v6601_v6  ;;  %v8254_v6 = vld [vmem:[%s8557_s2 + $0x10c] ss:$12 sps:$4 sm:$0xff]  }
 0xa9a   :  { %6276 = vmatprep.subr.bf16.mxu1 %v6840_v36 }
 0xa9b   :  { %3886 = vmatpush1.bf16.msra.mxu0 %v7861_v22 }
 0xa9c   :  { %3887 = vmatprep.subr.bf16.mxu0 %v7868_v2 }
 0xa9d   :  { %6277 = vmatpush3.bf16.msra.mxu1 %v6602_v7  ;;  %v8260_v7 = vld [vmem:[%s8557_s2 + $0x108] ss:$12 sps:$4 sm:$0xff]  }
 0xa9e   :  { %6278 = vmatprep.subr.bf16.mxu1 %v6840_v36 }
 0xa9f   :  { %3888 = vmatpush1.bf16.msra.mxu0 %v7876_v21 }
 0xaa0   :  { %3889 = vmatprep.subr.bf16.mxu0 %v7881_v15 }
 0xaa1   :  { %6279 = vmatpush3.bf16.msra.mxu1 %v6603_v46  ;;  %v6620_v46 = vld [vmem:[%s8557_s2 + $0x110] ss:$12 sps:$4 sm:$0xff]  }
 0xaa2   :  { %6280 = vmatprep.subr.bf16.mxu1 %v6840_v36 }
 0xaa3   :  { %3890 = vmatpush1.bf16.msra.mxu0 %v7891_v17 }
 0xaa4   :  { %4144 = vmatprep.subr.bf16.mxu0 %v8207_v44 }
 0xaa5   :  { %6281 = vmatpush3.bf16.msra.mxu1 %v6604_v51  ;;  %v8270_v51 = vld [vmem:[%s8557_s2 + $0x120] ss:$12 sps:$4 sm:$0xff]  }
 0xaa6   :  { %6286 = vmatprep.subr.bf16.mxu1 %v6840_v36 }
 0xb59   :  { %v3640_v22 = vpop.f32.mrb[72].mxu0  ;;  %v3681_v2 = vpop.f32.mrb[56].mxu1 }
 0xb5a   :  { %v3690_v21 = vadd.f32 %v3640_v22, %v2791_v59  ;;  %v3642_v15 = vpop.f32.mrb[73].mxu0  ;;  %v6264_v17 = vpop.f32.mrb[57].mxu1  ;;  %v3704_v49 = vadd.f32 %v8051_v43, %v3681_v2  ;;  %v8275_v59 = vld [vmem:[%s8557_s2 + $0x124] ss:$12 sps:$4 sm:$0xff]   ;;  %v8284_v22 = vld [vmem:[%s8557_s2 + $0x13c] ss:$12 sps:$4 sm:$0xff]  }
 0xb5b   :  { %v3697_v27 = vadd.f32 %v3642_v15, %v2793_v9  ;;  %v3644_v54 = vpop.f32.mrb[74].mxu0  ;;  %v3684_v10 = vpop.f32.mrb[58].mxu1  ;;  %v6624_v9 = vld [vmem:[%s8557_s2 + $0x128] ss:$12 sps:$4 sm:$0xff]   ;;  %v8291_v2 = vld [vmem:[%s8557_s2 + $0x138] ss:$12 sps:$4 sm:$0xff]  }
 0xb5c   :  { %v5532_v24 = vmul.f32 -1.442695, %v3690_v21  ;;  %v3645_v4 = vpop.f32.mrb[75].mxu0  ;;  %v6265_v38 = vpop.f32.mrb[59].mxu1  ;;  %v6628_v21 = vld [vmem:[%s8557_s2 + $0x140] ss:$12 sps:$4 sm:$0xff]  }
 0xb5d   :  { %v5533_v18 = vmul.f32 -1.442695, %v3697_v27  ;;  %v8301_v15 = vld [vmem:[%s8557_s2 + $0x154] ss:$12 sps:$4 sm:$0xff]   ;;  %v8307_v17 = vld [vmem:[%s8557_s2 + $0x150] ss:$12 sps:$4 sm:$0xff]   ;;  %v2795_v4 = vadd.f32 %v7948_v12, %v8034_v60  ;;  %v2797_v38 = vadd.f32 %v7950_v41, %v8042_v19 }
 0xb5e   :  { %6761 = vpow2.f32 %v5532_v24  ;;  %v6632_v27 = vld [vmem:[%s8557_s2 + $0x158] ss:$12 sps:$4 sm:$0xff]   ;;  %v8323_v10 = vld [vmem:[%s8557_s2 + $0x168] ss:$12 sps:$4 sm:$0xff]   ;;  %v6636_v24 = vld [vmem:[%s8557_s2 + $0x170] ss:$12 sps:$4 sm:$0xff]  }
 0xb5f   :  { %6763 = vpow2.f32 %v5533_v18  ;;  %v8317_v54 = vld [vmem:[%s8557_s2 + $0x16c] ss:$12 sps:$4 sm:$0xff]  }
 0xb68   :  { %v6762_v63 = vpop.eup %6761 }
 0xb69   :  { %v3694_v11 = vadd.f32 1.0, %v6762_v63  ;;  %v6764_v16 = vpop.eup %6763 }
 0xb6a   :  { %v3701_v39 = vadd.f32 1.0, %v6764_v16 }
 0xb6b   :  { %6765 = vrcp.f32 %v3694_v11 }
 0xb6c   :  { %6767 = vrcp.f32 %v3701_v39 }
 0xb75   :  { %v6766_v35 = vpop.eup %6765 }
 0xb76   :  { %v3705_v25 = vmul.f32 %v6766_v35, %v3704_v49  ;;  %v6768_v45 = vpop.eup %6767 }
 0xb77   :  { %v3708_v3 = vsub.f32 1.0, %v6768_v45  ;;  %v3710_v57 = vmul.f32 %v6768_v45, %v8127_v0  ;;  %v8222_v0 = vld [vmem:[%s8557_s2 + $0xdc] ss:$12 sps:$4 sm:$0xff]  }
 0xb78   :  { %v3706_v23 = vadd.f32 %v3705_v25, %v2862_v52 }
 0xb7a   :  { %6769 = vtanh.f32 %v3706_v23 }
 0xb84   :  { %v6770_v33 = vpop.eup %6769 }
 0xb85   :  { %v3709_v30 = vmul.f32 %v6770_v33, %v3708_v3 }
 0xb87   :  { %v8193_v40 = vadd.f32 %v3710_v57, %v3709_v30 }
 0xb89   :  { %5534 = vst [vmem:[%s8560_s5 + $0x10] sm:$0xff] %v8193_v40  ;;  %v3714_v61 = vpack.c.bf16 %v8193_v40, %v8193_v40 }
 0xb8b   :  { %3908 = vmatmul.mubr.bf16.vlgmr.msra.gmra.mrb[76].mxu0 %v3714_v61  ;;  %6283 = vmatmul.mubr.bf16.vlgmr.msra.gmra.mrb[60].mxu1 %v3714_v61 }
 0xb8c   :  { %4176 = vmatprep.mubr.bf16.mxu0 %v6839_v1  ;;  %6302 = vmatprep.mubr.msk.bf16.mxu1 %vm6841_vm0, %v6840_v36 }
 0xb8d   :  { %4145 = vmatpush1.bf16.msra.mxu0 %v8212_v56  ;;  %6287 = vmatpush3.bf16.msra.mxu1 %v6608_v62  ;;  %v2865_v62 = vadd.f32 %v7938_v47, %v8055_v5 }
 0xb8e   :  { %6288 = vmatprep.subr.bf16.mxu1 %v6840_v36  ;;  %4146 = vmatprep.subr.bf16.mxu0 %v8222_v0 }
 0xb91   :  { %4147 = vmatpush1.bf16.msra.mxu0 %v8228_v8  ;;  %6289 = vmatpush3.bf16.msra.mxu1 %v6612_v29 }
 0xb92   :  { %6290 = vmatprep.subr.bf16.mxu1 %v6840_v36  ;;  %4148 = vmatprep.subr.bf16.mxu0 %v8238_v31 }
 0xb95   :  { %4149 = vmatpush1.bf16.msra.mxu0 %v8244_v34  ;;  %6291 = vmatpush3.bf16.msra.mxu1 %v6616_v37 }
 0xb96   :  { %6292 = vmatprep.subr.bf16.mxu1 %v6840_v36  ;;  %4150 = vmatprep.subr.bf16.mxu0 %v8254_v6 }
 0xb99   :  { %4151 = vmatpush1.bf16.msra.mxu0 %v8260_v7  ;;  %6293 = vmatpush3.bf16.msra.mxu1 %v6620_v46 }
 0xb9a   :  { %6294 = vmatprep.subr.bf16.mxu1 %v6840_v36  ;;  %4152 = vmatprep.subr.bf16.mxu0 %v8275_v59 }
 0xb9d   :  { %4153 = vmatpush1.bf16.msra.mxu0 %v8270_v51  ;;  %6295 = vmatpush3.bf16.msra.mxu1 %v6624_v9 }
 0xb9e   :  { %4154 = vmatprep.subr.bf16.mxu0 %v8284_v22  ;;  %6296 = vmatprep.subr.bf16.mxu1 %v6840_v36 }
 0xba1   :  { %4155 = vmatpush1.bf16.msra.mxu0 %v8291_v2  ;;  %6297 = vmatpush3.bf16.msra.mxu1 %v6628_v21 }
 0xba2   :  { %4156 = vmatprep.subr.bf16.mxu0 %v8301_v15  ;;  %6298 = vmatprep.subr.bf16.mxu1 %v6840_v36 }
 0xba5   :  { %4157 = vmatpush1.bf16.msra.mxu0 %v8307_v17  ;;  %6299 = vmatpush3.bf16.msra.mxu1 %v6632_v27 }
 0xba6   :  { %4158 = vmatprep.subr.bf16.mxu0 %v8317_v54  ;;  %6300 = vmatprep.subr.bf16.mxu1 %v6840_v36 }
 0xba9   :  { %4159 = vmatpush1.bf16.msra.mxu0 %v8323_v10  ;;  %6301 = vmatpush3.bf16.msra.mxu1 %v6636_v24 }
 0xbaa   :  { %4413 = vmatprep.subr.bf16.mxu0 %v8207_v44  ;;  %6306 = vmatprep.subr.bf16.mxu1 %v6840_v36 }
 0xc5e   :  { %v3909_v18 = vpop.f32.mrb[76].mxu0  ;;  %v3950_v63 = vpop.f32.mrb[60].mxu1 }
 0xc5f   :  { %v3959_v11 = vadd.f32 %v3909_v18, %v2795_v4  ;;  %v3911_v16 = vpop.f32.mrb[77].mxu0  ;;  %v6284_v39 = vpop.f32.mrb[61].mxu1  ;;  %v3973_v41 = vadd.f32 %v8051_v43, %v3950_v63  ;;  %v6639_v18 = vld [vmem:[%s8557_s2 + $0xf8] ss:$12 sps:$4 sm:$0xff]   ;;  %v6640_v63 = vld [vmem:[%s8557_s2 + $0x110] ss:$12 sps:$4 sm:$0xff]  }
 0xc60   :  { %v3966_v49 = vadd.f32 %v3911_v16, %v2797_v38  ;;  %v3913_v35 = vpop.f32.mrb[78].mxu0  ;;  %v3953_v52 = vpop.f32.mrb[62].mxu1  ;;  %v6638_v38 = vld [vmem:[%s8557_s2 + $0xe0] ss:$12 sps:$4 sm:$0xff]   ;;  %v6643_v39 = vld [vmem:[%s8557_s2 + $0x158] ss:$12 sps:$4 sm:$0xff]  }
 0xc61   :  { %v5591_v25 = vmul.f32 -1.442695, %v3959_v11  ;;  %v3914_v23 = vpop.f32.mrb[79].mxu0  ;;  %v6285_v45 = vpop.f32.mrb[63].mxu1  ;;  %v6641_v11 = vld [vmem:[%s8557_s2 + $0x128] ss:$12 sps:$4 sm:$0xff]   ;;  %v2801_v35 = vadd.f32 %v7953_v48, %v8034_v60  ;;  %v2803_v52 = vadd.f32 %v7955_v50, %v8042_v19 }
 0xc62   :  { %v5592_v3 = vmul.f32 -1.442695, %v3966_v49  ;;  %v6642_v16 = vld [vmem:[%s8557_s2 + $0x140] ss:$12 sps:$4 sm:$0xff]   ;;  %v6644_v49 = vld [vmem:[%s8557_s2 + $0x170] ss:$12 sps:$4 sm:$0xff]  }
 0xc63   :  { %6771 = vpow2.f32 %v5591_v25 }
 0xc64   :  { %6773 = vpow2.f32 %v5592_v3 }
 0xc6d   :  { %v6772_v33 = vpop.eup %6771 }
 0xc6e   :  { %v3963_v30 = vadd.f32 1.0, %v6772_v33  ;;  %v6774_v12 = vpop.eup %6773 }
 0xc6f   :  { %v3970_v57 = vadd.f32 1.0, %v6774_v12 }
 0xc70   :  { %6775 = vrcp.f32 %v3963_v30 }
 0xc71   :  { %6777 = vrcp.f32 %v3970_v57 }
 0xc7a   :  { %v6776_v61 = vpop.eup %6775 }
 0xc7b   :  { %v3974_v29 = vmul.f32 %v6776_v61, %v3973_v41  ;;  %v6778_v46 = vpop.eup %6777 }
 0xc7c   :  { %v3977_v9 = vsub.f32 1.0, %v6778_v46  ;;  %v3979_v24 = vmul.f32 %v6778_v46, %v8193_v40  ;;  %v6637_v40 = vld [vmem:[%s8557_s2 + $0xc8] ss:$12 sps:$4 sm:$0xff]  }
 0xc7d   :  { %v3975_v37 = vadd.f32 %v3974_v29, %v2865_v62 }
 0xc7f   :  { %6779 = vtanh.f32 %v3975_v37 }
 0xc89   :  { %v6780_v21 = vpop.eup %6779 }
 0xc8a   :  { %v3978_v27 = vmul.f32 %v6780_v21, %v3977_v9 }
 0xc8c   :  { %v8341_v4 = vadd.f32 %v3979_v24, %v3978_v27  ;;  %v2870_v27 = vadd.f32 %v8026_v58, %v8055_v5 }
 0xc8e   :  { %5593 = vst [vmem:[%s8560_s5 + $0x18] sm:$0xff] %v8341_v4  ;;  %v3983_v47 = vpack.c.bf16 %v8341_v4, %v8341_v4 }
 0xc90   :  { %4177 = vmatmul.mubr.bf16.vlgmr.msra.gmra.mrb[80].mxu0 %v3983_v47  ;;  %6303 = vmatmul.mubr.bf16.vlgmr.msra.gmra.mrb[64].mxu1 %v3983_v47 }
 0xc91   :  { %4414 = vmatpush1.bf16.msra.mxu0 %v8212_v56  ;;  %4445 = vmatprep.mubr.bf16.mxu0 %v6839_v1 }
 0xc92   :  { %4415 = vmatprep.subr.bf16.mxu0 %v8222_v0  ;;  %6322 = vmatprep.mubr.msk.bf16.mxu1 %vm6841_vm0, %v6840_v36 }
 0xc93   :  { %6307 = vmatpush3.bf16.msra.mxu1 %v6637_v40 }
 0xc94   :  { %6308 = vmatprep.subr.bf16.mxu1 %v6840_v36 }
 0xc95   :  { %4416 = vmatpush1.bf16.msra.mxu0 %v8228_v8 }
 0xc96   :  { %4417 = vmatprep.subr.bf16.mxu0 %v8238_v31 }
 0xc97   :  { %6309 = vmatpush3.bf16.msra.mxu1 %v6638_v38 }
 0xc98   :  { %6310 = vmatprep.subr.bf16.mxu1 %v6840_v36 }
 0xc99   :  { %4418 = vmatpush1.bf16.msra.mxu0 %v8244_v34 }
 0xc9a   :  { %4419 = vmatprep.subr.bf16.mxu0 %v8254_v6 }
 0xc9b   :  { %6311 = vmatpush3.bf16.msra.mxu1 %v6639_v18 }
 0xc9c   :  { %6312 = vmatprep.subr.bf16.mxu1 %v6840_v36 }
 0xc9d   :  { %4420 = vmatpush1.bf16.msra.mxu0 %v8260_v7 }
 0xc9e   :  { %4421 = vmatprep.subr.bf16.mxu0 %v8275_v59 }
 0xc9f   :  { %6313 = vmatpush3.bf16.msra.mxu1 %v6640_v63 }
 0xca0   :  { %6314 = vmatprep.subr.bf16.mxu1 %v6840_v36 }
 0xca1   :  { %4422 = vmatpush1.bf16.msra.mxu0 %v8270_v51 }
 0xca2   :  { %4423 = vmatprep.subr.bf16.mxu0 %v8284_v22 }
 0xca3   :  { %6315 = vmatpush3.bf16.msra.mxu1 %v6641_v11 }
 0xca4   :  { %6316 = vmatprep.subr.bf16.mxu1 %v6840_v36 }
 0xca5   :  { %4424 = vmatpush1.bf16.msra.mxu0 %v8291_v2 }
 0xca6   :  { %4425 = vmatprep.subr.bf16.mxu0 %v8301_v15 }
 0xca7   :  { %6317 = vmatpush3.bf16.msra.mxu1 %v6642_v16 }
 0xca8   :  { %6318 = vmatprep.subr.bf16.mxu1 %v6840_v36 }
 0xca9   :  { %4426 = vmatpush1.bf16.msra.mxu0 %v8307_v17 }
 0xcaa   :  { %4427 = vmatprep.subr.bf16.mxu0 %v8317_v54 }
 0xcab   :  { %6319 = vmatpush3.bf16.msra.mxu1 %v6643_v39  ;;  %v6646_v39 = vld [vmem:[%s8557_s2 + $0xe0] ss:$12 sps:$4 sm:$0xff]  }
 0xcac   :  { %6320 = vmatprep.subr.bf16.mxu1 %v6840_v36 }
 0xcad   :  { %4428 = vmatpush1.bf16.msra.mxu0 %v8323_v10 }
 0xcae   :  { %4682 = vmatprep.subr.bf16.mxu0 %v8207_v44 }
 0xcaf   :  { %6321 = vmatpush3.bf16.msra.mxu1 %v6644_v49  ;;  %v6647_v49 = vld [vmem:[%s8557_s2 + $0xf8] ss:$12 sps:$4 sm:$0xff]  }
 0xcb0   :  { %6326 = vmatprep.subr.bf16.mxu1 %v6840_v36 }
 0xd63   :  { %v4178_v25 = vpop.f32.mrb[80].mxu0  ;;  %v4219_v23 = vpop.f32.mrb[64].mxu1 }
 0xd64   :  { %v4228_v45 = vadd.f32 %v4178_v25, %v2801_v35  ;;  %v4180_v3 = vpop.f32.mrb[81].mxu0  ;;  %v6304_v33 = vpop.f32.mrb[65].mxu1  ;;  %v4242_v50 = vadd.f32 %v8051_v43, %v4219_v23  ;;  %v6649_v35 = vld [vmem:[%s8557_s2 + $0x128] ss:$12 sps:$4 sm:$0xff]   ;;  %v6651_v25 = vld [vmem:[%s8557_s2 + $0x158] ss:$12 sps:$4 sm:$0xff]  }
 0xd65   :  { %v4235_v30 = vadd.f32 %v4180_v3, %v2803_v52  ;;  %v4182_v12 = vpop.f32.mrb[82].mxu0  ;;  %v4222_v57 = vpop.f32.mrb[66].mxu1  ;;  %v6650_v52 = vld [vmem:[%s8557_s2 + $0x140] ss:$12 sps:$4 sm:$0xff]   ;;  %v6652_v23 = vld [vmem:[%s8557_s2 + $0x170] ss:$12 sps:$4 sm:$0xff]   ;;  %v2807_v3 = vadd.f32 %v7959_v13, %v8042_v19 }
 0xd66   :  { %v5650_v41 = vmul.f32 -1.442695, %v4228_v45  ;;  %v4183_v61 = vpop.f32.mrb[83].mxu0  ;;  %v6305_v62 = vpop.f32.mrb[67].mxu1  ;;  %v2805_v45 = vadd.f32 %v7957_v20, %v8034_v60 }
 0xd67   :  { %v5651_v29 = vmul.f32 -1.442695, %v4235_v30 }
 0xd68   :  { %6781 = vpow2.f32 %v5650_v41 }
 0xd69   :  { %6783 = vpow2.f32 %v5651_v29 }
 0xd72   :  { %v6782_v37 = vpop.eup %6781 }
 0xd73   :  { %v4232_v46 = vadd.f32 1.0, %v6782_v37  ;;  %v6784_v48 = vpop.eup %6783 }
 0xd74   :  { %v4239_v9 = vadd.f32 1.0, %v6784_v48 }
 0xd75   :  { %6785 = vrcp.f32 %v4232_v46 }
 0xd76   :  { %6787 = vrcp.f32 %v4239_v9 }
 0xd7f   :  { %v6786_v21 = vpop.eup %6785 }
 0xd80   :  { %v4243_v24 = vmul.f32 %v6786_v21, %v4242_v50  ;;  %v6788_v40 = vpop.eup %6787 }
 0xd81   :  { %v4246_v38 = vsub.f32 1.0, %v6788_v40  ;;  %v4248_v11 = vmul.f32 %v6788_v40, %v8341_v4  ;;  %v6645_v4 = vld [vmem:[%s8557_s2 + $0xc8] ss:$12 sps:$4 sm:$0xff]  }
 0xd82   :  { %v4244_v47 = vadd.f32 %v4243_v24, %v2870_v27 }
 0xd84   :  { %6789 = vtanh.f32 %v4244_v47  ;;  %v2873_v47 = vadd.f32 %v8038_v14, %v8055_v5 }
 0xd8e   :  { %v6790_v18 = vpop.eup %6789 }
 0xd8f   :  { %v4247_v63 = vmul.f32 %v6790_v18, %v4246_v38 }
 0xd91   :  { %v8408_v16 = vadd.f32 %v4248_v11, %v4247_v63 }
 0xd93   :  { %5652 = vst [vmem:[%s8560_s5 + $0x20] sm:$0xff] %v8408_v16  ;;  %v4252_v58 = vpack.c.bf16 %v8408_v16, %v8408_v16 }
 0xd95   :  { %4446 = vmatmul.mubr.bf16.vlgmr.msra.gmra.mrb[84].mxu0 %v4252_v58  ;;  %6323 = vmatmul.mubr.bf16.vlgmr.msra.gmra.mrb[68].mxu1 %v4252_v58 }
 0xd96   :  { %4683 = vmatpush1.bf16.msra.mxu0 %v8212_v56  ;;  %4714 = vmatprep.mubr.bf16.mxu0 %v6839_v1 }
 0xd97   :  { %4684 = vmatprep.subr.bf16.mxu0 %v8222_v0  ;;  %6342 = vmatprep.mubr.msk.bf16.mxu1 %vm6841_vm0, %v6840_v36 }
 0xd98   :  { %6327 = vmatpush3.bf16.msra.mxu1 %v6645_v4 }
 0xd99   :  { %6328 = vmatprep.subr.bf16.mxu1 %v6840_v36 }
 0xd9a   :  { %4685 = vmatpush1.bf16.msra.mxu0 %v8228_v8 }
 0xd9b   :  { %4686 = vmatprep.subr.bf16.mxu0 %v8238_v31 }
 0xd9c   :  { %6329 = vmatpush3.bf16.msra.mxu1 %v6646_v39 }
 0xd9d   :  { %6330 = vmatprep.subr.bf16.mxu1 %v6840_v36 }
 0xd9e   :  { %4687 = vmatpush1.bf16.msra.mxu0 %v8244_v34 }
 0xd9f   :  { %4688 = vmatprep.subr.bf16.mxu0 %v8254_v6 }
 0xda0   :  { %6331 = vmatpush3.bf16.msra.mxu1 %v6647_v49 }
 0xda1   :  { %6332 = vmatprep.subr.bf16.mxu1 %v6840_v36 }
 0xda2   :  { %4689 = vmatpush1.bf16.msra.mxu0 %v8260_v7 }
 0xda3   :  { %4690 = vmatprep.subr.bf16.mxu0 %v8275_v59 }
 0xda6   :  { %4691 = vmatpush1.bf16.msra.mxu0 %v8270_v51 }
 0xda7   :  { %4692 = vmatprep.subr.bf16.mxu0 %v8284_v22 }
 0xdaa   :  { %4693 = vmatpush1.bf16.msra.mxu0 %v8291_v2 }
 0xdab   :  { %4694 = vmatprep.subr.bf16.mxu0 %v8301_v15 }
 0xdae   :  { %4695 = vmatpush1.bf16.msra.mxu0 %v8307_v17 }
 0xdaf   :  { %4696 = vmatprep.subr.bf16.mxu0 %v8317_v54 }
 0xdb2   :  { %4697 = vmatpush1.bf16.msra.mxu0 %v8323_v10 }
 0xdb3   :  { %4951 = vmatprep.subr.bf16.mxu0 %v8207_v44  ;;  %v6648_v44 = vld [vmem:[%s8557_s2 + $0x110] ss:$12 sps:$4 sm:$0xff]  }
 0xdb4   :  { %6333 = vmatpush3.bf16.msra.mxu1 %v6648_v44 }
 0xdb5   :  { %6334 = vmatprep.subr.bf16.mxu1 %v6840_v36 }
 0xdb8   :  { %6335 = vmatpush3.bf16.msra.mxu1 %v6649_v35 }
 0xdb9   :  { %6336 = vmatprep.subr.bf16.mxu1 %v6840_v36 }
 0xdbc   :  { %6337 = vmatpush3.bf16.msra.mxu1 %v6650_v52 }
 0xdbd   :  { %6338 = vmatprep.subr.bf16.mxu1 %v6840_v36 }
 0xdc0   :  { %6339 = vmatpush3.bf16.msra.mxu1 %v6651_v25 }
 0xdc1   :  { %6340 = vmatprep.subr.bf16.mxu1 %v6840_v36 }
 0xdc4   :  { %6341 = vmatpush3.bf16.msra.mxu1 %v6652_v23 }
 0xdc5   :  { %6346 = vmatprep.subr.bf16.mxu1 %v6840_v36 }
 0xe68   :  { %v4447_v33 = vpop.f32.mrb[84].mxu0  ;;  %v4488_v30 = vpop.f32.mrb[68].mxu1 }
 0xe69   :  { %v4497_v12 = vadd.f32 %v4447_v33, %v2805_v45  ;;  %v4449_v57 = vpop.f32.mrb[85].mxu0  ;;  %v6324_v41 = vpop.f32.mrb[69].mxu1  ;;  %v4511_v13 = vadd.f32 %v8051_v43, %v4488_v30  ;;  %v2878_v33 = vadd.f32 %v8022_v42, %v8055_v5  ;;  %v2815_v42 = vadd.f32 %v8028_v55, %v8034_v60 }
 0xe6a   :  { %v4504_v61 = vadd.f32 %v4449_v57, %v2807_v3  ;;  %v4451_v62 = vpop.f32.mrb[86].mxu0  ;;  %v4491_v29 = vpop.f32.mrb[70].mxu1 }
 0xe6b   :  { %v5709_v37 = vmul.f32 -1.442695, %v4497_v12  ;;  %v4452_v46 = vpop.f32.mrb[87].mxu0  ;;  %v6325_v48 = vpop.f32.mrb[71].mxu1 }
 0xe6c   :  { %v5710_v9 = vmul.f32 -1.442695, %v4504_v61  ;;  %v2817_v46 = vadd.f32 %v8036_v28, %v8042_v19  ;;  %v6838_v28 = vld [vmem:[%s8559_s4 + $0x1] ss:$0 sm:$0xff] }
 0xe6d   :  { %6791 = vpow2.f32 %v5709_v37 }
 0xe6e   :  { %6793 = vpow2.f32 %v5710_v9 }
 0xe77   :  { %v6792_v50 = vpop.eup %6791 }
 0xe78   :  { %v4501_v21 = vadd.f32 1.0, %v6792_v50  ;;  %v6794_v20 = vpop.eup %6793 }
 0xe79   :  { %v4508_v27 = vadd.f32 1.0, %v6794_v20 }
 0xe7a   :  { %6795 = vrcp.f32 %v4501_v21 }
 0xe7b   :  { %6797 = vrcp.f32 %v4508_v27 }
 0xe84   :  { %v6796_v24 = vpop.eup %6795 }
 0xe85   :  { %v4512_v40 = vmul.f32 %v6796_v24, %v4511_v13  ;;  %v6798_v18 = vpop.eup %6797 }
 0xe86   :  { %v4515_v63 = vsub.f32 1.0, %v6798_v18  ;;  %v4517_v4 = vmul.f32 %v6798_v18, %v8408_v16 }
 0xe87   :  { %v4513_v38 = vadd.f32 %v4512_v40, %v2873_v47 }
 0xe89   :  { %6799 = vtanh.f32 %v4513_v38 }
 0xe93   :  { %v6800_v11 = vpop.eup %6799 }
 0xe94   :  { %v4516_v58 = vmul.f32 %v6800_v11, %v4515_v63 }
 0xe96   :  { %v8475_v39 = vadd.f32 %v4517_v4, %v4516_v58  ;;  %v2881_v4 = vadd.f32 %v8030_v26, %v8055_v5 }
 0xe98   :  { %5711 = vst [vmem:[%s8560_s5 + $0x28] sm:$0xff] %v8475_v39  ;;  %v4521_v14 = vpack.c.bf16 %v8475_v39, %v8475_v39 }
 0xe9a   :  { %4715 = vmatmul.mubr.bf16.vlgmr.msra.gmra.mrb[88].mxu0 %v4521_v14  ;;  %6343 = vmatmul.mubr.bf16.vlgmr.msra.gmra.mrb[72].mxu1 %v4521_v14 }
 0xe9b   :  { %4952 = vmatpush1.bf16.msra.mxu0 %v8212_v56  ;;  %4983 = vmatprep.mubr.bf16.mxu0 %v6839_v1  ;;  %v6653_v1 = vld [vmem:[%s8557_s2 + $0xc8] ss:$12 sps:$4 sm:$0xff]   ;;  %v6654_v56 = vld [vmem:[%s8557_s2 + $0xe0] ss:$12 sps:$4 sm:$0xff]  }
 0xe9c   :  { %4953 = vmatprep.subr.bf16.mxu0 %v8222_v0  ;;  %6362 = vmatprep.mubr.msk.bf16.mxu1 %vm6841_vm0, %v6840_v36  ;;  %v6655_v0 = vld [vmem:[%s8557_s2 + $0xf8] ss:$12 sps:$4 sm:$0xff]  }
 0xe9d   :  { %6347 = vmatpush3.bf16.msra.mxu1 %v6653_v1 }
 0xe9e   :  { %6348 = vmatprep.subr.bf16.mxu1 %v6840_v36 }
 0xe9f   :  { %4954 = vmatpush1.bf16.msra.mxu0 %v8228_v8  ;;  %v6656_v8 = vld [vmem:[%s8557_s2 + $0x110] ss:$12 sps:$4 sm:$0xff]  }
 0xea0   :  { %4955 = vmatprep.subr.bf16.mxu0 %v8238_v31  ;;  %v6657_v31 = vld [vmem:[%s8557_s2 + $0x128] ss:$12 sps:$4 sm:$0xff]  }
 0xea1   :  { %6349 = vmatpush3.bf16.msra.mxu1 %v6654_v56 }
 0xea2   :  { %6350 = vmatprep.subr.bf16.mxu1 %v6840_v36 }
 0xea3   :  { %4956 = vmatpush1.bf16.msra.mxu0 %v8244_v34  ;;  %v6658_v34 = vld [vmem:[%s8557_s2 + $0x140] ss:$12 sps:$4 sm:$0xff]  }
 0xea4   :  { %4957 = vmatprep.subr.bf16.mxu0 %v8254_v6  ;;  %v6659_v6 = vld [vmem:[%s8557_s2 + $0x158] ss:$12 sps:$4 sm:$0xff]  }
 0xea5   :  { %6351 = vmatpush3.bf16.msra.mxu1 %v6655_v0 }
 0xea6   :  { %6352 = vmatprep.subr.bf16.mxu1 %v6840_v36 }
 0xea7   :  { %4958 = vmatpush1.bf16.msra.mxu0 %v8260_v7  ;;  %v6660_v7 = vld [vmem:[%s8557_s2 + $0x170] ss:$12 sps:$4 sm:$0xff]  }
 0xea8   :  { %4959 = vmatprep.subr.bf16.mxu0 %v8275_v59  ;;  %v2813_v59 = vadd.f32 %v8024_v53, %v8042_v19 }
 0xea9   :  { %6353 = vmatpush3.bf16.msra.mxu1 %v6656_v8 }
 0xeaa   :  { %6354 = vmatprep.subr.bf16.mxu1 %v6840_v36 }
 0xeab   :  { %4960 = vmatpush1.bf16.msra.mxu0 %v8270_v51  ;;  %v2811_v51 = vadd.f32 %v8020_v32, %v8034_v60 }
 0xeac   :  { %4961 = vmatprep.subr.bf16.mxu0 %v8284_v22 }
 0xead   :  { %6355 = vmatpush3.bf16.msra.mxu1 %v6657_v31 }
 0xeae   :  { %6356 = vmatprep.subr.bf16.mxu1 %v6840_v36 }
 0xeaf   :  { %4962 = vmatpush1.bf16.msra.mxu0 %v8291_v2 }
 0xeb0   :  { %4963 = vmatprep.subr.bf16.mxu0 %v8301_v15 }
 0xeb1   :  { %6357 = vmatpush3.bf16.msra.mxu1 %v6658_v34 }
 0xeb2   :  { %6358 = vmatprep.subr.bf16.mxu1 %v6840_v36 }
 0xeb3   :  { %4964 = vmatpush1.bf16.msra.mxu0 %v8307_v17 }
 0xeb4   :  { %4965 = vmatprep.subr.bf16.mxu0 %v8317_v54 }
 0xeb5   :  { %6359 = vmatpush3.bf16.msra.mxu1 %v6659_v6 }
 0xeb6   :  { %6360 = vmatprep.subr.bf16.mxu1 %v6840_v36 }
 0xeb7   :  { %4966 = vmatpush1.bf16.msra.mxu0 %v8323_v10 }
 0xeb9   :  { %6361 = vmatpush3.bf16.msra.mxu1 %v6660_v7 }
 0xf6d   :  { %v4716_v22 = vpop.f32.mrb[88].mxu0  ;;  %v4757_v2 = vpop.f32.mrb[72].mxu1 }
 0xf6e   :  { %v4766_v15 = vadd.f32 %v4716_v22, %v2811_v51  ;;  %v4718_v17 = vpop.f32.mrb[89].mxu0  ;;  %v6344_v54 = vpop.f32.mrb[73].mxu1  ;;  %v4780_v53 = vadd.f32 %v8051_v43, %v4757_v2 }
 0xf6f   :  { %v4773_v10 = vadd.f32 %v4718_v17, %v2813_v59  ;;  %v4720_v16 = vpop.f32.mrb[90].mxu0  ;;  %v4760_v49 = vpop.f32.mrb[74].mxu1 }
 0xf70   :  { %v5768_v44 = vmul.f32 -1.442695, %v4766_v15  ;;  %v4721_v35 = vpop.f32.mrb[91].mxu0  ;;  %v6345_v52 = vpop.f32.mrb[75].mxu1 }
 0xf71   :  { %v5769_v36 = vmul.f32 -1.442695, %v4773_v10 }
 0xf72   :  { %6801 = vpow2.f32 %v5768_v44 }
 0xf73   :  { %6803 = vpow2.f32 %v5769_v36 }
 0xf7c   :  { %v6802_v25 = vpop.eup %6801 }
 0xf7d   :  { %v4770_v23 = vadd.f32 1.0, %v6802_v25  ;;  %v6804_v32 = vpop.eup %6803 }
 0xf7e   :  { %v4777_v45 = vadd.f32 1.0, %v6804_v32 }
 0xf7f   :  { %6805 = vrcp.f32 %v4770_v23 }
 0xf80   :  { %6807 = vrcp.f32 %v4777_v45 }
 0xf89   :  { %v6806_v3 = vpop.eup %6805 }
 0xf8a   :  { %v4781_v30 = vmul.f32 %v6806_v3, %v4780_v53  ;;  %v6808_v57 = vpop.eup %6807 }
 0xf8b   :  { %v4784_v41 = vsub.f32 1.0, %v6808_v57  ;;  %v4786_v29 = vmul.f32 %v6808_v57, %v8475_v39 }
 0xf8c   :  { %v4782_v12 = vadd.f32 %v4781_v30, %v2878_v33 }
 0xf8e   :  { %6809 = vtanh.f32 %v4782_v12 }
 0xf98   :  { %v6810_v61 = vpop.eup %6809 }
 0xf99   :  { %v4785_v62 = vmul.f32 %v6810_v61, %v4784_v41 }
 0xf9b   :  { %v4787_v37 = vadd.f32 %v4786_v29, %v4785_v62 }
 0xf9d   :  { %5770 = vst [vmem:[%s8560_s5 + $0x30] sm:$0xff] %v4787_v37  ;;  %v4790_v43 = vpack.c.bf16 %v4787_v37, %v4787_v37 }
 0xf9f   :  { %4984 = vmatmul.mubr.bf16.vlgmr.msra.gmra.mrb[92].mxu0 %v4790_v43  ;;  %6363 = vmatmul.mubr.bf16.vlgmr.msra.gmra.mrb[76].mxu1 %v4790_v43 }
0x1072   :  { %v4985_v48 = vpop.f32.mrb[92].mxu0  ;;  %v5026_v9 = vpop.f32.mrb[76].mxu1 }
0x1073   :  { %v5035_v50 = vadd.f32 %v4985_v48, %v2815_v42  ;;  %v4987_v21 = vpop.f32.mrb[93].mxu0  ;;  %v6364_v20 = vpop.f32.mrb[77].mxu1  ;;  %v5049_v19 = vadd.f32 %v6838_v28, %v5026_v9 }
0x1074   :  { %v5042_v27 = vadd.f32 %v4987_v21, %v2817_v46  ;;  %v4989_v13 = vpop.f32.mrb[94].mxu0  ;;  %v5029_v24 = vpop.f32.mrb[78].mxu1 }
0x1075   :  { %v5827_v47 = vmul.f32 -1.442695, %v5035_v50  ;;  %v4990_v40 = vpop.f32.mrb[95].mxu0  ;;  %v6365_v38 = vpop.f32.mrb[79].mxu1 }
0x1076   :  { %v5828_v18 = vmul.f32 -1.442695, %v5042_v27 }
0x1077   :  { %6811 = vpow2.f32 %v5827_v47 }
0x1078   :  { %6813 = vpow2.f32 %v5828_v18 }
0x1081   :  { %v6812_v63 = vpop.eup %6811 }
0x1082   :  { %v5039_v11 = vadd.f32 1.0, %v6812_v63  ;;  %v6814_v55 = vpop.eup %6813 }
0x1083   :  { %v5046_v60 = vadd.f32 1.0, %v6814_v55 }
0x1084   :  { %6815 = vrcp.f32 %v5039_v11 }
0x1085   :  { %6817 = vrcp.f32 %v5046_v60 }
0x108e   :  { %v6816_v58 = vpop.eup %6815 }
0x108f   :  { %v5050_v39 = vmul.f32 %v6816_v58, %v5049_v19  ;;  %v6818_v1 = vpop.eup %6817 }
0x1090   :  { %v5053_v56 = vsub.f32 1.0, %v6818_v1  ;;  %v5055_v31 = vmul.f32 %v6818_v1, %v4787_v37 }
0x1091   :  { %v5051_v14 = vadd.f32 %v5050_v39, %v2881_v4 }
0x1093   :  { %6819 = vtanh.f32 %v5051_v14 }
0x109d   :  { %v6820_v0 = vpop.eup %6819 }
0x109e   :  { %v5054_v8 = vmul.f32 %v6820_v0, %v5053_v56 }
0x10a0   :  { %v5056_v34 = vadd.f32 %v5055_v31, %v5054_v8 }
0x10a2   :  { %5829 = vst [vmem:[%s8560_s5 + $0x38] sm:$0xff] %v5056_v34 }

</bundles_post_ra>
